<compile_context>
chip_gen: v6e
topology: v6e:2x2x1
jax: 0.10.0
libtpu: 0.0.40
codegen_flags: <defaults>
</compile_context>

<pallas_src>
import jax
import jax.numpy as jnp
from jax import lax
from jax.experimental import pallas as pl
from jax.experimental.pallas import tpu as pltpu

NEG_SLOPE = 0.01   # nn.LeakyReLU() default negative_slope
BN_EPS = 1e-5      # nn.BatchNorm3d default eps


# --------------------------- fused DownBlock forward ---------------------------

def downblock_forward(x_ncdhw, params):
    """MaxPool3d(2) -> [Conv3d(3) + BN + LeakyReLU] x2, fused in one Pallas kernel."""
    cp1, cp2 = params
    N, Cin, D, H, W = x_ncdhw.shape
    assert D % 2 == 0 and H % 2 == 0 and W % 2 == 0
    D2, H2, W2 = D // 2, H // 2, W // 2
    P2 = D2 * H2 * W2
    assert P2 % 128 == 0, "pooled volume must fill TPU lanes (multiple of 128)"
    C1 = cp1[0].shape[-1]
    C2 = cp2[0].shape[-1]
    Cbuf = max(8, -(-max(Cin, C1) // 8) * 8)        # pad channel rows to sublane multiple
    max_delta = H2 * W2 + W2 + 1                    # largest tap shift in flattened lanes
    PAD = -(-max_delta // 128) * 128                # lane-aligned halo
    BUF_LEN = PAD + P2 + PAD

    # ---- layout plumbing: put the 8 pooling taps on a leading axis, pooled volume on lanes ----
    x8 = x_ncdhw.reshape(N, Cin, D2, 2, H2, 2, W2, 2)
    x8 = jnp.transpose(x8, (0, 3, 5, 7, 1, 2, 4, 6)).reshape(N, 8, Cin, P2)
    x8 = x8.astype(jnp.float32)

    # ---- fold conv bias + BatchNorm into per-tap weights (scale) and per-channel shift ----
    def fold(w, b, gamma, beta, mean, var, cin_pad):
        cout, cin = w.shape[-1], w.shape[-2]
        scale = gamma / jnp.sqrt(var + BN_EPS)                            # (cout,)
        wt = jnp.transpose(w, (0, 1, 2, 4, 3)).reshape(27, cout, cin)     # (tap, cout, cin)
        wt = wt * scale[None, :, None]                                    # fold BN scale
        wt = jnp.pad(wt, ((0, 0), (0, 0), (0, cin_pad - cin)))            # pad K to buffer rows
        shift = (beta + (b - mean) * scale).reshape(cout, 1)
        return wt.astype(jnp.float32), shift.astype(jnp.float32)

    w1t, s1 = fold(*cp1, Cbuf)
    w2t, s2 = fold(*cp2, Cbuf)

    # ---- per-tap lane shifts and 'same'-padding boundary masks (tiny constants) ----
    gd = jnp.arange(D2).reshape(D2, 1, 1)
    gh = jnp.arange(H2).reshape(1, H2, 1)
    gw = jnp.arange(W2).reshape(1, 1, W2)
    deltas, masks = [], []
    for kd in range(3):
        for kh in range(3):
            for kw in range(3):
                od, oh, ow = kd - 1, kh - 1, kw - 1
                deltas.append(od * H2 * W2 + oh * W2 + ow)
                m = ((gd + od >= 0) & (gd + od < D2) &
                     (gh + oh >= 0) & (gh + oh < H2) &
                     (gw + ow >= 0) & (gw + ow < W2))
                masks.append(m.reshape(1, P2))
    masks = jnp.stack(masks).astype(jnp.float32)                          # (27, 1, P2)

    def kernel(x8_ref, mask_ref, w1_ref, s1_ref, w2_ref, s2_ref, o_ref, buf_ref):
        # --- MaxPool3d(2): 8-way max over the pre-arranged window-tap axis (lanes = P2) ---
        pooled = jnp.max(x8_ref[0], axis=0)                               # (Cin, P2)

        # zero halo + place pooled interior into the shift buffer
        buf_ref[...] = jnp.zeros_like(buf_ref)
        buf_ref[0:Cin, PAD:PAD + P2] = pooled

        def conv_taps(w_ref, cout):
            # sum over the 27 taps: shifted read from the haloed buffer, mask the
            # 'same'-padding boundary, small (cout, Cbuf) x (Cbuf, P2) MXU dot.
            acc = jnp.zeros((cout, P2), jnp.float32)
            for t in range(27):
                lo = PAD + deltas[t]
                xt = buf_ref[:, lo:lo + P2] * mask_ref[t]                 # (Cbuf, P2)
                acc = acc + jnp.dot(w_ref[t], xt,
                                    preferred_element_type=jnp.float32)
            return acc

        # --- conv1 (BN scale folded into weights) + shift + LeakyReLU ---
        a1 = conv_taps(w1_ref, C1) + s1_ref[...]
        a1 = jnp.where(a1 >= 0, a1, NEG_SLOPE * a1)
        # TODO(synk): nn.Dropout between the convs is identity in inference mode.

        # --- conv2 + shift + LeakyReLU (reuse the same haloed buffer) ---
        buf_ref[0:C1, PAD:PAD + P2] = a1
        y = conv_taps(w2_ref, C2) + s2_ref[...]
        o_ref[0] = jnp.where(y >= 0, y, NEG_SLOPE * y).astype(o_ref.dtype)

    out = pl.pallas_call(
        kernel,
        out_shape=jax.ShapeDtypeStruct((N, C2, P2), jnp.float32),
        grid_spec=pltpu.PrefetchScalarGridSpec(
            num_scalar_prefetch=0,
            grid=(N,),
            in_specs=[
                pl.BlockSpec((1, 8, Cin, P2), lambda n: (n, 0, 0, 0)),
                pl.BlockSpec((27, 1, P2), lambda n: (0, 0, 0)),
                pl.BlockSpec((27, C1, Cbuf), lambda n: (0, 0, 0)),
                pl.BlockSpec((C1, 1), lambda n: (0, 0)),
                pl.BlockSpec((27, C2, Cbuf), lambda n: (0, 0, 0)),
                pl.BlockSpec((C2, 1), lambda n: (0, 0)),
            ],
            out_specs=pl.BlockSpec((1, C2, P2), lambda n: (n, 0, 0)),
            scratch_shapes=[pltpu.VMEM((Cbuf, BUF_LEN), jnp.float32)],
        ),
        compiler_params=pltpu.CompilerParams(
            dimension_semantics=("parallel",)),
    )(x8, masks, w1t, s1, w2t, s2)

    # output lanes are the flattened pooled volume -> this reshape is free and the
    # result is already NCDHW (no final transpose needed).
    return out.reshape(N, C2, D2, H2, W2)


# --------------------------- params & reference ---------------------------

def init_downblock_params(key, in_channels, out_channels, dropout_p=0.1):
    del dropout_p  # unused in inference forward
    ks = jax.random.split(key, 12)

    def conv_init(kw, kb, cin, cout):
        bound = (1.0 / (cin * 27)) ** 0.5  # PyTorch default kaiming-uniform bound
        w = jax.random.uniform(kw, (3, 3, 3, cin, cout), jnp.float32, -bound, bound)
        b = jax.random.uniform(kb, (cout,), jnp.float32, -bound, bound)
        return w, b

    def bn_init(kg, kb, km, kv, c):
        gamma = 1.0 + 0.1 * jax.random.normal(kg, (c,), jnp.float32)
        beta = 0.1 * jax.random.normal(kb, (c,), jnp.float32)
        mean = 0.1 * jax.random.normal(km, (c,), jnp.float32)
        var = 0.5 + jax.random.uniform(kv, (c,), jnp.float32)
        return gamma, beta, mean, var

    w1, b1 = conv_init(ks[0], ks[1], in_channels, out_channels)
    g1, be1, m1, v1 = bn_init(ks[2], ks[3], ks[4], ks[5], out_channels)
    w2, b2 = conv_init(ks[6], ks[7], out_channels, out_channels)
    g2, be2, m2, v2 = bn_init(ks[8], ks[9], ks[10], ks[11], out_channels)
    return ((w1, b1, g1, be1, m1, v1), (w2, b2, g2, be2, m2, v2))


def downblock_reference(x_ncdhw, params):
    """Pure-JAX reference (lax.reduce_window + lax.conv_general_dilated)."""
    x = jnp.transpose(x_ncdhw, (0, 2, 3, 4, 1))
    x = lax.reduce_window(x, -jnp.inf, lax.max,
                          (1, 2, 2, 2, 1), (1, 2, 2, 2, 1), "VALID")
    for (w, b, gamma, beta, mean, var) in params:
        x = lax.conv_general_dilated(
            x, w, window_strides=(1, 1, 1), padding=[(1, 1)] * 3,
            dimension_numbers=("NDHWC", "DHWIO", "NDHWC"),
            precision=lax.Precision.HIGHEST)
        x = x + b
        x = (x - mean) / jnp.sqrt(var + BN_EPS) * gamma + beta
        x = jnp.where(x >= 0, x, NEG_SLOPE * x)
    return jnp.transpose(x, (0, 4, 1, 2, 3))


# --------------------------- main ---------------------------

if __name__ == "__main__":
    key = jax.random.PRNGKey(0)
    kx, kp = jax.random.split(key)

    N, Cin, D, H, W = 2, 4, 16, 16, 16   # input (NCDHW), like PyTorch
    Cout = 8
    x = jax.random.normal(kx, (N, Cin, D, H, W), jnp.float32)
    params = init_downblock_params(kp, Cin, Cout, dropout_p=0.1)

    out = jax.jit(downblock_forward)(x, params)
    out = jax.block_until_ready(out)

    assert out.shape == (N, Cout, D // 2, H // 2, W // 2), out.shape
    ref = downblock_reference(x, params)
    max_err = float(jnp.max(jnp.abs(out - ref)))
    if not bool(jnp.allclose(out, ref, atol=2e-3, rtol=2e-3)):
        raise AssertionError(f"Pallas output mismatch vs reference, max|err|={max_err}")
    print("KERNEL_OK")
</pallas_src>

<mosaic_0001>
module attributes {stable_mosaic.version = 11 : i64} {
  func.func @kernel(%arg0: i32, %arg1: memref<1x8x4x512xf32, #tpu.memory_space<vmem>>, %arg2: memref<27x1x512xf32, #tpu.memory_space<vmem>>, %arg3: memref<27x8x8xf32, #tpu.memory_space<vmem>>, %arg4: memref<8x1xf32, #tpu.memory_space<vmem>>, %arg5: memref<27x8x8xf32, #tpu.memory_space<vmem>>, %arg6: memref<8x1xf32, #tpu.memory_space<vmem>>, %arg7: memref<1x8x512xf32, #tpu.memory_space<vmem>>, %arg8: memref<8x768xf32, #tpu.memory_space<vmem>>) attributes {dimension_semantics = [#tpu.dimension_semantics<parallel>], iteration_bounds = array<i64: 2>, scalar_prefetch = 0 : i64, scratch_operands = 1 : i64, tpu.core_type = #tpu.core_type<tc>, window_params = [{transform_indices = @transform_0, window_bounds = array<i64: 1, 8, 4, 512>}, {pipeline_mode = #tpu.pipeline_mode<synchronous>, transform_indices = @transform_1, window_bounds = array<i64: 27, 1, 512>}, {pipeline_mode = #tpu.pipeline_mode<synchronous>, transform_indices = @transform_2, window_bounds = array<i64: 27, 8, 8>}, {pipeline_mode = #tpu.pipeline_mode<synchronous>, transform_indices = @transform_3, window_bounds = array<i64: 8, 1>}, {pipeline_mode = #tpu.pipeline_mode<synchronous>, transform_indices = @transform_4, window_bounds = array<i64: 27, 8, 8>}, {pipeline_mode = #tpu.pipeline_mode<synchronous>, transform_indices = @transform_5, window_bounds = array<i64: 8, 1>}, {transform_indices = @transform_6, window_bounds = array<i64: 1, 8, 512>}]} {
    %c0 = arith.constant 0 : index
    %c0_0 = arith.constant 0 : index
    %c0_1 = arith.constant 0 : index
    %c0_2 = arith.constant 0 : index
    %0 = vector.load %arg1[%c0, %c0_0, %c0_1, %c0_2] : memref<1x8x4x512xf32, #tpu.memory_space<vmem>>, vector<1x8x4x512xf32>
    %1 = vector.shape_cast %0 : vector<1x8x4x512xf32> to vector<8x4x512xf32>
    %cst = arith.constant dense<0xFF800000> : vector<4x512xf32>
    %2 = vector.multi_reduction <maximumf>, %1, %cst [0] : vector<8x4x512xf32> to vector<4x512xf32>
    %cst_3 = arith.constant 0.000000e+00 : f32
    %3 = vector.broadcast %cst_3 : f32 to vector<8x768xf32>
    %c0_4 = arith.constant 0 : index
    %c0_5 = arith.constant 0 : index
    %4 = vector.load %arg8[%c0_4, %c0_5] : memref<8x768xf32, #tpu.memory_space<vmem>>, vector<8x768xf32>
    tpu.vector_store %arg8[%c0_4, %c0_5], %3 {strides = array<i32>} : memref<8x768xf32, #tpu.memory_space<vmem>>, vector<8x768xf32>,
    %c0_6 = arith.constant 0 : index
    %c128 = arith.constant 128 : index
    %5 = vector.load %arg8[%c0_6, %c128] : memref<8x768xf32, #tpu.memory_space<vmem>>, vector<4x512xf32>
    tpu.vector_store %arg8[%c0_6, %c128], %2 {strides = array<i32>} : memref<8x768xf32, #tpu.memory_space<vmem>>, vector<4x512xf32>,
    %cst_7 = arith.constant 0.000000e+00 : f32
    %6 = vector.broadcast %cst_7 : f32 to vector<8x512xf32>
    %c0_8 = arith.constant 0 : index
    %c55 = arith.constant 55 : index
    %7 = vector.load %arg8[%c0_8, %c55] : memref<8x768xf32, #tpu.memory_space<vmem>>, vector<8x512xf32>
    %c0_9 = arith.constant 0 : index
    %c0_10 = arith.constant 0 : index
    %c0_11 = arith.constant 0 : index
    %8 = vector.load %arg2[%c0_9, %c0_10, %c0_11] : memref<27x1x512xf32, #tpu.memory_space<vmem>>, vector<1x1x512xf32>
    %9 = vector.shape_cast %8 : vector<1x1x512xf32> to vector<1x512xf32>
    %10 = vector.broadcast %9 : vector<1x512xf32> to vector<8x512xf32>
    %11 = arith.mulf %7, %10 : vector<8x512xf32>
    %c0_12 = arith.constant 0 : index
    %c0_13 = arith.constant 0 : index
    %c0_14 = arith.constant 0 : index
    %12 = vector.load %arg3[%c0_12, %c0_13, %c0_14] : memref<27x8x8xf32, #tpu.memory_space<vmem>>, vector<1x8x8xf32>
    %13 = vector.shape_cast %12 : vector<1x8x8xf32> to vector<8x8xf32>
    %cst_15 = arith.constant dense<0.000000e+00> : vector<8x512xf32>
    %14 = tpu.matmul %13, %11, %cst_15 {dimension_numbers = #tpu.dot_dimension_numbers<[1], [0], [0], [1], [0, 0, 1, 1], [], []>} : vector<8x8xf32>, vector<8x512xf32>, vector<8x512xf32> -> vector<8x512xf32>
    %15 = arith.addf %6, %14 : vector<8x512xf32>
    %c0_16 = arith.constant 0 : index
    %c56 = arith.constant 56 : index
    %16 = vector.load %arg8[%c0_16, %c56] : memref<8x768xf32, #tpu.memory_space<vmem>>, vector<8x512xf32>
    %c1 = arith.constant 1 : index
    %c0_17 = arith.constant 0 : index
    %c0_18 = arith.constant 0 : index
    %17 = vector.load %arg2[%c1, %c0_17, %c0_18] : memref<27x1x512xf32, #tpu.memory_space<vmem>>, vector<1x1x512xf32>
    %18 = vector.shape_cast %17 : vector<1x1x512xf32> to vector<1x512xf32>
    %19 = vector.broadcast %18 : vector<1x512xf32> to vector<8x512xf32>
    %20 = arith.mulf %16, %19 : vector<8x512xf32>
    %c1_19 = arith.constant 1 : index
    %c0_20 = arith.constant 0 : index
    %c0_21 = arith.constant 0 : index
    %21 = vector.load %arg3[%c1_19, %c0_20, %c0_21] : memref<27x8x8xf32, #tpu.memory_space<vmem>>, vector<1x8x8xf32>
    %22 = vector.shape_cast %21 : vector<1x8x8xf32> to vector<8x8xf32>
    %cst_22 = arith.constant dense<0.000000e+00> : vector<8x512xf32>
    %23 = tpu.matmul %22, %20, %cst_22 {dimension_numbers = #tpu.dot_dimension_numbers<[1], [0], [0], [1], [0, 0, 1, 1], [], []>} : vector<8x8xf32>, vector<8x512xf32>, vector<8x512xf32> -> vector<8x512xf32>
    %24 = arith.addf %15, %23 : vector<8x512xf32>
    %c0_23 = arith.constant 0 : index
    %c57 = arith.constant 57 : index
    %25 = vector.load %arg8[%c0_23, %c57] : memref<8x768xf32, #tpu.memory_space<vmem>>, vector<8x512xf32>
    %c2 = arith.constant 2 : index
    %c0_24 = arith.constant 0 : index
    %c0_25 = arith.constant 0 : index
    %26 = vector.load %arg2[%c2, %c0_24, %c0_25] : memref<27x1x512xf32, #tpu.memory_space<vmem>>, vector<1x1x512xf32>
    %27 = vector.shape_cast %26 : vector<1x1x512xf32> to vector<1x512xf32>
    %28 = vector.broadcast %27 : vector<1x512xf32> to vector<8x512xf32>
    %29 = arith.mulf %25, %28 : vector<8x512xf32>
    %c2_26 = arith.constant 2 : index
    %c0_27 = arith.constant 0 : index
    %c0_28 = arith.constant 0 : index
    %30 = vector.load %arg3[%c2_26, %c0_27, %c0_28] : memref<27x8x8xf32, #tpu.memory_space<vmem>>, vector<1x8x8xf32>
    %31 = vector.shape_cast %30 : vector<1x8x8xf32> to vector<8x8xf32>
    %cst_29 = arith.constant dense<0.000000e+00> : vector<8x512xf32>
    %32 = tpu.matmul %31, %29, %cst_29 {dimension_numbers = #tpu.dot_dimension_numbers<[1], [0], [0], [1], [0, 0, 1, 1], [], []>} : vector<8x8xf32>, vector<8x512xf32>, vector<8x512xf32> -> vector<8x512xf32>
    %33 = arith.addf %24, %32 : vector<8x512xf32>
    %c0_30 = arith.constant 0 : index
    %c63 = arith.constant 63 : index
    %34 = vector.load %arg8[%c0_30, %c63] : memref<8x768xf32, #tpu.memory_space<vmem>>, vector<8x512xf32>
    %c3 = arith.constant 3 : index
    %c0_31 = arith.constant 0 : index
    %c0_32 = arith.constant 0 : index
    %35 = vector.load %arg2[%c3, %c0_31, %c0_32] : memref<27x1x512xf32, #tpu.memory_space<vmem>>, vector<1x1x512xf32>
    %36 = vector.shape_cast %35 : vector<1x1x512xf32> to vector<1x512xf32>
    %37 = vector.broadcast %36 : vector<1x512xf32> to vector<8x512xf32>
    %38 = arith.mulf %34, %37 : vector<8x512xf32>
    %c3_33 = arith.constant 3 : index
    %c0_34 = arith.constant 0 : index
    %c0_35 = arith.constant 0 : index
    %39 = vector.load %arg3[%c3_33, %c0_34, %c0_35] : memref<27x8x8xf32, #tpu.memory_space<vmem>>, vector<1x8x8xf32>
    %40 = vector.shape_cast %39 : vector<1x8x8xf32> to vector<8x8xf32>
    %cst_36 = arith.constant dense<0.000000e+00> : vector<8x512xf32>
    %41 = tpu.matmul %40, %38, %cst_36 {dimension_numbers = #tpu.dot_dimension_numbers<[1], [0], [0], [1], [0, 0, 1, 1], [], []>} : vector<8x8xf32>, vector<8x512xf32>, vector<8x512xf32> -> vector<8x512xf32>
    %42 = arith.addf %33, %41 : vector<8x512xf32>
    %c0_37 = arith.constant 0 : index
    %c64 = arith.constant 64 : index
    %43 = vector.load %arg8[%c0_37, %c64] : memref<8x768xf32, #tpu.memory_space<vmem>>, vector<8x512xf32>
    %c4 = arith.constant 4 : index
    %c0_38 = arith.constant 0 : index
    %c0_39 = arith.constant 0 : index
    %44 = vector.load %arg2[%c4, %c0_38, %c0_39] : memref<27x1x512xf32, #tpu.memory_space<vmem>>, vector<1x1x512xf32>
    %45 = vector.shape_cast %44 : vector<1x1x512xf32> to vector<1x512xf32>
    %46 = vector.broadcast %45 : vector<1x512xf32> to vector<8x512xf32>
    %47 = arith.mulf %43, %46 : vector<8x512xf32>
    %c4_40 = arith.constant 4 : index
    %c0_41 = arith.constant 0 : index
    %c0_42 = arith.constant 0 : index
    %48 = vector.load %arg3[%c4_40, %c0_41, %c0_42] : memref<27x8x8xf32, #tpu.memory_space<vmem>>, vector<1x8x8xf32>
    %49 = vector.shape_cast %48 : vector<1x8x8xf32> to vector<8x8xf32>
    %cst_43 = arith.constant dense<0.000000e+00> : vector<8x512xf32>
    %50 = tpu.matmul %49, %47, %cst_43 {dimension_numbers = #tpu.dot_dimension_numbers<[1], [0], [0], [1], [0, 0, 1, 1], [], []>} : vector<8x8xf32>, vector<8x512xf32>, vector<8x512xf32> -> vector<8x512xf32>
    %51 = arith.addf %42, %50 : vector<8x512xf32>
    %c0_44 = arith.constant 0 : index
    %c65 = arith.constant 65 : index
    %52 = vector.load %arg8[%c0_44, %c65] : memref<8x768xf32, #tpu.memory_space<vmem>>, vector<8x512xf32>
    %c5 = arith.constant 5 : index
    %c0_45 = arith.constant 0 : index
    %c0_46 = arith.constant 0 : index
    %53 = vector.load %arg2[%c5, %c0_45, %c0_46] : memref<27x1x512xf32, #tpu.memory_space<vmem>>, vector<1x1x512xf32>
    %54 = vector.shape_cast %53 : vector<1x1x512xf32> to vector<1x512xf32>
    %55 = vector.broadcast %54 : vector<1x512xf32> to vector<8x512xf32>
    %56 = arith.mulf %52, %55 : vector<8x512xf32>
    %c5_47 = arith.constant 5 : index
    %c0_48 = arith.constant 0 : index
    %c0_49 = arith.constant 0 : index
    %57 = vector.load %arg3[%c5_47, %c0_48, %c0_49] : memref<27x8x8xf32, #tpu.memory_space<vmem>>, vector<1x8x8xf32>
    %58 = vector.shape_cast %57 : vector<1x8x8xf32> to vector<8x8xf32>
    %cst_50 = arith.constant dense<0.000000e+00> : vector<8x512xf32>
    %59 = tpu.matmul %58, %56, %cst_50 {dimension_numbers = #tpu.dot_dimension_numbers<[1], [0], [0], [1], [0, 0, 1, 1], [], []>} : vector<8x8xf32>, vector<8x512xf32>, vector<8x512xf32> -> vector<8x512xf32>
    %60 = arith.addf %51, %59 : vector<8x512xf32>
    %c0_51 = arith.constant 0 : index
    %c71 = arith.constant 71 : index
    %61 = vector.load %arg8[%c0_51, %c71] : memref<8x768xf32, #tpu.memory_space<vmem>>, vector<8x512xf32>
    %c6 = arith.constant 6 : index
    %c0_52 = arith.constant 0 : index
    %c0_53 = arith.constant 0 : index
    %62 = vector.load %arg2[%c6, %c0_52, %c0_53] : memref<27x1x512xf32, #tpu.memory_space<vmem>>, vector<1x1x512xf32>
    %63 = vector.shape_cast %62 : vector<1x1x512xf32> to vector<1x512xf32>
    %64 = vector.broadcast %63 : vector<1x512xf32> to vector<8x512xf32>
    %65 = arith.mulf %61, %64 : vector<8x512xf32>
    %c6_54 = arith.constant 6 : index
    %c0_55 = arith.constant 0 : index
    %c0_56 = arith.constant 0 : index
    %66 = vector.load %arg3[%c6_54, %c0_55, %c0_56] : memref<27x8x8xf32, #tpu.memory_space<vmem>>, vector<1x8x8xf32>
    %67 = vector.shape_cast %66 : vector<1x8x8xf32> to vector<8x8xf32>
    %cst_57 = arith.constant dense<0.000000e+00> : vector<8x512xf32>
    %68 = tpu.matmul %67, %65, %cst_57 {dimension_numbers = #tpu.dot_dimension_numbers<[1], [0], [0], [1], [0, 0, 1, 1], [], []>} : vector<8x8xf32>, vector<8x512xf32>, vector<8x512xf32> -> vector<8x512xf32>
    %69 = arith.addf %60, %68 : vector<8x512xf32>
    %c0_58 = arith.constant 0 : index
    %c72 = arith.constant 72 : index
    %70 = vector.load %arg8[%c0_58, %c72] : memref<8x768xf32, #tpu.memory_space<vmem>>, vector<8x512xf32>
    %c7 = arith.constant 7 : index
    %c0_59 = arith.constant 0 : index
    %c0_60 = arith.constant 0 : index
    %71 = vector.load %arg2[%c7, %c0_59, %c0_60] : memref<27x1x512xf32, #tpu.memory_space<vmem>>, vector<1x1x512xf32>
    %72 = vector.shape_cast %71 : vector<1x1x512xf32> to vector<1x512xf32>
    %73 = vector.broadcast %72 : vector<1x512xf32> to vector<8x512xf32>
    %74 = arith.mulf %70, %73 : vector<8x512xf32>
    %c7_61 = arith.constant 7 : index
    %c0_62 = arith.constant 0 : index
    %c0_63 = arith.constant 0 : index
    %75 = vector.load %arg3[%c7_61, %c0_62, %c0_63] : memref<27x8x8xf32, #tpu.memory_space<vmem>>, vector<1x8x8xf32>
    %76 = vector.shape_cast %75 : vector<1x8x8xf32> to vector<8x8xf32>
    %cst_64 = arith.constant dense<0.000000e+00> : vector<8x512xf32>
    %77 = tpu.matmul %76, %74, %cst_64 {dimension_numbers = #tpu.dot_dimension_numbers<[1], [0], [0], [1], [0, 0, 1, 1], [], []>} : vector<8x8xf32>, vector<8x512xf32>, vector<8x512xf32> -> vector<8x512xf32>
    %78 = arith.addf %69, %77 : vector<8x512xf32>
    %c0_65 = arith.constant 0 : index
    %c73 = arith.constant 73 : index
    %79 = vector.load %arg8[%c0_65, %c73] : memref<8x768xf32, #tpu.memory_space<vmem>>, vector<8x512xf32>
    %c8 = arith.constant 8 : index
    %c0_66 = arith.constant 0 : index
    %c0_67 = arith.constant 0 : index
    %80 = vector.load %arg2[%c8, %c0_66, %c0_67] : memref<27x1x512xf32, #tpu.memory_space<vmem>>, vector<1x1x512xf32>
    %81 = vector.shape_cast %80 : vector<1x1x512xf32> to vector<1x512xf32>
    %82 = vector.broadcast %81 : vector<1x512xf32> to vector<8x512xf32>
    %83 = arith.mulf %79, %82 : vector<8x512xf32>
    %c8_68 = arith.constant 8 : index
    %c0_69 = arith.constant 0 : index
    %c0_70 = arith.constant 0 : index
    %84 = vector.load %arg3[%c8_68, %c0_69, %c0_70] : memref<27x8x8xf32, #tpu.memory_space<vmem>>, vector<1x8x8xf32>
    %85 = vector.shape_cast %84 : vector<1x8x8xf32> to vector<8x8xf32>
    %cst_71 = arith.constant dense<0.000000e+00> : vector<8x512xf32>
    %86 = tpu.matmul %85, %83, %cst_71 {dimension_numbers = #tpu.dot_dimension_numbers<[1], [0], [0], [1], [0, 0, 1, 1], [], []>} : vector<8x8xf32>, vector<8x512xf32>, vector<8x512xf32> -> vector<8x512xf32>
    %87 = arith.addf %78, %86 : vector<8x512xf32>
    %c0_72 = arith.constant 0 : index
    %c119 = arith.constant 119 : index
    %88 = vector.load %arg8[%c0_72, %c119] : memref<8x768xf32, #tpu.memory_space<vmem>>, vector<8x512xf32>
    %c9 = arith.constant 9 : index
    %c0_73 = arith.constant 0 : index
    %c0_74 = arith.constant 0 : index
    %89 = vector.load %arg2[%c9, %c0_73, %c0_74] : memref<27x1x512xf32, #tpu.memory_space<vmem>>, vector<1x1x512xf32>
    %90 = vector.shape_cast %89 : vector<1x1x512xf32> to vector<1x512xf32>
    %91 = vector.broadcast %90 : vector<1x512xf32> to vector<8x512xf32>
    %92 = arith.mulf %88, %91 : vector<8x512xf32>
    %c9_75 = arith.constant 9 : index
    %c0_76 = arith.constant 0 : index
    %c0_77 = arith.constant 0 : index
    %93 = vector.load %arg3[%c9_75, %c0_76, %c0_77] : memref<27x8x8xf32, #tpu.memory_space<vmem>>, vector<1x8x8xf32>
    %94 = vector.shape_cast %93 : vector<1x8x8xf32> to vector<8x8xf32>
    %cst_78 = arith.constant dense<0.000000e+00> : vector<8x512xf32>
    %95 = tpu.matmul %94, %92, %cst_78 {dimension_numbers = #tpu.dot_dimension_numbers<[1], [0], [0], [1], [0, 0, 1, 1], [], []>} : vector<8x8xf32>, vector<8x512xf32>, vector<8x512xf32> -> vector<8x512xf32>
    %96 = arith.addf %87, %95 : vector<8x512xf32>
    %c0_79 = arith.constant 0 : index
    %c120 = arith.constant 120 : index
    %97 = vector.load %arg8[%c0_79, %c120] : memref<8x768xf32, #tpu.memory_space<vmem>>, vector<8x512xf32>
    %c10 = arith.constant 10 : index
    %c0_80 = arith.constant 0 : index
    %c0_81 = arith.constant 0 : index
    %98 = vector.load %arg2[%c10, %c0_80, %c0_81] : memref<27x1x512xf32, #tpu.memory_space<vmem>>, vector<1x1x512xf32>
    %99 = vector.shape_cast %98 : vector<1x1x512xf32> to vector<1x512xf32>
    %100 = vector.broadcast %99 : vector<1x512xf32> to vector<8x512xf32>
    %101 = arith.mulf %97, %100 : vector<8x512xf32>
    %c10_82 = arith.constant 10 : index
    %c0_83 = arith.constant 0 : index
    %c0_84 = arith.constant 0 : index
    %102 = vector.load %arg3[%c10_82, %c0_83, %c0_84] : memref<27x8x8xf32, #tpu.memory_space<vmem>>, vector<1x8x8xf32>
    %103 = vector.shape_cast %102 : vector<1x8x8xf32> to vector<8x8xf32>
    %cst_85 = arith.constant dense<0.000000e+00> : vector<8x512xf32>
    %104 = tpu.matmul %103, %101, %cst_85 {dimension_numbers = #tpu.dot_dimension_numbers<[1], [0], [0], [1], [0, 0, 1, 1], [], []>} : vector<8x8xf32>, vector<8x512xf32>, vector<8x512xf32> -> vector<8x512xf32>
    %105 = arith.addf %96, %104 : vector<8x512xf32>
    %c0_86 = arith.constant 0 : index
    %c121 = arith.constant 121 : index
    %106 = vector.load %arg8[%c0_86, %c121] : memref<8x768xf32, #tpu.memory_space<vmem>>, vector<8x512xf32>
    %c11 = arith.constant 11 : index
    %c0_87 = arith.constant 0 : index
    %c0_88 = arith.constant 0 : index
    %107 = vector.load %arg2[%c11, %c0_87, %c0_88] : memref<27x1x512xf32, #tpu.memory_space<vmem>>, vector<1x1x512xf32>
    %108 = vector.shape_cast %107 : vector<1x1x512xf32> to vector<1x512xf32>
    %109 = vector.broadcast %108 : vector<1x512xf32> to vector<8x512xf32>
    %110 = arith.mulf %106, %109 : vector<8x512xf32>
    %c11_89 = arith.constant 11 : index
    %c0_90 = arith.constant 0 : index
    %c0_91 = arith.constant 0 : index
    %111 = vector.load %arg3[%c11_89, %c0_90, %c0_91] : memref<27x8x8xf32, #tpu.memory_space<vmem>>, vector<1x8x8xf32>
    %112 = vector.shape_cast %111 : vector<1x8x8xf32> to vector<8x8xf32>
    %cst_92 = arith.constant dense<0.000000e+00> : vector<8x512xf32>
    %113 = tpu.matmul %112, %110, %cst_92 {dimension_numbers = #tpu.dot_dimension_numbers<[1], [0], [0], [1], [0, 0, 1, 1], [], []>} : vector<8x8xf32>, vector<8x512xf32>, vector<8x512xf32> -> vector<8x512xf32>
    %114 = arith.addf %105, %113 : vector<8x512xf32>
    %c0_93 = arith.constant 0 : index
    %c127 = arith.constant 127 : index
    %115 = vector.load %arg8[%c0_93, %c127] : memref<8x768xf32, #tpu.memory_space<vmem>>, vector<8x512xf32>
    %c12 = arith.constant 12 : index
    %c0_94 = arith.constant 0 : index
    %c0_95 = arith.constant 0 : index
    %116 = vector.load %arg2[%c12, %c0_94, %c0_95] : memref<27x1x512xf32, #tpu.memory_space<vmem>>, vector<1x1x512xf32>
    %117 = vector.shape_cast %116 : vector<1x1x512xf32> to vector<1x512xf32>
    %118 = vector.broadcast %117 : vector<1x512xf32> to vector<8x512xf32>
    %119 = arith.mulf %115, %118 : vector<8x512xf32>
    %c12_96 = arith.constant 12 : index
    %c0_97 = arith.constant 0 : index
    %c0_98 = arith.constant 0 : index
    %120 = vector.load %arg3[%c12_96, %c0_97, %c0_98] : memref<27x8x8xf32, #tpu.memory_space<vmem>>, vector<1x8x8xf32>
    %121 = vector.shape_cast %120 : vector<1x8x8xf32> to vector<8x8xf32>
    %cst_99 = arith.constant dense<0.000000e+00> : vector<8x512xf32>
    %122 = tpu.matmul %121, %119, %cst_99 {dimension_numbers = #tpu.dot_dimension_numbers<[1], [0], [0], [1], [0, 0, 1, 1], [], []>} : vector<8x8xf32>, vector<8x512xf32>, vector<8x512xf32> -> vector<8x512xf32>
    %123 = arith.addf %114, %122 : vector<8x512xf32>
    %c0_100 = arith.constant 0 : index
    %c128_101 = arith.constant 128 : index
    %124 = vector.load %arg8[%c0_100, %c128_101] : memref<8x768xf32, #tpu.memory_space<vmem>>, vector<8x512xf32>
    %c13 = arith.constant 13 : index
    %c0_102 = arith.constant 0 : index
    %c0_103 = arith.constant 0 : index
    %125 = vector.load %arg2[%c13, %c0_102, %c0_103] : memref<27x1x512xf32, #tpu.memory_space<vmem>>, vector<1x1x512xf32>
    %126 = vector.shape_cast %125 : vector<1x1x512xf32> to vector<1x512xf32>
    %127 = vector.broadcast %126 : vector<1x512xf32> to vector<8x512xf32>
    %128 = arith.mulf %124, %127 : vector<8x512xf32>
    %c13_104 = arith.constant 13 : index
    %c0_105 = arith.constant 0 : index
    %c0_106 = arith.constant 0 : index
    %129 = vector.load %arg3[%c13_104, %c0_105, %c0_106] : memref<27x8x8xf32, #tpu.memory_space<vmem>>, vector<1x8x8xf32>
    %130 = vector.shape_cast %129 : vector<1x8x8xf32> to vector<8x8xf32>
    %cst_107 = arith.constant dense<0.000000e+00> : vector<8x512xf32>
    %131 = tpu.matmul %130, %128, %cst_107 {dimension_numbers = #tpu.dot_dimension_numbers<[1], [0], [0], [1], [0, 0, 1, 1], [], []>} : vector<8x8xf32>, vector<8x512xf32>, vector<8x512xf32> -> vector<8x512xf32>
    %132 = arith.addf %123, %131 : vector<8x512xf32>
    %c0_108 = arith.constant 0 : index
    %c129 = arith.constant 129 : index
    %133 = vector.load %arg8[%c0_108, %c129] : memref<8x768xf32, #tpu.memory_space<vmem>>, vector<8x512xf32>
    %c14 = arith.constant 14 : index
    %c0_109 = arith.constant 0 : index
    %c0_110 = arith.constant 0 : index
    %134 = vector.load %arg2[%c14, %c0_109, %c0_110] : memref<27x1x512xf32, #tpu.memory_space<vmem>>, vector<1x1x512xf32>
    %135 = vector.shape_cast %134 : vector<1x1x512xf32> to vector<1x512xf32>
    %136 = vector.broadcast %135 : vector<1x512xf32> to vector<8x512xf32>
    %137 = arith.mulf %133, %136 : vector<8x512xf32>
    %c14_111 = arith.constant 14 : index
    %c0_112 = arith.constant 0 : index
    %c0_113 = arith.constant 0 : index
    %138 = vector.load %arg3[%c14_111, %c0_112, %c0_113] : memref<27x8x8xf32, #tpu.memory_space<vmem>>, vector<1x8x8xf32>
    %139 = vector.shape_cast %138 : vector<1x8x8xf32> to vector<8x8xf32>
    %cst_114 = arith.constant dense<0.000000e+00> : vector<8x512xf32>
    %140 = tpu.matmul %139, %137, %cst_114 {dimension_numbers = #tpu.dot_dimension_numbers<[1], [0], [0], [1], [0, 0, 1, 1], [], []>} : vector<8x8xf32>, vector<8x512xf32>, vector<8x512xf32> -> vector<8x512xf32>
    %141 = arith.addf %132, %140 : vector<8x512xf32>
    %c0_115 = arith.constant 0 : index
    %c135 = arith.constant 135 : index
    %142 = vector.load %arg8[%c0_115, %c135] : memref<8x768xf32, #tpu.memory_space<vmem>>, vector<8x512xf32>
    %c15 = arith.constant 15 : index
    %c0_116 = arith.constant 0 : index
    %c0_117 = arith.constant 0 : index
    %143 = vector.load %arg2[%c15, %c0_116, %c0_117] : memref<27x1x512xf32, #tpu.memory_space<vmem>>, vector<1x1x512xf32>
    %144 = vector.shape_cast %143 : vector<1x1x512xf32> to vector<1x512xf32>
    %145 = vector.broadcast %144 : vector<1x512xf32> to vector<8x512xf32>
    %146 = arith.mulf %142, %145 : vector<8x512xf32>
    %c15_118 = arith.constant 15 : index
    %c0_119 = arith.constant 0 : index
    %c0_120 = arith.constant 0 : index
    %147 = vector.load %arg3[%c15_118, %c0_119, %c0_120] : memref<27x8x8xf32, #tpu.memory_space<vmem>>, vector<1x8x8xf32>
    %148 = vector.shape_cast %147 : vector<1x8x8xf32> to vector<8x8xf32>
    %cst_121 = arith.constant dense<0.000000e+00> : vector<8x512xf32>
    %149 = tpu.matmul %148, %146, %cst_121 {dimension_numbers = #tpu.dot_dimension_numbers<[1], [0], [0], [1], [0, 0, 1, 1], [], []>} : vector<8x8xf32>, vector<8x512xf32>, vector<8x512xf32> -> vector<8x512xf32>
    %150 = arith.addf %141, %149 : vector<8x512xf32>
    %c0_122 = arith.constant 0 : index
    %c136 = arith.constant 136 : index
    %151 = vector.load %arg8[%c0_122, %c136] : memref<8x768xf32, #tpu.memory_space<vmem>>, vector<8x512xf32>
    %c16 = arith.constant 16 : index
    %c0_123 = arith.constant 0 : index
    %c0_124 = arith.constant 0 : index
    %152 = vector.load %arg2[%c16, %c0_123, %c0_124] : memref<27x1x512xf32, #tpu.memory_space<vmem>>, vector<1x1x512xf32>
    %153 = vector.shape_cast %152 : vector<1x1x512xf32> to vector<1x512xf32>
    %154 = vector.broadcast %153 : vector<1x512xf32> to vector<8x512xf32>
    %155 = arith.mulf %151, %154 : vector<8x512xf32>
    %c16_125 = arith.constant 16 : index
    %c0_126 = arith.constant 0 : index
    %c0_127 = arith.constant 0 : index
    %156 = vector.load %arg3[%c16_125, %c0_126, %c0_127] : memref<27x8x8xf32, #tpu.memory_space<vmem>>, vector<1x8x8xf32>
    %157 = vector.shape_cast %156 : vector<1x8x8xf32> to vector<8x8xf32>
    %cst_128 = arith.constant dense<0.000000e+00> : vector<8x512xf32>
    %158 = tpu.matmul %157, %155, %cst_128 {dimension_numbers = #tpu.dot_dimension_numbers<[1], [0], [0], [1], [0, 0, 1, 1], [], []>} : vector<8x8xf32>, vector<8x512xf32>, vector<8x512xf32> -> vector<8x512xf32>
    %159 = arith.addf %150, %158 : vector<8x512xf32>
    %c0_129 = arith.constant 0 : index
    %c137 = arith.constant 137 : index
    %160 = vector.load %arg8[%c0_129, %c137] : memref<8x768xf32, #tpu.memory_space<vmem>>, vector<8x512xf32>
    %c17 = arith.constant 17 : index
    %c0_130 = arith.constant 0 : index
    %c0_131 = arith.constant 0 : index
    %161 = vector.load %arg2[%c17, %c0_130, %c0_131] : memref<27x1x512xf32, #tpu.memory_space<vmem>>, vector<1x1x512xf32>
    %162 = vector.shape_cast %161 : vector<1x1x512xf32> to vector<1x512xf32>
    %163 = vector.broadcast %162 : vector<1x512xf32> to vector<8x512xf32>
    %164 = arith.mulf %160, %163 : vector<8x512xf32>
    %c17_132 = arith.constant 17 : index
    %c0_133 = arith.constant 0 : index
    %c0_134 = arith.constant 0 : index
    %165 = vector.load %arg3[%c17_132, %c0_133, %c0_134] : memref<27x8x8xf32, #tpu.memory_space<vmem>>, vector<1x8x8xf32>
    %166 = vector.shape_cast %165 : vector<1x8x8xf32> to vector<8x8xf32>
    %cst_135 = arith.constant dense<0.000000e+00> : vector<8x512xf32>
    %167 = tpu.matmul %166, %164, %cst_135 {dimension_numbers = #tpu.dot_dimension_numbers<[1], [0], [0], [1], [0, 0, 1, 1], [], []>} : vector<8x8xf32>, vector<8x512xf32>, vector<8x512xf32> -> vector<8x512xf32>
    %168 = arith.addf %159, %167 : vector<8x512xf32>
    %c0_136 = arith.constant 0 : index
    %c183 = arith.constant 183 : index
    %169 = vector.load %arg8[%c0_136, %c183] : memref<8x768xf32, #tpu.memory_space<vmem>>, vector<8x512xf32>
    %c18 = arith.constant 18 : index
    %c0_137 = arith.constant 0 : index
    %c0_138 = arith.constant 0 : index
    %170 = vector.load %arg2[%c18, %c0_137, %c0_138] : memref<27x1x512xf32, #tpu.memory_space<vmem>>, vector<1x1x512xf32>
    %171 = vector.shape_cast %170 : vector<1x1x512xf32> to vector<1x512xf32>
    %172 = vector.broadcast %171 : vector<1x512xf32> to vector<8x512xf32>
    %173 = arith.mulf %169, %172 : vector<8x512xf32>
    %c18_139 = arith.constant 18 : index
    %c0_140 = arith.constant 0 : index
    %c0_141 = arith.constant 0 : index
    %174 = vector.load %arg3[%c18_139, %c0_140, %c0_141] : memref<27x8x8xf32, #tpu.memory_space<vmem>>, vector<1x8x8xf32>
    %175 = vector.shape_cast %174 : vector<1x8x8xf32> to vector<8x8xf32>
    %cst_142 = arith.constant dense<0.000000e+00> : vector<8x512xf32>
    %176 = tpu.matmul %175, %173, %cst_142 {dimension_numbers = #tpu.dot_dimension_numbers<[1], [0], [0], [1], [0, 0, 1, 1], [], []>} : vector<8x8xf32>, vector<8x512xf32>, vector<8x512xf32> -> vector<8x512xf32>
    %177 = arith.addf %168, %176 : vector<8x512xf32>
    %c0_143 = arith.constant 0 : index
    %c184 = arith.constant 184 : index
    %178 = vector.load %arg8[%c0_143, %c184] : memref<8x768xf32, #tpu.memory_space<vmem>>, vector<8x512xf32>
    %c19 = arith.constant 19 : index
    %c0_144 = arith.constant 0 : index
    %c0_145 = arith.constant 0 : index
    %179 = vector.load %arg2[%c19, %c0_144, %c0_145] : memref<27x1x512xf32, #tpu.memory_space<vmem>>, vector<1x1x512xf32>
    %180 = vector.shape_cast %179 : vector<1x1x512xf32> to vector<1x512xf32>
    %181 = vector.broadcast %180 : vector<1x512xf32> to vector<8x512xf32>
    %182 = arith.mulf %178, %181 : vector<8x512xf32>
    %c19_146 = arith.constant 19 : index
    %c0_147 = arith.constant 0 : index
    %c0_148 = arith.constant 0 : index
    %183 = vector.load %arg3[%c19_146, %c0_147, %c0_148] : memref<27x8x8xf32, #tpu.memory_space<vmem>>, vector<1x8x8xf32>
    %184 = vector.shape_cast %183 : vector<1x8x8xf32> to vector<8x8xf32>
    %cst_149 = arith.constant dense<0.000000e+00> : vector<8x512xf32>
    %185 = tpu.matmul %184, %182, %cst_149 {dimension_numbers = #tpu.dot_dimension_numbers<[1], [0], [0], [1], [0, 0, 1, 1], [], []>} : vector<8x8xf32>, vector<8x512xf32>, vector<8x512xf32> -> vector<8x512xf32>
    %186 = arith.addf %177, %185 : vector<8x512xf32>
    %c0_150 = arith.constant 0 : index
    %c185 = arith.constant 185 : index
    %187 = vector.load %arg8[%c0_150, %c185] : memref<8x768xf32, #tpu.memory_space<vmem>>, vector<8x512xf32>
    %c20 = arith.constant 20 : index
    %c0_151 = arith.constant 0 : index
    %c0_152 = arith.constant 0 : index
    %188 = vector.load %arg2[%c20, %c0_151, %c0_152] : memref<27x1x512xf32, #tpu.memory_space<vmem>>, vector<1x1x512xf32>
    %189 = vector.shape_cast %188 : vector<1x1x512xf32> to vector<1x512xf32>
    %190 = vector.broadcast %189 : vector<1x512xf32> to vector<8x512xf32>
    %191 = arith.mulf %187, %190 : vector<8x512xf32>
    %c20_153 = arith.constant 20 : index
    %c0_154 = arith.constant 0 : index
    %c0_155 = arith.constant 0 : index
    %192 = vector.load %arg3[%c20_153, %c0_154, %c0_155] : memref<27x8x8xf32, #tpu.memory_space<vmem>>, vector<1x8x8xf32>
    %193 = vector.shape_cast %192 : vector<1x8x8xf32> to vector<8x8xf32>
    %cst_156 = arith.constant dense<0.000000e+00> : vector<8x512xf32>
    %194 = tpu.matmul %193, %191, %cst_156 {dimension_numbers = #tpu.dot_dimension_numbers<[1], [0], [0], [1], [0, 0, 1, 1], [], []>} : vector<8x8xf32>, vector<8x512xf32>, vector<8x512xf32> -> vector<8x512xf32>
    %195 = arith.addf %186, %194 : vector<8x512xf32>
    %c0_157 = arith.constant 0 : index
    %c191 = arith.constant 191 : index
    %196 = vector.load %arg8[%c0_157, %c191] : memref<8x768xf32, #tpu.memory_space<vmem>>, vector<8x512xf32>
    %c21 = arith.constant 21 : index
    %c0_158 = arith.constant 0 : index
    %c0_159 = arith.constant 0 : index
    %197 = vector.load %arg2[%c21, %c0_158, %c0_159] : memref<27x1x512xf32, #tpu.memory_space<vmem>>, vector<1x1x512xf32>
    %198 = vector.shape_cast %197 : vector<1x1x512xf32> to vector<1x512xf32>
    %199 = vector.broadcast %198 : vector<1x512xf32> to vector<8x512xf32>
    %200 = arith.mulf %196, %199 : vector<8x512xf32>
    %c21_160 = arith.constant 21 : index
    %c0_161 = arith.constant 0 : index
    %c0_162 = arith.constant 0 : index
    %201 = vector.load %arg3[%c21_160, %c0_161, %c0_162] : memref<27x8x8xf32, #tpu.memory_space<vmem>>, vector<1x8x8xf32>
    %202 = vector.shape_cast %201 : vector<1x8x8xf32> to vector<8x8xf32>
    %cst_163 = arith.constant dense<0.000000e+00> : vector<8x512xf32>
    %203 = tpu.matmul %202, %200, %cst_163 {dimension_numbers = #tpu.dot_dimension_numbers<[1], [0], [0], [1], [0, 0, 1, 1], [], []>} : vector<8x8xf32>, vector<8x512xf32>, vector<8x512xf32> -> vector<8x512xf32>
    %204 = arith.addf %195, %203 : vector<8x512xf32>
    %c0_164 = arith.constant 0 : index
    %c192 = arith.constant 192 : index
    %205 = vector.load %arg8[%c0_164, %c192] : memref<8x768xf32, #tpu.memory_space<vmem>>, vector<8x512xf32>
    %c22 = arith.constant 22 : index
    %c0_165 = arith.constant 0 : index
    %c0_166 = arith.constant 0 : index
    %206 = vector.load %arg2[%c22, %c0_165, %c0_166] : memref<27x1x512xf32, #tpu.memory_space<vmem>>, vector<1x1x512xf32>
    %207 = vector.shape_cast %206 : vector<1x1x512xf32> to vector<1x512xf32>
    %208 = vector.broadcast %207 : vector<1x512xf32> to vector<8x512xf32>
    %209 = arith.mulf %205, %208 : vector<8x512xf32>
    %c22_167 = arith.constant 22 : index
    %c0_168 = arith.constant 0 : index
    %c0_169 = arith.constant 0 : index
    %210 = vector.load %arg3[%c22_167, %c0_168, %c0_169] : memref<27x8x8xf32, #tpu.memory_space<vmem>>, vector<1x8x8xf32>
    %211 = vector.shape_cast %210 : vector<1x8x8xf32> to vector<8x8xf32>
    %cst_170 = arith.constant dense<0.000000e+00> : vector<8x512xf32>
    %212 = tpu.matmul %211, %209, %cst_170 {dimension_numbers = #tpu.dot_dimension_numbers<[1], [0], [0], [1], [0, 0, 1, 1], [], []>} : vector<8x8xf32>, vector<8x512xf32>, vector<8x512xf32> -> vector<8x512xf32>
    %213 = arith.addf %204, %212 : vector<8x512xf32>
    %c0_171 = arith.constant 0 : index
    %c193 = arith.constant 193 : index
    %214 = vector.load %arg8[%c0_171, %c193] : memref<8x768xf32, #tpu.memory_space<vmem>>, vector<8x512xf32>
    %c23 = arith.constant 23 : index
    %c0_172 = arith.constant 0 : index
    %c0_173 = arith.constant 0 : index
    %215 = vector.load %arg2[%c23, %c0_172, %c0_173] : memref<27x1x512xf32, #tpu.memory_space<vmem>>, vector<1x1x512xf32>
    %216 = vector.shape_cast %215 : vector<1x1x512xf32> to vector<1x512xf32>
    %217 = vector.broadcast %216 : vector<1x512xf32> to vector<8x512xf32>
    %218 = arith.mulf %214, %217 : vector<8x512xf32>
    %c23_174 = arith.constant 23 : index
    %c0_175 = arith.constant 0 : index
    %c0_176 = arith.constant 0 : index
    %219 = vector.load %arg3[%c23_174, %c0_175, %c0_176] : memref<27x8x8xf32, #tpu.memory_space<vmem>>, vector<1x8x8xf32>
    %220 = vector.shape_cast %219 : vector<1x8x8xf32> to vector<8x8xf32>
    %cst_177 = arith.constant dense<0.000000e+00> : vector<8x512xf32>
    %221 = tpu.matmul %220, %218, %cst_177 {dimension_numbers = #tpu.dot_dimension_numbers<[1], [0], [0], [1], [0, 0, 1, 1], [], []>} : vector<8x8xf32>, vector<8x512xf32>, vector<8x512xf32> -> vector<8x512xf32>
    %222 = arith.addf %213, %221 : vector<8x512xf32>
    %c0_178 = arith.constant 0 : index
    %c199 = arith.constant 199 : index
    %223 = vector.load %arg8[%c0_178, %c199] : memref<8x768xf32, #tpu.memory_space<vmem>>, vector<8x512xf32>
    %c24 = arith.constant 24 : index
    %c0_179 = arith.constant 0 : index
    %c0_180 = arith.constant 0 : index
    %224 = vector.load %arg2[%c24, %c0_179, %c0_180] : memref<27x1x512xf32, #tpu.memory_space<vmem>>, vector<1x1x512xf32>
    %225 = vector.shape_cast %224 : vector<1x1x512xf32> to vector<1x512xf32>
    %226 = vector.broadcast %225 : vector<1x512xf32> to vector<8x512xf32>
    %227 = arith.mulf %223, %226 : vector<8x512xf32>
    %c24_181 = arith.constant 24 : index
    %c0_182 = arith.constant 0 : index
    %c0_183 = arith.constant 0 : index
    %228 = vector.load %arg3[%c24_181, %c0_182, %c0_183] : memref<27x8x8xf32, #tpu.memory_space<vmem>>, vector<1x8x8xf32>
    %229 = vector.shape_cast %228 : vector<1x8x8xf32> to vector<8x8xf32>
    %cst_184 = arith.constant dense<0.000000e+00> : vector<8x512xf32>
    %230 = tpu.matmul %229, %227, %cst_184 {dimension_numbers = #tpu.dot_dimension_numbers<[1], [0], [0], [1], [0, 0, 1, 1], [], []>} : vector<8x8xf32>, vector<8x512xf32>, vector<8x512xf32> -> vector<8x512xf32>
    %231 = arith.addf %222, %230 : vector<8x512xf32>
    %c0_185 = arith.constant 0 : index
    %c200 = arith.constant 200 : index
    %232 = vector.load %arg8[%c0_185, %c200] : memref<8x768xf32, #tpu.memory_space<vmem>>, vector<8x512xf32>
    %c25 = arith.constant 25 : index
    %c0_186 = arith.constant 0 : index
    %c0_187 = arith.constant 0 : index
    %233 = vector.load %arg2[%c25, %c0_186, %c0_187] : memref<27x1x512xf32, #tpu.memory_space<vmem>>, vector<1x1x512xf32>
    %234 = vector.shape_cast %233 : vector<1x1x512xf32> to vector<1x512xf32>
    %235 = vector.broadcast %234 : vector<1x512xf32> to vector<8x512xf32>
    %236 = arith.mulf %232, %235 : vector<8x512xf32>
    %c25_188 = arith.constant 25 : index
    %c0_189 = arith.constant 0 : index
    %c0_190 = arith.constant 0 : index
    %237 = vector.load %arg3[%c25_188, %c0_189, %c0_190] : memref<27x8x8xf32, #tpu.memory_space<vmem>>, vector<1x8x8xf32>
    %238 = vector.shape_cast %237 : vector<1x8x8xf32> to vector<8x8xf32>
    %cst_191 = arith.constant dense<0.000000e+00> : vector<8x512xf32>
    %239 = tpu.matmul %238, %236, %cst_191 {dimension_numbers = #tpu.dot_dimension_numbers<[1], [0], [0], [1], [0, 0, 1, 1], [], []>} : vector<8x8xf32>, vector<8x512xf32>, vector<8x512xf32> -> vector<8x512xf32>
    %240 = arith.addf %231, %239 : vector<8x512xf32>
    %c0_192 = arith.constant 0 : index
    %c201 = arith.constant 201 : index
    %241 = vector.load %arg8[%c0_192, %c201] : memref<8x768xf32, #tpu.memory_space<vmem>>, vector<8x512xf32>
    %c26 = arith.constant 26 : index
    %c0_193 = arith.constant 0 : index
    %c0_194 = arith.constant 0 : index
    %242 = vector.load %arg2[%c26, %c0_193, %c0_194] : memref<27x1x512xf32, #tpu.memory_space<vmem>>, vector<1x1x512xf32>
    %243 = vector.shape_cast %242 : vector<1x1x512xf32> to vector<1x512xf32>
    %244 = vector.broadcast %243 : vector<1x512xf32> to vector<8x512xf32>
    %245 = arith.mulf %241, %244 : vector<8x512xf32>
    %c26_195 = arith.constant 26 : index
    %c0_196 = arith.constant 0 : index
    %c0_197 = arith.constant 0 : index
    %246 = vector.load %arg3[%c26_195, %c0_196, %c0_197] : memref<27x8x8xf32, #tpu.memory_space<vmem>>, vector<1x8x8xf32>
    %247 = vector.shape_cast %246 : vector<1x8x8xf32> to vector<8x8xf32>
    %cst_198 = arith.constant dense<0.000000e+00> : vector<8x512xf32>
    %248 = tpu.matmul %247, %245, %cst_198 {dimension_numbers = #tpu.dot_dimension_numbers<[1], [0], [0], [1], [0, 0, 1, 1], [], []>} : vector<8x8xf32>, vector<8x512xf32>, vector<8x512xf32> -> vector<8x512xf32>
    %249 = arith.addf %240, %248 : vector<8x512xf32>
    %c0_199 = arith.constant 0 : index
    %c0_200 = arith.constant 0 : index
    %250 = vector.load %arg4[%c0_199, %c0_200] : memref<8x1xf32, #tpu.memory_space<vmem>>, vector<8x1xf32>
    %251 = vector.broadcast %250 : vector<8x1xf32> to vector<8x512xf32>
    %252 = arith.addf %249, %251 : vector<8x512xf32>
    %cst_201 = arith.constant 0.000000e+00 : f32
    %253 = vector.broadcast %cst_201 : f32 to vector<8x512xf32>
    %254 = arith.cmpf oge, %252, %253 : vector<8x512xf32>
    %cst_202 = arith.constant 0.00999999977 : f32
    %255 = vector.broadcast %cst_202 : f32 to vector<8x512xf32>
    %256 = arith.mulf %255, %252 : vector<8x512xf32>
    %257 = arith.select %254, %252, %256 : vector<8x512xi1>, vector<8x512xf32>
    %c0_203 = arith.constant 0 : index
    %c128_204 = arith.constant 128 : index
    %258 = vector.load %arg8[%c0_203, %c128_204] : memref<8x768xf32, #tpu.memory_space<vmem>>, vector<8x512xf32>
    tpu.vector_store %arg8[%c0_203, %c128_204], %257 {strides = array<i32>} : memref<8x768xf32, #tpu.memory_space<vmem>>, vector<8x512xf32>,
    %cst_205 = arith.constant 0.000000e+00 : f32
    %259 = vector.broadcast %cst_205 : f32 to vector<8x512xf32>
    %c0_206 = arith.constant 0 : index
    %c55_207 = arith.constant 55 : index
    %260 = vector.load %arg8[%c0_206, %c55_207] : memref<8x768xf32, #tpu.memory_space<vmem>>, vector<8x512xf32>
    %c0_208 = arith.constant 0 : index
    %c0_209 = arith.constant 0 : index
    %c0_210 = arith.constant 0 : index
    %261 = vector.load %arg2[%c0_208, %c0_209, %c0_210] : memref<27x1x512xf32, #tpu.memory_space<vmem>>, vector<1x1x512xf32>
    %262 = vector.shape_cast %261 : vector<1x1x512xf32> to vector<1x512xf32>
    %263 = vector.broadcast %262 : vector<1x512xf32> to vector<8x512xf32>
    %264 = arith.mulf %260, %263 : vector<8x512xf32>
    %c0_211 = arith.constant 0 : index
    %c0_212 = arith.constant 0 : index
    %c0_213 = arith.constant 0 : index
    %265 = vector.load %arg5[%c0_211, %c0_212, %c0_213] : memref<27x8x8xf32, #tpu.memory_space<vmem>>, vector<1x8x8xf32>
    %266 = vector.shape_cast %265 : vector<1x8x8xf32> to vector<8x8xf32>
    %cst_214 = arith.constant dense<0.000000e+00> : vector<8x512xf32>
    %267 = tpu.matmul %266, %264, %cst_214 {dimension_numbers = #tpu.dot_dimension_numbers<[1], [0], [0], [1], [0, 0, 1, 1], [], []>} : vector<8x8xf32>, vector<8x512xf32>, vector<8x512xf32> -> vector<8x512xf32>
    %268 = arith.addf %259, %267 : vector<8x512xf32>
    %c0_215 = arith.constant 0 : index
    %c56_216 = arith.constant 56 : index
    %269 = vector.load %arg8[%c0_215, %c56_216] : memref<8x768xf32, #tpu.memory_space<vmem>>, vector<8x512xf32>
    %c1_217 = arith.constant 1 : index
    %c0_218 = arith.constant 0 : index
    %c0_219 = arith.constant 0 : index
    %270 = vector.load %arg2[%c1_217, %c0_218, %c0_219] : memref<27x1x512xf32, #tpu.memory_space<vmem>>, vector<1x1x512xf32>
    %271 = vector.shape_cast %270 : vector<1x1x512xf32> to vector<1x512xf32>
    %272 = vector.broadcast %271 : vector<1x512xf32> to vector<8x512xf32>
    %273 = arith.mulf %269, %272 : vector<8x512xf32>
    %c1_220 = arith.constant 1 : index
    %c0_221 = arith.constant 0 : index
    %c0_222 = arith.constant 0 : index
    %274 = vector.load %arg5[%c1_220, %c0_221, %c0_222] : memref<27x8x8xf32, #tpu.memory_space<vmem>>, vector<1x8x8xf32>
    %275 = vector.shape_cast %274 : vector<1x8x8xf32> to vector<8x8xf32>
    %cst_223 = arith.constant dense<0.000000e+00> : vector<8x512xf32>
    %276 = tpu.matmul %275, %273, %cst_223 {dimension_numbers = #tpu.dot_dimension_numbers<[1], [0], [0], [1], [0, 0, 1, 1], [], []>} : vector<8x8xf32>, vector<8x512xf32>, vector<8x512xf32> -> vector<8x512xf32>
    %277 = arith.addf %268, %276 : vector<8x512xf32>
    %c0_224 = arith.constant 0 : index
    %c57_225 = arith.constant 57 : index
    %278 = vector.load %arg8[%c0_224, %c57_225] : memref<8x768xf32, #tpu.memory_space<vmem>>, vector<8x512xf32>
    %c2_226 = arith.constant 2 : index
    %c0_227 = arith.constant 0 : index
    %c0_228 = arith.constant 0 : index
    %279 = vector.load %arg2[%c2_226, %c0_227, %c0_228] : memref<27x1x512xf32, #tpu.memory_space<vmem>>, vector<1x1x512xf32>
    %280 = vector.shape_cast %279 : vector<1x1x512xf32> to vector<1x512xf32>
    %281 = vector.broadcast %280 : vector<1x512xf32> to vector<8x512xf32>
    %282 = arith.mulf %278, %281 : vector<8x512xf32>
    %c2_229 = arith.constant 2 : index
    %c0_230 = arith.constant 0 : index
    %c0_231 = arith.constant 0 : index
    %283 = vector.load %arg5[%c2_229, %c0_230, %c0_231] : memref<27x8x8xf32, #tpu.memory_space<vmem>>, vector<1x8x8xf32>
    %284 = vector.shape_cast %283 : vector<1x8x8xf32> to vector<8x8xf32>
    %cst_232 = arith.constant dense<0.000000e+00> : vector<8x512xf32>
    %285 = tpu.matmul %284, %282, %cst_232 {dimension_numbers = #tpu.dot_dimension_numbers<[1], [0], [0], [1], [0, 0, 1, 1], [], []>} : vector<8x8xf32>, vector<8x512xf32>, vector<8x512xf32> -> vector<8x512xf32>
    %286 = arith.addf %277, %285 : vector<8x512xf32>
    %c0_233 = arith.constant 0 : index
    %c63_234 = arith.constant 63 : index
    %287 = vector.load %arg8[%c0_233, %c63_234] : memref<8x768xf32, #tpu.memory_space<vmem>>, vector<8x512xf32>
    %c3_235 = arith.constant 3 : index
    %c0_236 = arith.constant 0 : index
    %c0_237 = arith.constant 0 : index
    %288 = vector.load %arg2[%c3_235, %c0_236, %c0_237] : memref<27x1x512xf32, #tpu.memory_space<vmem>>, vector<1x1x512xf32>
    %289 = vector.shape_cast %288 : vector<1x1x512xf32> to vector<1x512xf32>
    %290 = vector.broadcast %289 : vector<1x512xf32> to vector<8x512xf32>
    %291 = arith.mulf %287, %290 : vector<8x512xf32>
    %c3_238 = arith.constant 3 : index
    %c0_239 = arith.constant 0 : index
    %c0_240 = arith.constant 0 : index
    %292 = vector.load %arg5[%c3_238, %c0_239, %c0_240] : memref<27x8x8xf32, #tpu.memory_space<vmem>>, vector<1x8x8xf32>
    %293 = vector.shape_cast %292 : vector<1x8x8xf32> to vector<8x8xf32>
    %cst_241 = arith.constant dense<0.000000e+00> : vector<8x512xf32>
    %294 = tpu.matmul %293, %291, %cst_241 {dimension_numbers = #tpu.dot_dimension_numbers<[1], [0], [0], [1], [0, 0, 1, 1], [], []>} : vector<8x8xf32>, vector<8x512xf32>, vector<8x512xf32> -> vector<8x512xf32>
    %295 = arith.addf %286, %294 : vector<8x512xf32>
    %c0_242 = arith.constant 0 : index
    %c64_243 = arith.constant 64 : index
    %296 = vector.load %arg8[%c0_242, %c64_243] : memref<8x768xf32, #tpu.memory_space<vmem>>, vector<8x512xf32>
    %c4_244 = arith.constant 4 : index
    %c0_245 = arith.constant 0 : index
    %c0_246 = arith.constant 0 : index
    %297 = vector.load %arg2[%c4_244, %c0_245, %c0_246] : memref<27x1x512xf32, #tpu.memory_space<vmem>>, vector<1x1x512xf32>
    %298 = vector.shape_cast %297 : vector<1x1x512xf32> to vector<1x512xf32>
    %299 = vector.broadcast %298 : vector<1x512xf32> to vector<8x512xf32>
    %300 = arith.mulf %296, %299 : vector<8x512xf32>
    %c4_247 = arith.constant 4 : index
    %c0_248 = arith.constant 0 : index
    %c0_249 = arith.constant 0 : index
    %301 = vector.load %arg5[%c4_247, %c0_248, %c0_249] : memref<27x8x8xf32, #tpu.memory_space<vmem>>, vector<1x8x8xf32>
    %302 = vector.shape_cast %301 : vector<1x8x8xf32> to vector<8x8xf32>
    %cst_250 = arith.constant dense<0.000000e+00> : vector<8x512xf32>
    %303 = tpu.matmul %302, %300, %cst_250 {dimension_numbers = #tpu.dot_dimension_numbers<[1], [0], [0], [1], [0, 0, 1, 1], [], []>} : vector<8x8xf32>, vector<8x512xf32>, vector<8x512xf32> -> vector<8x512xf32>
    %304 = arith.addf %295, %303 : vector<8x512xf32>
    %c0_251 = arith.constant 0 : index
    %c65_252 = arith.constant 65 : index
    %305 = vector.load %arg8[%c0_251, %c65_252] : memref<8x768xf32, #tpu.memory_space<vmem>>, vector<8x512xf32>
    %c5_253 = arith.constant 5 : index
    %c0_254 = arith.constant 0 : index
    %c0_255 = arith.constant 0 : index
    %306 = vector.load %arg2[%c5_253, %c0_254, %c0_255] : memref<27x1x512xf32, #tpu.memory_space<vmem>>, vector<1x1x512xf32>
    %307 = vector.shape_cast %306 : vector<1x1x512xf32> to vector<1x512xf32>
    %308 = vector.broadcast %307 : vector<1x512xf32> to vector<8x512xf32>
    %309 = arith.mulf %305, %308 : vector<8x512xf32>
    %c5_256 = arith.constant 5 : index
    %c0_257 = arith.constant 0 : index
    %c0_258 = arith.constant 0 : index
    %310 = vector.load %arg5[%c5_256, %c0_257, %c0_258] : memref<27x8x8xf32, #tpu.memory_space<vmem>>, vector<1x8x8xf32>
    %311 = vector.shape_cast %310 : vector<1x8x8xf32> to vector<8x8xf32>
    %cst_259 = arith.constant dense<0.000000e+00> : vector<8x512xf32>
    %312 = tpu.matmul %311, %309, %cst_259 {dimension_numbers = #tpu.dot_dimension_numbers<[1], [0], [0], [1], [0, 0, 1, 1], [], []>} : vector<8x8xf32>, vector<8x512xf32>, vector<8x512xf32> -> vector<8x512xf32>
    %313 = arith.addf %304, %312 : vector<8x512xf32>
    %c0_260 = arith.constant 0 : index
    %c71_261 = arith.constant 71 : index
    %314 = vector.load %arg8[%c0_260, %c71_261] : memref<8x768xf32, #tpu.memory_space<vmem>>, vector<8x512xf32>
    %c6_262 = arith.constant 6 : index
    %c0_263 = arith.constant 0 : index
    %c0_264 = arith.constant 0 : index
    %315 = vector.load %arg2[%c6_262, %c0_263, %c0_264] : memref<27x1x512xf32, #tpu.memory_space<vmem>>, vector<1x1x512xf32>
    %316 = vector.shape_cast %315 : vector<1x1x512xf32> to vector<1x512xf32>
    %317 = vector.broadcast %316 : vector<1x512xf32> to vector<8x512xf32>
    %318 = arith.mulf %314, %317 : vector<8x512xf32>
    %c6_265 = arith.constant 6 : index
    %c0_266 = arith.constant 0 : index
    %c0_267 = arith.constant 0 : index
    %319 = vector.load %arg5[%c6_265, %c0_266, %c0_267] : memref<27x8x8xf32, #tpu.memory_space<vmem>>, vector<1x8x8xf32>
    %320 = vector.shape_cast %319 : vector<1x8x8xf32> to vector<8x8xf32>
    %cst_268 = arith.constant dense<0.000000e+00> : vector<8x512xf32>
    %321 = tpu.matmul %320, %318, %cst_268 {dimension_numbers = #tpu.dot_dimension_numbers<[1], [0], [0], [1], [0, 0, 1, 1], [], []>} : vector<8x8xf32>, vector<8x512xf32>, vector<8x512xf32> -> vector<8x512xf32>
    %322 = arith.addf %313, %321 : vector<8x512xf32>
    %c0_269 = arith.constant 0 : index
    %c72_270 = arith.constant 72 : index
    %323 = vector.load %arg8[%c0_269, %c72_270] : memref<8x768xf32, #tpu.memory_space<vmem>>, vector<8x512xf32>
    %c7_271 = arith.constant 7 : index
    %c0_272 = arith.constant 0 : index
    %c0_273 = arith.constant 0 : index
    %324 = vector.load %arg2[%c7_271, %c0_272, %c0_273] : memref<27x1x512xf32, #tpu.memory_space<vmem>>, vector<1x1x512xf32>
    %325 = vector.shape_cast %324 : vector<1x1x512xf32> to vector<1x512xf32>
    %326 = vector.broadcast %325 : vector<1x512xf32> to vector<8x512xf32>
    %327 = arith.mulf %323, %326 : vector<8x512xf32>
    %c7_274 = arith.constant 7 : index
    %c0_275 = arith.constant 0 : index
    %c0_276 = arith.constant 0 : index
    %328 = vector.load %arg5[%c7_274, %c0_275, %c0_276] : memref<27x8x8xf32, #tpu.memory_space<vmem>>, vector<1x8x8xf32>
    %329 = vector.shape_cast %328 : vector<1x8x8xf32> to vector<8x8xf32>
    %cst_277 = arith.constant dense<0.000000e+00> : vector<8x512xf32>
    %330 = tpu.matmul %329, %327, %cst_277 {dimension_numbers = #tpu.dot_dimension_numbers<[1], [0], [0], [1], [0, 0, 1, 1], [], []>} : vector<8x8xf32>, vector<8x512xf32>, vector<8x512xf32> -> vector<8x512xf32>
    %331 = arith.addf %322, %330 : vector<8x512xf32>
    %c0_278 = arith.constant 0 : index
    %c73_279 = arith.constant 73 : index
    %332 = vector.load %arg8[%c0_278, %c73_279] : memref<8x768xf32, #tpu.memory_space<vmem>>, vector<8x512xf32>
    %c8_280 = arith.constant 8 : index
    %c0_281 = arith.constant 0 : index
    %c0_282 = arith.constant 0 : index
    %333 = vector.load %arg2[%c8_280, %c0_281, %c0_282] : memref<27x1x512xf32, #tpu.memory_space<vmem>>, vector<1x1x512xf32>
    %334 = vector.shape_cast %333 : vector<1x1x512xf32> to vector<1x512xf32>
    %335 = vector.broadcast %334 : vector<1x512xf32> to vector<8x512xf32>
    %336 = arith.mulf %332, %335 : vector<8x512xf32>
    %c8_283 = arith.constant 8 : index
    %c0_284 = arith.constant 0 : index
    %c0_285 = arith.constant 0 : index
    %337 = vector.load %arg5[%c8_283, %c0_284, %c0_285] : memref<27x8x8xf32, #tpu.memory_space<vmem>>, vector<1x8x8xf32>
    %338 = vector.shape_cast %337 : vector<1x8x8xf32> to vector<8x8xf32>
    %cst_286 = arith.constant dense<0.000000e+00> : vector<8x512xf32>
    %339 = tpu.matmul %338, %336, %cst_286 {dimension_numbers = #tpu.dot_dimension_numbers<[1], [0], [0], [1], [0, 0, 1, 1], [], []>} : vector<8x8xf32>, vector<8x512xf32>, vector<8x512xf32> -> vector<8x512xf32>
    %340 = arith.addf %331, %339 : vector<8x512xf32>
    %c0_287 = arith.constant 0 : index
    %c119_288 = arith.constant 119 : index
    %341 = vector.load %arg8[%c0_287, %c119_288] : memref<8x768xf32, #tpu.memory_space<vmem>>, vector<8x512xf32>
    %c9_289 = arith.constant 9 : index
    %c0_290 = arith.constant 0 : index
    %c0_291 = arith.constant 0 : index
    %342 = vector.load %arg2[%c9_289, %c0_290, %c0_291] : memref<27x1x512xf32, #tpu.memory_space<vmem>>, vector<1x1x512xf32>
    %343 = vector.shape_cast %342 : vector<1x1x512xf32> to vector<1x512xf32>
    %344 = vector.broadcast %343 : vector<1x512xf32> to vector<8x512xf32>
    %345 = arith.mulf %341, %344 : vector<8x512xf32>
    %c9_292 = arith.constant 9 : index
    %c0_293 = arith.constant 0 : index
    %c0_294 = arith.constant 0 : index
    %346 = vector.load %arg5[%c9_292, %c0_293, %c0_294] : memref<27x8x8xf32, #tpu.memory_space<vmem>>, vector<1x8x8xf32>
    %347 = vector.shape_cast %346 : vector<1x8x8xf32> to vector<8x8xf32>
    %cst_295 = arith.constant dense<0.000000e+00> : vector<8x512xf32>
    %348 = tpu.matmul %347, %345, %cst_295 {dimension_numbers = #tpu.dot_dimension_numbers<[1], [0], [0], [1], [0, 0, 1, 1], [], []>} : vector<8x8xf32>, vector<8x512xf32>, vector<8x512xf32> -> vector<8x512xf32>
    %349 = arith.addf %340, %348 : vector<8x512xf32>
    %c0_296 = arith.constant 0 : index
    %c120_297 = arith.constant 120 : index
    %350 = vector.load %arg8[%c0_296, %c120_297] : memref<8x768xf32, #tpu.memory_space<vmem>>, vector<8x512xf32>
    %c10_298 = arith.constant 10 : index
    %c0_299 = arith.constant 0 : index
    %c0_300 = arith.constant 0 : index
    %351 = vector.load %arg2[%c10_298, %c0_299, %c0_300] : memref<27x1x512xf32, #tpu.memory_space<vmem>>, vector<1x1x512xf32>
    %352 = vector.shape_cast %351 : vector<1x1x512xf32> to vector<1x512xf32>
    %353 = vector.broadcast %352 : vector<1x512xf32> to vector<8x512xf32>
    %354 = arith.mulf %350, %353 : vector<8x512xf32>
    %c10_301 = arith.constant 10 : index
    %c0_302 = arith.constant 0 : index
    %c0_303 = arith.constant 0 : index
    %355 = vector.load %arg5[%c10_301, %c0_302, %c0_303] : memref<27x8x8xf32, #tpu.memory_space<vmem>>, vector<1x8x8xf32>
    %356 = vector.shape_cast %355 : vector<1x8x8xf32> to vector<8x8xf32>
    %cst_304 = arith.constant dense<0.000000e+00> : vector<8x512xf32>
    %357 = tpu.matmul %356, %354, %cst_304 {dimension_numbers = #tpu.dot_dimension_numbers<[1], [0], [0], [1], [0, 0, 1, 1], [], []>} : vector<8x8xf32>, vector<8x512xf32>, vector<8x512xf32> -> vector<8x512xf32>
    %358 = arith.addf %349, %357 : vector<8x512xf32>
    %c0_305 = arith.constant 0 : index
    %c121_306 = arith.constant 121 : index
    %359 = vector.load %arg8[%c0_305, %c121_306] : memref<8x768xf32, #tpu.memory_space<vmem>>, vector<8x512xf32>
    %c11_307 = arith.constant 11 : index
    %c0_308 = arith.constant 0 : index
    %c0_309 = arith.constant 0 : index
    %360 = vector.load %arg2[%c11_307, %c0_308, %c0_309] : memref<27x1x512xf32, #tpu.memory_space<vmem>>, vector<1x1x512xf32>
    %361 = vector.shape_cast %360 : vector<1x1x512xf32> to vector<1x512xf32>
    %362 = vector.broadcast %361 : vector<1x512xf32> to vector<8x512xf32>
    %363 = arith.mulf %359, %362 : vector<8x512xf32>
    %c11_310 = arith.constant 11 : index
    %c0_311 = arith.constant 0 : index
    %c0_312 = arith.constant 0 : index
    %364 = vector.load %arg5[%c11_310, %c0_311, %c0_312] : memref<27x8x8xf32, #tpu.memory_space<vmem>>, vector<1x8x8xf32>
    %365 = vector.shape_cast %364 : vector<1x8x8xf32> to vector<8x8xf32>
    %cst_313 = arith.constant dense<0.000000e+00> : vector<8x512xf32>
    %366 = tpu.matmul %365, %363, %cst_313 {dimension_numbers = #tpu.dot_dimension_numbers<[1], [0], [0], [1], [0, 0, 1, 1], [], []>} : vector<8x8xf32>, vector<8x512xf32>, vector<8x512xf32> -> vector<8x512xf32>
    %367 = arith.addf %358, %366 : vector<8x512xf32>
    %c0_314 = arith.constant 0 : index
    %c127_315 = arith.constant 127 : index
    %368 = vector.load %arg8[%c0_314, %c127_315] : memref<8x768xf32, #tpu.memory_space<vmem>>, vector<8x512xf32>
    %c12_316 = arith.constant 12 : index
    %c0_317 = arith.constant 0 : index
    %c0_318 = arith.constant 0 : index
    %369 = vector.load %arg2[%c12_316, %c0_317, %c0_318] : memref<27x1x512xf32, #tpu.memory_space<vmem>>, vector<1x1x512xf32>
    %370 = vector.shape_cast %369 : vector<1x1x512xf32> to vector<1x512xf32>
    %371 = vector.broadcast %370 : vector<1x512xf32> to vector<8x512xf32>
    %372 = arith.mulf %368, %371 : vector<8x512xf32>
    %c12_319 = arith.constant 12 : index
    %c0_320 = arith.constant 0 : index
    %c0_321 = arith.constant 0 : index
    %373 = vector.load %arg5[%c12_319, %c0_320, %c0_321] : memref<27x8x8xf32, #tpu.memory_space<vmem>>, vector<1x8x8xf32>
    %374 = vector.shape_cast %373 : vector<1x8x8xf32> to vector<8x8xf32>
    %cst_322 = arith.constant dense<0.000000e+00> : vector<8x512xf32>
    %375 = tpu.matmul %374, %372, %cst_322 {dimension_numbers = #tpu.dot_dimension_numbers<[1], [0], [0], [1], [0, 0, 1, 1], [], []>} : vector<8x8xf32>, vector<8x512xf32>, vector<8x512xf32> -> vector<8x512xf32>
    %376 = arith.addf %367, %375 : vector<8x512xf32>
    %c0_323 = arith.constant 0 : index
    %c128_324 = arith.constant 128 : index
    %377 = vector.load %arg8[%c0_323, %c128_324] : memref<8x768xf32, #tpu.memory_space<vmem>>, vector<8x512xf32>
    %c13_325 = arith.constant 13 : index
    %c0_326 = arith.constant 0 : index
    %c0_327 = arith.constant 0 : index
    %378 = vector.load %arg2[%c13_325, %c0_326, %c0_327] : memref<27x1x512xf32, #tpu.memory_space<vmem>>, vector<1x1x512xf32>
    %379 = vector.shape_cast %378 : vector<1x1x512xf32> to vector<1x512xf32>
    %380 = vector.broadcast %379 : vector<1x512xf32> to vector<8x512xf32>
    %381 = arith.mulf %377, %380 : vector<8x512xf32>
    %c13_328 = arith.constant 13 : index
    %c0_329 = arith.constant 0 : index
    %c0_330 = arith.constant 0 : index
    %382 = vector.load %arg5[%c13_328, %c0_329, %c0_330] : memref<27x8x8xf32, #tpu.memory_space<vmem>>, vector<1x8x8xf32>
    %383 = vector.shape_cast %382 : vector<1x8x8xf32> to vector<8x8xf32>
    %cst_331 = arith.constant dense<0.000000e+00> : vector<8x512xf32>
    %384 = tpu.matmul %383, %381, %cst_331 {dimension_numbers = #tpu.dot_dimension_numbers<[1], [0], [0], [1], [0, 0, 1, 1], [], []>} : vector<8x8xf32>, vector<8x512xf32>, vector<8x512xf32> -> vector<8x512xf32>
    %385 = arith.addf %376, %384 : vector<8x512xf32>
    %c0_332 = arith.constant 0 : index
    %c129_333 = arith.constant 129 : index
    %386 = vector.load %arg8[%c0_332, %c129_333] : memref<8x768xf32, #tpu.memory_space<vmem>>, vector<8x512xf32>
    %c14_334 = arith.constant 14 : index
    %c0_335 = arith.constant 0 : index
    %c0_336 = arith.constant 0 : index
    %387 = vector.load %arg2[%c14_334, %c0_335, %c0_336] : memref<27x1x512xf32, #tpu.memory_space<vmem>>, vector<1x1x512xf32>
    %388 = vector.shape_cast %387 : vector<1x1x512xf32> to vector<1x512xf32>
    %389 = vector.broadcast %388 : vector<1x512xf32> to vector<8x512xf32>
    %390 = arith.mulf %386, %389 : vector<8x512xf32>
    %c14_337 = arith.constant 14 : index
    %c0_338 = arith.constant 0 : index
    %c0_339 = arith.constant 0 : index
    %391 = vector.load %arg5[%c14_337, %c0_338, %c0_339] : memref<27x8x8xf32, #tpu.memory_space<vmem>>, vector<1x8x8xf32>
    %392 = vector.shape_cast %391 : vector<1x8x8xf32> to vector<8x8xf32>
    %cst_340 = arith.constant dense<0.000000e+00> : vector<8x512xf32>
    %393 = tpu.matmul %392, %390, %cst_340 {dimension_numbers = #tpu.dot_dimension_numbers<[1], [0], [0], [1], [0, 0, 1, 1], [], []>} : vector<8x8xf32>, vector<8x512xf32>, vector<8x512xf32> -> vector<8x512xf32>
    %394 = arith.addf %385, %393 : vector<8x512xf32>
    %c0_341 = arith.constant 0 : index
    %c135_342 = arith.constant 135 : index
    %395 = vector.load %arg8[%c0_341, %c135_342] : memref<8x768xf32, #tpu.memory_space<vmem>>, vector<8x512xf32>
    %c15_343 = arith.constant 15 : index
    %c0_344 = arith.constant 0 : index
    %c0_345 = arith.constant 0 : index
    %396 = vector.load %arg2[%c15_343, %c0_344, %c0_345] : memref<27x1x512xf32, #tpu.memory_space<vmem>>, vector<1x1x512xf32>
    %397 = vector.shape_cast %396 : vector<1x1x512xf32> to vector<1x512xf32>
    %398 = vector.broadcast %397 : vector<1x512xf32> to vector<8x512xf32>
    %399 = arith.mulf %395, %398 : vector<8x512xf32>
    %c15_346 = arith.constant 15 : index
    %c0_347 = arith.constant 0 : index
    %c0_348 = arith.constant 0 : index
    %400 = vector.load %arg5[%c15_346, %c0_347, %c0_348] : memref<27x8x8xf32, #tpu.memory_space<vmem>>, vector<1x8x8xf32>
    %401 = vector.shape_cast %400 : vector<1x8x8xf32> to vector<8x8xf32>
    %cst_349 = arith.constant dense<0.000000e+00> : vector<8x512xf32>
    %402 = tpu.matmul %401, %399, %cst_349 {dimension_numbers = #tpu.dot_dimension_numbers<[1], [0], [0], [1], [0, 0, 1, 1], [], []>} : vector<8x8xf32>, vector<8x512xf32>, vector<8x512xf32> -> vector<8x512xf32>
    %403 = arith.addf %394, %402 : vector<8x512xf32>
    %c0_350 = arith.constant 0 : index
    %c136_351 = arith.constant 136 : index
    %404 = vector.load %arg8[%c0_350, %c136_351] : memref<8x768xf32, #tpu.memory_space<vmem>>, vector<8x512xf32>
    %c16_352 = arith.constant 16 : index
    %c0_353 = arith.constant 0 : index
    %c0_354 = arith.constant 0 : index
    %405 = vector.load %arg2[%c16_352, %c0_353, %c0_354] : memref<27x1x512xf32, #tpu.memory_space<vmem>>, vector<1x1x512xf32>
    %406 = vector.shape_cast %405 : vector<1x1x512xf32> to vector<1x512xf32>
    %407 = vector.broadcast %406 : vector<1x512xf32> to vector<8x512xf32>
    %408 = arith.mulf %404, %407 : vector<8x512xf32>
    %c16_355 = arith.constant 16 : index
    %c0_356 = arith.constant 0 : index
    %c0_357 = arith.constant 0 : index
    %409 = vector.load %arg5[%c16_355, %c0_356, %c0_357] : memref<27x8x8xf32, #tpu.memory_space<vmem>>, vector<1x8x8xf32>
    %410 = vector.shape_cast %409 : vector<1x8x8xf32> to vector<8x8xf32>
    %cst_358 = arith.constant dense<0.000000e+00> : vector<8x512xf32>
    %411 = tpu.matmul %410, %408, %cst_358 {dimension_numbers = #tpu.dot_dimension_numbers<[1], [0], [0], [1], [0, 0, 1, 1], [], []>} : vector<8x8xf32>, vector<8x512xf32>, vector<8x512xf32> -> vector<8x512xf32>
    %412 = arith.addf %403, %411 : vector<8x512xf32>
    %c0_359 = arith.constant 0 : index
    %c137_360 = arith.constant 137 : index
    %413 = vector.load %arg8[%c0_359, %c137_360] : memref<8x768xf32, #tpu.memory_space<vmem>>, vector<8x512xf32>
    %c17_361 = arith.constant 17 : index
    %c0_362 = arith.constant 0 : index
    %c0_363 = arith.constant 0 : index
    %414 = vector.load %arg2[%c17_361, %c0_362, %c0_363] : memref<27x1x512xf32, #tpu.memory_space<vmem>>, vector<1x1x512xf32>
    %415 = vector.shape_cast %414 : vector<1x1x512xf32> to vector<1x512xf32>
    %416 = vector.broadcast %415 : vector<1x512xf32> to vector<8x512xf32>
    %417 = arith.mulf %413, %416 : vector<8x512xf32>
    %c17_364 = arith.constant 17 : index
    %c0_365 = arith.constant 0 : index
    %c0_366 = arith.constant 0 : index
    %418 = vector.load %arg5[%c17_364, %c0_365, %c0_366] : memref<27x8x8xf32, #tpu.memory_space<vmem>>, vector<1x8x8xf32>
    %419 = vector.shape_cast %418 : vector<1x8x8xf32> to vector<8x8xf32>
    %cst_367 = arith.constant dense<0.000000e+00> : vector<8x512xf32>
    %420 = tpu.matmul %419, %417, %cst_367 {dimension_numbers = #tpu.dot_dimension_numbers<[1], [0], [0], [1], [0, 0, 1, 1], [], []>} : vector<8x8xf32>, vector<8x512xf32>, vector<8x512xf32> -> vector<8x512xf32>
    %421 = arith.addf %412, %420 : vector<8x512xf32>
    %c0_368 = arith.constant 0 : index
    %c183_369 = arith.constant 183 : index
    %422 = vector.load %arg8[%c0_368, %c183_369] : memref<8x768xf32, #tpu.memory_space<vmem>>, vector<8x512xf32>
    %c18_370 = arith.constant 18 : index
    %c0_371 = arith.constant 0 : index
    %c0_372 = arith.constant 0 : index
    %423 = vector.load %arg2[%c18_370, %c0_371, %c0_372] : memref<27x1x512xf32, #tpu.memory_space<vmem>>, vector<1x1x512xf32>
    %424 = vector.shape_cast %423 : vector<1x1x512xf32> to vector<1x512xf32>
    %425 = vector.broadcast %424 : vector<1x512xf32> to vector<8x512xf32>
    %426 = arith.mulf %422, %425 : vector<8x512xf32>
    %c18_373 = arith.constant 18 : index
    %c0_374 = arith.constant 0 : index
    %c0_375 = arith.constant 0 : index
    %427 = vector.load %arg5[%c18_373, %c0_374, %c0_375] : memref<27x8x8xf32, #tpu.memory_space<vmem>>, vector<1x8x8xf32>
    %428 = vector.shape_cast %427 : vector<1x8x8xf32> to vector<8x8xf32>
    %cst_376 = arith.constant dense<0.000000e+00> : vector<8x512xf32>
    %429 = tpu.matmul %428, %426, %cst_376 {dimension_numbers = #tpu.dot_dimension_numbers<[1], [0], [0], [1], [0, 0, 1, 1], [], []>} : vector<8x8xf32>, vector<8x512xf32>, vector<8x512xf32> -> vector<8x512xf32>
    %430 = arith.addf %421, %429 : vector<8x512xf32>
    %c0_377 = arith.constant 0 : index
    %c184_378 = arith.constant 184 : index
    %431 = vector.load %arg8[%c0_377, %c184_378] : memref<8x768xf32, #tpu.memory_space<vmem>>, vector<8x512xf32>
    %c19_379 = arith.constant 19 : index
    %c0_380 = arith.constant 0 : index
    %c0_381 = arith.constant 0 : index
    %432 = vector.load %arg2[%c19_379, %c0_380, %c0_381] : memref<27x1x512xf32, #tpu.memory_space<vmem>>, vector<1x1x512xf32>
    %433 = vector.shape_cast %432 : vector<1x1x512xf32> to vector<1x512xf32>
    %434 = vector.broadcast %433 : vector<1x512xf32> to vector<8x512xf32>
    %435 = arith.mulf %431, %434 : vector<8x512xf32>
    %c19_382 = arith.constant 19 : index
    %c0_383 = arith.constant 0 : index
    %c0_384 = arith.constant 0 : index
    %436 = vector.load %arg5[%c19_382, %c0_383, %c0_384] : memref<27x8x8xf32, #tpu.memory_space<vmem>>, vector<1x8x8xf32>
    %437 = vector.shape_cast %436 : vector<1x8x8xf32> to vector<8x8xf32>
    %cst_385 = arith.constant dense<0.000000e+00> : vector<8x512xf32>
    %438 = tpu.matmul %437, %435, %cst_385 {dimension_numbers = #tpu.dot_dimension_numbers<[1], [0], [0], [1], [0, 0, 1, 1], [], []>} : vector<8x8xf32>, vector<8x512xf32>, vector<8x512xf32> -> vector<8x512xf32>
    %439 = arith.addf %430, %438 : vector<8x512xf32>
    %c0_386 = arith.constant 0 : index
    %c185_387 = arith.constant 185 : index
    %440 = vector.load %arg8[%c0_386, %c185_387] : memref<8x768xf32, #tpu.memory_space<vmem>>, vector<8x512xf32>
    %c20_388 = arith.constant 20 : index
    %c0_389 = arith.constant 0 : index
    %c0_390 = arith.constant 0 : index
    %441 = vector.load %arg2[%c20_388, %c0_389, %c0_390] : memref<27x1x512xf32, #tpu.memory_space<vmem>>, vector<1x1x512xf32>
    %442 = vector.shape_cast %441 : vector<1x1x512xf32> to vector<1x512xf32>
    %443 = vector.broadcast %442 : vector<1x512xf32> to vector<8x512xf32>
    %444 = arith.mulf %440, %443 : vector<8x512xf32>
    %c20_391 = arith.constant 20 : index
    %c0_392 = arith.constant 0 : index
    %c0_393 = arith.constant 0 : index
    %445 = vector.load %arg5[%c20_391, %c0_392, %c0_393] : memref<27x8x8xf32, #tpu.memory_space<vmem>>, vector<1x8x8xf32>
    %446 = vector.shape_cast %445 : vector<1x8x8xf32> to vector<8x8xf32>
    %cst_394 = arith.constant dense<0.000000e+00> : vector<8x512xf32>
    %447 = tpu.matmul %446, %444, %cst_394 {dimension_numbers = #tpu.dot_dimension_numbers<[1], [0], [0], [1], [0, 0, 1, 1], [], []>} : vector<8x8xf32>, vector<8x512xf32>, vector<8x512xf32> -> vector<8x512xf32>
    %448 = arith.addf %439, %447 : vector<8x512xf32>
    %c0_395 = arith.constant 0 : index
    %c191_396 = arith.constant 191 : index
    %449 = vector.load %arg8[%c0_395, %c191_396] : memref<8x768xf32, #tpu.memory_space<vmem>>, vector<8x512xf32>
    %c21_397 = arith.constant 21 : index
    %c0_398 = arith.constant 0 : index
    %c0_399 = arith.constant 0 : index
    %450 = vector.load %arg2[%c21_397, %c0_398, %c0_399] : memref<27x1x512xf32, #tpu.memory_space<vmem>>, vector<1x1x512xf32>
    %451 = vector.shape_cast %450 : vector<1x1x512xf32> to vector<1x512xf32>
    %452 = vector.broadcast %451 : vector<1x512xf32> to vector<8x512xf32>
    %453 = arith.mulf %449, %452 : vector<8x512xf32>
    %c21_400 = arith.constant 21 : index
    %c0_401 = arith.constant 0 : index
    %c0_402 = arith.constant 0 : index
    %454 = vector.load %arg5[%c21_400, %c0_401, %c0_402] : memref<27x8x8xf32, #tpu.memory_space<vmem>>, vector<1x8x8xf32>
    %455 = vector.shape_cast %454 : vector<1x8x8xf32> to vector<8x8xf32>
    %cst_403 = arith.constant dense<0.000000e+00> : vector<8x512xf32>
    %456 = tpu.matmul %455, %453, %cst_403 {dimension_numbers = #tpu.dot_dimension_numbers<[1], [0], [0], [1], [0, 0, 1, 1], [], []>} : vector<8x8xf32>, vector<8x512xf32>, vector<8x512xf32> -> vector<8x512xf32>
    %457 = arith.addf %448, %456 : vector<8x512xf32>
    %c0_404 = arith.constant 0 : index
    %c192_405 = arith.constant 192 : index
    %458 = vector.load %arg8[%c0_404, %c192_405] : memref<8x768xf32, #tpu.memory_space<vmem>>, vector<8x512xf32>
    %c22_406 = arith.constant 22 : index
    %c0_407 = arith.constant 0 : index
    %c0_408 = arith.constant 0 : index
    %459 = vector.load %arg2[%c22_406, %c0_407, %c0_408] : memref<27x1x512xf32, #tpu.memory_space<vmem>>, vector<1x1x512xf32>
    %460 = vector.shape_cast %459 : vector<1x1x512xf32> to vector<1x512xf32>
    %461 = vector.broadcast %460 : vector<1x512xf32> to vector<8x512xf32>
    %462 = arith.mulf %458, %461 : vector<8x512xf32>
    %c22_409 = arith.constant 22 : index
    %c0_410 = arith.constant 0 : index
    %c0_411 = arith.constant 0 : index
    %463 = vector.load %arg5[%c22_409, %c0_410, %c0_411] : memref<27x8x8xf32, #tpu.memory_space<vmem>>, vector<1x8x8xf32>
    %464 = vector.shape_cast %463 : vector<1x8x8xf32> to vector<8x8xf32>
    %cst_412 = arith.constant dense<0.000000e+00> : vector<8x512xf32>
    %465 = tpu.matmul %464, %462, %cst_412 {dimension_numbers = #tpu.dot_dimension_numbers<[1], [0], [0], [1], [0, 0, 1, 1], [], []>} : vector<8x8xf32>, vector<8x512xf32>, vector<8x512xf32> -> vector<8x512xf32>
    %466 = arith.addf %457, %465 : vector<8x512xf32>
    %c0_413 = arith.constant 0 : index
    %c193_414 = arith.constant 193 : index
    %467 = vector.load %arg8[%c0_413, %c193_414] : memref<8x768xf32, #tpu.memory_space<vmem>>, vector<8x512xf32>
    %c23_415 = arith.constant 23 : index
    %c0_416 = arith.constant 0 : index
    %c0_417 = arith.constant 0 : index
    %468 = vector.load %arg2[%c23_415, %c0_416, %c0_417] : memref<27x1x512xf32, #tpu.memory_space<vmem>>, vector<1x1x512xf32>
    %469 = vector.shape_cast %468 : vector<1x1x512xf32> to vector<1x512xf32>
    %470 = vector.broadcast %469 : vector<1x512xf32> to vector<8x512xf32>
    %471 = arith.mulf %467, %470 : vector<8x512xf32>
    %c23_418 = arith.constant 23 : index
    %c0_419 = arith.constant 0 : index
    %c0_420 = arith.constant 0 : index
    %472 = vector.load %arg5[%c23_418, %c0_419, %c0_420] : memref<27x8x8xf32, #tpu.memory_space<vmem>>, vector<1x8x8xf32>
    %473 = vector.shape_cast %472 : vector<1x8x8xf32> to vector<8x8xf32>
    %cst_421 = arith.constant dense<0.000000e+00> : vector<8x512xf32>
    %474 = tpu.matmul %473, %471, %cst_421 {dimension_numbers = #tpu.dot_dimension_numbers<[1], [0], [0], [1], [0, 0, 1, 1], [], []>} : vector<8x8xf32>, vector<8x512xf32>, vector<8x512xf32> -> vector<8x512xf32>
    %475 = arith.addf %466, %474 : vector<8x512xf32>
    %c0_422 = arith.constant 0 : index
    %c199_423 = arith.constant 199 : index
    %476 = vector.load %arg8[%c0_422, %c199_423] : memref<8x768xf32, #tpu.memory_space<vmem>>, vector<8x512xf32>
    %c24_424 = arith.constant 24 : index
    %c0_425 = arith.constant 0 : index
    %c0_426 = arith.constant 0 : index
    %477 = vector.load %arg2[%c24_424, %c0_425, %c0_426] : memref<27x1x512xf32, #tpu.memory_space<vmem>>, vector<1x1x512xf32>
    %478 = vector.shape_cast %477 : vector<1x1x512xf32> to vector<1x512xf32>
    %479 = vector.broadcast %478 : vector<1x512xf32> to vector<8x512xf32>
    %480 = arith.mulf %476, %479 : vector<8x512xf32>
    %c24_427 = arith.constant 24 : index
    %c0_428 = arith.constant 0 : index
    %c0_429 = arith.constant 0 : index
    %481 = vector.load %arg5[%c24_427, %c0_428, %c0_429] : memref<27x8x8xf32, #tpu.memory_space<vmem>>, vector<1x8x8xf32>
    %482 = vector.shape_cast %481 : vector<1x8x8xf32> to vector<8x8xf32>
    %cst_430 = arith.constant dense<0.000000e+00> : vector<8x512xf32>
    %483 = tpu.matmul %482, %480, %cst_430 {dimension_numbers = #tpu.dot_dimension_numbers<[1], [0], [0], [1], [0, 0, 1, 1], [], []>} : vector<8x8xf32>, vector<8x512xf32>, vector<8x512xf32> -> vector<8x512xf32>
    %484 = arith.addf %475, %483 : vector<8x512xf32>
    %c0_431 = arith.constant 0 : index
    %c200_432 = arith.constant 200 : index
    %485 = vector.load %arg8[%c0_431, %c200_432] : memref<8x768xf32, #tpu.memory_space<vmem>>, vector<8x512xf32>
    %c25_433 = arith.constant 25 : index
    %c0_434 = arith.constant 0 : index
    %c0_435 = arith.constant 0 : index
    %486 = vector.load %arg2[%c25_433, %c0_434, %c0_435] : memref<27x1x512xf32, #tpu.memory_space<vmem>>, vector<1x1x512xf32>
    %487 = vector.shape_cast %486 : vector<1x1x512xf32> to vector<1x512xf32>
    %488 = vector.broadcast %487 : vector<1x512xf32> to vector<8x512xf32>
    %489 = arith.mulf %485, %488 : vector<8x512xf32>
    %c25_436 = arith.constant 25 : index
    %c0_437 = arith.constant 0 : index
    %c0_438 = arith.constant 0 : index
    %490 = vector.load %arg5[%c25_436, %c0_437, %c0_438] : memref<27x8x8xf32, #tpu.memory_space<vmem>>, vector<1x8x8xf32>
    %491 = vector.shape_cast %490 : vector<1x8x8xf32> to vector<8x8xf32>
    %cst_439 = arith.constant dense<0.000000e+00> : vector<8x512xf32>
    %492 = tpu.matmul %491, %489, %cst_439 {dimension_numbers = #tpu.dot_dimension_numbers<[1], [0], [0], [1], [0, 0, 1, 1], [], []>} : vector<8x8xf32>, vector<8x512xf32>, vector<8x512xf32> -> vector<8x512xf32>
    %493 = arith.addf %484, %492 : vector<8x512xf32>
    %c0_440 = arith.constant 0 : index
    %c201_441 = arith.constant 201 : index
    %494 = vector.load %arg8[%c0_440, %c201_441] : memref<8x768xf32, #tpu.memory_space<vmem>>, vector<8x512xf32>
    %c26_442 = arith.constant 26 : index
    %c0_443 = arith.constant 0 : index
    %c0_444 = arith.constant 0 : index
    %495 = vector.load %arg2[%c26_442, %c0_443, %c0_444] : memref<27x1x512xf32, #tpu.memory_space<vmem>>, vector<1x1x512xf32>
    %496 = vector.shape_cast %495 : vector<1x1x512xf32> to vector<1x512xf32>
    %497 = vector.broadcast %496 : vector<1x512xf32> to vector<8x512xf32>
    %498 = arith.mulf %494, %497 : vector<8x512xf32>
    %c26_445 = arith.constant 26 : index
    %c0_446 = arith.constant 0 : index
    %c0_447 = arith.constant 0 : index
    %499 = vector.load %arg5[%c26_445, %c0_446, %c0_447] : memref<27x8x8xf32, #tpu.memory_space<vmem>>, vector<1x8x8xf32>
    %500 = vector.shape_cast %499 : vector<1x8x8xf32> to vector<8x8xf32>
    %cst_448 = arith.constant dense<0.000000e+00> : vector<8x512xf32>
    %501 = tpu.matmul %500, %498, %cst_448 {dimension_numbers = #tpu.dot_dimension_numbers<[1], [0], [0], [1], [0, 0, 1, 1], [], []>} : vector<8x8xf32>, vector<8x512xf32>, vector<8x512xf32> -> vector<8x512xf32>
    %502 = arith.addf %493, %501 : vector<8x512xf32>
    %c0_449 = arith.constant 0 : index
    %c0_450 = arith.constant 0 : index
    %503 = vector.load %arg6[%c0_449, %c0_450] : memref<8x1xf32, #tpu.memory_space<vmem>>, vector<8x1xf32>
    %504 = vector.broadcast %503 : vector<8x1xf32> to vector<8x512xf32>
    %505 = arith.addf %502, %504 : vector<8x512xf32>
    %cst_451 = arith.constant 0.000000e+00 : f32
    %506 = vector.broadcast %cst_451 : f32 to vector<8x512xf32>
    %507 = arith.cmpf oge, %505, %506 : vector<8x512xf32>
    %cst_452 = arith.constant 0.00999999977 : f32
    %508 = vector.broadcast %cst_452 : f32 to vector<8x512xf32>
    %509 = arith.mulf %508, %505 : vector<8x512xf32>
    %510 = arith.select %507, %505, %509 : vector<8x512xi1>, vector<8x512xf32>
    %c0_453 = arith.constant 0 : index
    %c0_454 = arith.constant 0 : index
    %c0_455 = arith.constant 0 : index
    %511 = vector.load %arg7[%c0_453, %c0_454, %c0_455] : memref<1x8x512xf32, #tpu.memory_space<vmem>>, vector<1x8x512xf32>
    %512 = vector.shape_cast %511 : vector<1x8x512xf32> to vector<8x512xf32>
    %513 = vector.shape_cast %510 : vector<8x512xf32> to vector<1x8x512xf32>
    tpu.vector_store %arg7[%c0_453, %c0_454, %c0_455], %513 {strides = array<i32>} : memref<1x8x512xf32, #tpu.memory_space<vmem>>, vector<1x8x512xf32>,
    return
  }
  func.func @transform_0(%arg0: i32) -> (i32, i32, i32, i32) {
    %c0_i32 = arith.constant 0 : i32
    %c0_i32_0 = arith.constant 0 : i32
    %c0_i32_1 = arith.constant 0 : i32
    %c0_i32_2 = arith.constant 0 : i32
    return %arg0, %c0_i32, %c0_i32_0, %c0_i32_1 : i32, i32, i32, i32
  }
  func.func @transform_1(%arg0: i32) -> (i32, i32, i32) {
    %c0_i32 = arith.constant 0 : i32
    %c0_i32_0 = arith.constant 0 : i32
    %c0_i32_1 = arith.constant 0 : i32
    %c0_i32_2 = arith.constant 0 : i32
    return %c0_i32, %c0_i32_0, %c0_i32_1 : i32, i32, i32
  }
  func.func @transform_2(%arg0: i32) -> (i32, i32, i32) {
    %c0_i32 = arith.constant 0 : i32
    %c0_i32_0 = arith.constant 0 : i32
    %c0_i32_1 = arith.constant 0 : i32
    %c0_i32_2 = arith.constant 0 : i32
    return %c0_i32, %c0_i32_0, %c0_i32_1 : i32, i32, i32
  }
  func.func @transform_3(%arg0: i32) -> (i32, i32) {
    %c0_i32 = arith.constant 0 : i32
    %c0_i32_0 = arith.constant 0 : i32
    %c0_i32_1 = arith.constant 0 : i32
    return %c0_i32, %c0_i32_0 : i32, i32
  }
  func.func @transform_4(%arg0: i32) -> (i32, i32, i32) {
    %c0_i32 = arith.constant 0 : i32
    %c0_i32_0 = arith.constant 0 : i32
    %c0_i32_1 = arith.constant 0 : i32
    %c0_i32_2 = arith.constant 0 : i32
    return %c0_i32, %c0_i32_0, %c0_i32_1 : i32, i32, i32
  }
  func.func @transform_5(%arg0: i32) -> (i32, i32) {
    %c0_i32 = arith.constant 0 : i32
    %c0_i32_0 = arith.constant 0 : i32
    %c0_i32_1 = arith.constant 0 : i32
    return %c0_i32, %c0_i32_0 : i32, i32
  }
  func.func @transform_6(%arg0: i32) -> (i32, i32, i32) {
    %c0_i32 = arith.constant 0 : i32
    %c0_i32_0 = arith.constant 0 : i32
    %c0_i32_1 = arith.constant 0 : i32
    return %arg0, %c0_i32, %c0_i32_0 : i32, i32, i32
  }
}

</mosaic_0001>

<bundles_post_ra>
// kernel: downblock_forward.1
= control target key start
LH: loop header
LB: loop body
LE: loop exit
PB: predicated region body
PF: predicated region fallthrough
CT: control target
= control target key end

     0   :  { %s12207_s21 = smov 0   ;;  %s15126_s0 = inlined_call_operand.vmem [shape: f32[2,8,4,512], index: 0, kind: input, shape index: {}]   ;;  %s15127_s1 = inlined_call_operand.vmem [shape: f32[27,1,512], index: 1, kind: input, shape index: {}]   ;;  %s15128_s2 = inlined_call_operand.vmem [shape: f32[27,8,8], index: 2, kind: input, shape index: {}]   ;;  %s15129_s3 = inlined_call_operand.vmem [shape: f32[8,1], index: 3, kind: input, shape index: {}]   ;;  %s15130_s4 = inlined_call_operand.vmem [shape: f32[27,8,8], index: 4, kind: input, shape index: {}]   ;;  %s15131_s5 = inlined_call_operand.vmem [shape: f32[8,1], index: 5, kind: input, shape index: {}]   ;;  %s15132_s6 = inlined_call_operand.vmem [shape: f32[2,8,512], index: 6, kind: output, shape index: {}]  }
   0x1 LB: > { %s11880_s22 = sadd.s32 4294967295, %s12151_s21   ;;  %p11884_p0 = scmp.ge.s32.totalorder %s12151_s21, 1  ;;  %s12151_s21 = sphi %s12207_s21, %s16_s21  }
   0x2   : > { %p212_p1 = scmp.lt.s32.totalorder %s12151_s21, 3 }
   0x4   : > { %p213_p2 = pnand %p11884_p0, %p212_p1 }
   0x6   : > { %216 = sbr.rel (%p213_p2) target bundleno = 1938 (0x792), region = 44 }
   0xb   : > { %v305_v0 = vlaneseq  ;;  %v303_v2 = vld [vmem:[%s15127_s1] sm:$0xf]  ;;  %v12153_v3 = vmov 0.0   ;;  %p242_p3 = scmp.lt.s32.totalorder %s11880_s22, 1  ;;  %s12154_s25 = smov 55   ;;  %vm371_vm0 = vcmask 457728  }
   0xc   : > { %282 = vst [vmem:[#allocation2 + $0x28] sm:$0xff] %v12153_v3  ;;  %283 = vst [vmem:[#allocation2 + $0x10] sm:$0xff] %v12153_v3  ;;  %479 = vmatprep.mubr.f32.mxu0 %v12153_v3  ;;  %550 = vmatprep.mubr.f32.mxu1 %v12153_v3  ;;  %v11889_v12 = vld [vmem:[%s15127_s1 + $0x4] sm:$0xf]  ;;  %s12155_s8 = smov 56   ;;  %s12156_s11 = smov 57  }
   0xd   : > { %v306_v1 = vshrl.u32 %v305_v0, 7  ;;  %284 = vst [vmem:[#allocation2 + $0x8] sm:$0xff] %v12153_v3  ;;  %285 = vst [vmem:[#allocation2] sm:$0xff] %v12153_v3  ;;  %s15237_s22 = smov (!%p242_p3, %s11880_s22), 1  ;;  %v11895_v35 = vld [vmem:[%s15127_s1 + $0x8] sm:$0xf] }
   0xe   : > { %286 = vst [vmem:[#allocation2 + $0x18] sm:$0xff] %v12153_v3  ;;  %s12103_s28 = sshll.u32 %s15237_s22, 7  ;;  %v11899_v54 = vld [vmem:[%s15127_s1 + $0xc] sm:$0xf]  ;;  %s12157_s14 = smov 63   ;;  %vm329_vm1 = vcmask 449536  }
   0xf   : > { %v12225_v4 = vsub.s32 2, %v306_v1  ;;  %v12227_v5 = vsub.s32 0, %v306_v1  ;;  %v12229_v6 = vsub.s32 3, %v306_v1  ;;  %v12231_v7 = vsub.s32 1, %v306_v1  ;;  %s12248_s7 = scalar_lea.vmem %s15126_s0, %s12103_s28  ;;  %v11903_v59 = vld [vmem:[%s15127_s1 + $0x10] sm:$0xf] }
  0x10   : > { %v253_v13 = vld [vmem:[%s12248_s7 + $0x8] sm:$0xff]  ;;  %v255_v14 = vld [vmem:[%s12248_s7 + $0x18] sm:$0xff]  ;;  %v252_v25 = vld [vmem:[%s12248_s7] sm:$0xff]  ;;  %s12158_s17 = smov 64   ;;  %s12159_s20 = smov 65   ;;  %vm753_vm2 = vcmask 465920  }
  0x11   : > { %15152 = vst [vmem:[#allocation3_spill] sm:$0xff] %v12225_v4  ;;  %15153 = vst [vmem:[#allocation4_spill] sm:$0xff] %v12227_v5  ;;  %v316_v8 = vrot.slane %v303_v2, %v12225_v4  ;;  %v308_v9 = vrot.slane %v303_v2, %v12227_v5  ;;  %v320_v10 = vrot.slane %v303_v2, %v12229_v6  ;;  %v257_v15 = vld [vmem:[%s12248_s7 + $0x28] sm:$0xff]  ;;  %v259_v18 = vld [vmem:[%s12248_s7 + $0x38] sm:$0xff]  ;;  %s12160_s26 = smov 71   ;;  %s12161_s29 = smov 72  }
  0x12   : > { %v312_v11 = vrot.slane %v303_v2, %v12231_v7  ;;  %v354_v16 = vrot.slane %v11889_v12, %v12231_v7  ;;  %v350_v17 = vrot.slane %v11889_v12, %v12227_v5  ;;  %v261_v19 = vld [vmem:[%s12248_s7 + $0x48] sm:$0xff]  ;;  %v263_v20 = vld [vmem:[%s12248_s7 + $0x58] sm:$0xff]  ;;  %v275_v23 = vmax.f32 %v253_v13, %v257_v15  ;;  %v254_v26 = vld [vmem:[%s12248_s7 + $0x10] sm:$0xff]  ;;  %s12162_s30 = smov 73   ;;  %s12163_s18 = smov 119  }
  0x13   : > { %325 = vrot.lane.b32.xlu1 %v316_v8, %s12154_s25  ;;  %321 = vrot.lane.b32.xlu0 %v308_v9, %s12154_s25  ;;  %v265_v21 = vld [vmem:[%s12248_s7 + $0x68] sm:$0xff]  ;;  %v267_v22 = vld [vmem:[%s12248_s7 + $0x78] sm:$0xff]  ;;  %v276_v24 = vmax.f32 %v255_v14, %v259_v18  ;;  %v362_v28 = vrot.slane %v11889_v12, %v12229_v6  ;;  %v358_v34 = vrot.slane %v11889_v12, %v12225_v4  ;;  %vm969_vm3 = vcmask 515072   ;;  %s12164_s24 = smov 9   ;;  %s12166_s12 = smov 121  }
  0x14   : > { %v256_v27 = vld [vmem:[%s12248_s7 + $0x20] sm:$0xff]  ;;  %v277_v29 = vmax.f32 %v275_v23, %v261_v19  ;;  %v258_v30 = vld [vmem:[%s12248_s7 + $0x30] sm:$0xff]  ;;  %v736_v44 = vrot.slane %v11895_v35, %v12231_v7  ;;  %v732_v46 = vrot.slane %v11895_v35, %v12227_v5  ;;  %v744_v51 = vrot.slane %v11895_v35, %v12229_v6  ;;  %v12332_v15 = vld [vmem:[%s15127_s1 + $0x1c] sm:$0xf]  ;;  %s12167_s16 = smov 127   ;;  %s12168_s27 = smov 1  }
  0x15   : > { %v260_v31 = vld [vmem:[%s12248_s7 + $0x40] sm:$0xff]  ;;  %v262_v32 = vld [vmem:[%s12248_s7 + $0x50] sm:$0xff]  ;;  %v268_v33 = vmax.f32 %v252_v25, %v256_v27  ;;  %v278_v36 = vmax.f32 %v276_v24, %v263_v20  ;;  %v269_v38 = vmax.f32 %v254_v26, %v258_v30  ;;  %v740_v52 = vrot.slane %v11895_v35, %v12225_v4  ;;  %s12169_s10 = smov 7   ;;  %s12170_s19 = smov 8  }
  0x16   : > { %v264_v37 = vld [vmem:[%s12248_s7 + $0x60] sm:$0xff]  ;;  %v279_v39 = vmax.f32 %v277_v29, %v265_v21  ;;  %v266_v40 = vld [vmem:[%s12248_s7 + $0x70] sm:$0xff]  ;;  %v948_v55 = vrot.slane %v11899_v54, %v12227_v5  ;;  %v952_v56 = vrot.slane %v11899_v54, %v12231_v7  ;;  %v956_v57 = vrot.slane %v11899_v54, %v12225_v4  ;;  %s12165_s7 = smov 120  }
  0x17   : > { %327 = vrot.lane.b32.xlu1 %v320_v10, %s12154_s25  ;;  %323 = vrot.lane.b32.xlu0 %v312_v11, %s12154_s25  ;;  %v270_v41 = vmax.f32 %v268_v33, %v260_v31  ;;  %v280_v42 = vmax.f32 %v278_v36, %v267_v22  ;;  %v271_v43 = vmax.f32 %v269_v38, %v262_v32  ;;  %v11907_v0 = vld [vmem:[%s15127_s1 + $0x14] sm:$0xf]  ;;  %v11911_v10 = vld [vmem:[%s15127_s1 + $0x18] sm:$0xf]  ;;  %vm1185_vm4 = vcmask 523264  }
  0x18   : > { %v960_v58 = vrot.slane %v11899_v54, %v12229_v6  ;;  %v1168_v60 = vrot.slane %v11903_v59, %v12231_v7  ;;  %v1164_v61 = vrot.slane %v11903_v59, %v12227_v5  ;;  %v1176_v62 = vrot.slane %v11903_v59, %v12229_v6 }
  0x19   : > { %v272_v45 = vmax.f32 %v270_v41, %v264_v37  ;;  %v281_v47 = vmax.f32 %v279_v39, %v280_v42  ;;  %v273_v48 = vmax.f32 %v271_v43, %v266_v40  ;;  %v1172_v63 = vrot.slane %v11903_v59, %v12225_v4 }
  0x1a   : > { %v1379_v1 = vrot.slane %v11907_v0, %v12227_v5  ;;  %v1383_v2 = vrot.slane %v11907_v0, %v12231_v7  ;;  %v1387_v8 = vrot.slane %v11907_v0, %v12225_v4  ;;  %v1391_v9 = vrot.slane %v11907_v0, %v12229_v6 }
  0x1b   : > { %365 = vrot.lane.b32.xlu1 %v354_v16, %s12155_s8  ;;  %363 = vrot.lane.b32.xlu0 %v350_v17, %s12155_s8  ;;  %v291_v49 = vcombine.high %v281_v47, %v281_v47  ;;  %296 = vst [vmem:[#allocation2] sm:$0xf] %v281_v47  ;;  %v274_v50 = vmax.f32 %v272_v45, %v273_v48  ;;  %vm1000_vm5 = vcmask 531456   ;;  %vm784_vm6 = vcmask 580608  }
  0x1c   : > { %v1597_v11 = vrot.slane %v11911_v10, %v12231_v7  ;;  %v1593_v12 = vrot.slane %v11911_v10, %v12227_v5  ;;  %v1605_v13 = vrot.slane %v11911_v10, %v12229_v6  ;;  %v1601_v14 = vrot.slane %v11911_v10, %v12225_v4 }
  0x1d   : > { %297 = vst [vmem:[#allocation2 + $0x18] sm:$0xf] %v291_v49  ;;  %294 = vst [vmem:[#allocation2 + $0x10] sm:$0xf] %v274_v50  ;;  %v290_v53 = vcombine.high %v274_v50, %v274_v50  ;;  %v1807_v16 = vrot.slane %v12332_v15, %v12227_v5  ;;  %vm402_vm7 = vcmask 588800   ;;  %vm411_vm8 = vcmask 64512  }
  0x1e   : > { %vm572_vm9 = vcmask 596992   ;;  %vm15133_vm10 = vcmask 973824   ;;  %vm15134_vm11 = vcmask 72704   ;;  %vm2472_vm12 = vcmask 982016  }
  0x1f   : > { %369 = vrot.lane.b32.xlu1 %v362_v28, %s12155_s8  ;;  %367 = vrot.lane.b32.xlu0 %v358_v34, %s12155_s8  ;;  %295 = vst [vmem:[#allocation2 + $0x8] sm:$0xf] %v290_v53  ;;  %vm2687_vm13 = vcmask 990208   ;;  %vm15137_vm14 = vcmask 1039360   ;;  %vm15136_vm15 = vcmask 7168  }
  0x23   : > { %747 = vrot.lane.b32.xlu1 %v736_v44, %s12156_s11  ;;  %745 = vrot.lane.b32.xlu0 %v732_v46, %s12156_s11 }
  0x24   : > { %v12344_v20 = vld [vmem:[#allocation2 + $0x18] sm:$0xff] }
  0x27   : > { %751 = vrot.lane.b32.xlu1 %v744_v51, %s12156_s11  ;;  %749 = vrot.lane.b32.xlu0 %v740_v52, %s12156_s11 }
  0x2b   : > { %961 = vrot.lane.b32.xlu1 %v948_v55, %s12157_s14  ;;  %963 = vrot.lane.b32.xlu0 %v952_v56, %s12157_s14 }
  0x2f   : > { %965 = vrot.lane.b32.xlu1 %v956_v57, %s12157_s14  ;;  %967 = vrot.lane.b32.xlu0 %v960_v58, %s12157_s14  ;;  %v12403_v57 = vld [vmem:[#allocation2 + $0x10] sm:$0xff] }
  0x33   : > { %1179 = vrot.lane.b32.xlu1 %v1168_v60, %s12158_s17  ;;  %1177 = vrot.lane.b32.xlu0 %v1164_v61, %s12158_s17 }
  0x37   : > { %1183 = vrot.lane.b32.xlu1 %v1176_v62, %s12158_s17  ;;  %1181 = vrot.lane.b32.xlu0 %v1172_v63, %s12158_s17  ;;  %v12409_v62 = vld [vmem:[#allocation2] sm:$0xff] }
  0x3b   : > { %1392 = vrot.lane.b32.xlu1 %v1379_v1, %s12159_s20  ;;  %1394 = vrot.lane.b32.xlu0 %v1383_v2, %s12159_s20 }
  0x3f   : > { %1396 = vrot.lane.b32.xlu1 %v1387_v8, %s12159_s20  ;;  %1398 = vrot.lane.b32.xlu0 %v1391_v9, %s12159_s20  ;;  %v12417_v8 = vld [vmem:[#allocation2 + $0x8] sm:$0xff] }
  0x43   : > { %1608 = vrot.lane.b32.xlu1 %v1597_v11, %s12160_s26  ;;  %1606 = vrot.lane.b32.xlu0 %v1593_v12, %s12160_s26 }
  0x47   : > { %1612 = vrot.lane.b32.xlu1 %v1605_v13, %s12160_s26  ;;  %1610 = vrot.lane.b32.xlu0 %v1601_v14, %s12160_s26 }
  0x4b   : > { %1820 = vrot.lane.b32.xlu1 %v1807_v16, %s12161_s29 }
  0x85   : > { %v12339_v17 = vpop.permute.xlu1 %325  ;;  %v12341_v18 = vpop.permute.xlu0 %321 }
  0x86   : > { %v338_v19 = vmul.f32 0.0, %v12341_v18 }
  0x88   : > { %562 = vrot.lane.b32.xlu1 %v338_v19, %s12162_s30 }
  0x89   : > { %v12347_v21 = vpop.permute.xlu1 %327  ;;  %v12349_v22 = vpop.permute.xlu0 %323 }
  0x8a   : > { %v342_v23 = vmul.f32 %v12347_v21, %v12344_v20  ;;  %v331_v1 = vsel %vm329_vm1, %v12349_v22, %v12339_v17  ;;  %v330_v11 = vsel %vm329_vm1, %v12341_v18, %v12349_v22  ;;  %v332_v16 = vsel %vm329_vm1, %v12339_v17, %v12347_v21 }
  0x8b   : > { %v340_v10 = vmul.f32 %v331_v1, %v12417_v8  ;;  %v339_v13 = vmul.f32 %v330_v11, %v12403_v57  ;;  %v341_v18 = vmul.f32 %v332_v16, %v12409_v62 }
  0x8c   : > { %570 = vrot.lane.b32.xlu1 %v342_v23, %s12162_s30 }
  0x8d   : > { %v366_v24 = vpop.permute.xlu1 %365  ;;  %v364_v25 = vpop.permute.xlu0 %363 }
  0x8e   : > { %v380_v26 = vmul.f32 0.0, %v364_v25  ;;  %v372_v54 = vsel %vm371_vm0, %v364_v25, %v366_v24 }
  0x8f   : > { %v381_v59 = vmul.f32 %v372_v54, %v12403_v57 }
  0x90   : > { %392 = vrot.lane.b32.xlu0 %v380_v26, %s12161_s29 }
  0x91   : > { %v370_v27 = vpop.permute.xlu1 %369  ;;  %v368_v28 = vpop.permute.xlu0 %367 }
  0x92   : > { %v384_v29 = vmul.f32 %v370_v27, %v12344_v20  ;;  %v374_v60 = vsel %vm371_vm0, %v368_v28, %v370_v27  ;;  %v373_v2 = vsel %vm371_vm0, %v366_v24, %v368_v28 }
  0x93   : > { %v383_v0 = vmul.f32 %v374_v60, %v12409_v62  ;;  %v382_v9 = vmul.f32 %v373_v2, %v12417_v8 }
  0x94   : > { %400 = vrot.lane.b32.xlu0 %v384_v29, %s12161_s29 }
  0x95   : > { %v12357_v30 = vpop.permute.xlu1 %747  ;;  %v746_v31 = vpop.permute.xlu0 %745 }
  0x96   : > { %v762_v32 = vmul.f32 0.0, %v746_v31  ;;  %v754_v12 = vsel %vm753_vm2, %v746_v31, %v12357_v30 }
  0x97   : > { %v763_v14 = vmul.f32 %v754_v12, %v12403_v57 }
  0x98   : > { %774 = vrot.lane.b32.xlu0 %v762_v32, %s12160_s26 }
  0x99   : > { %v752_v33 = vpop.permute.xlu1 %751  ;;  %v12360_v34 = vpop.permute.xlu0 %749 }
  0x9a   : > { %v766_v35 = vmul.f32 %v752_v33, %v12344_v20  ;;  %v756_v19 = vsel %vm753_vm2, %v12360_v34, %v752_v33  ;;  %v755_v23 = vsel %vm753_vm2, %v12357_v30, %v12360_v34 }
  0x9b   : > { %v765_v22 = vmul.f32 %v756_v19, %v12409_v62  ;;  %v764_v21 = vmul.f32 %v755_v23, %v12417_v8 }
  0x9c   : > { %782 = vrot.lane.b32.xlu0 %v766_v35, %s12160_s26 }
  0x9d   : > { %v12364_v36 = vpop.permute.xlu1 %961  ;;  %v12366_v37 = vpop.permute.xlu0 %963 }
  0x9e   : > { %v978_v38 = vmul.f32 0.0, %v12364_v36  ;;  %v970_v25 = vsel %vm969_vm3, %v12364_v36, %v12366_v37 }
  0x9f   : > { %v979_v27 = vmul.f32 %v970_v25, %v12403_v57  ;;  %v343_v25 = vld [vmem:[%s15128_s2] sm:$0xff] }
  0xa0   : > { %990 = vrot.lane.b32.xlu1 %v978_v38, %s12159_s20 }
  0xa1   : > { %v12370_v39 = vpop.permute.xlu1 %965  ;;  %v12372_v40 = vpop.permute.xlu0 %967 }
  0xa2   : > { %v982_v41 = vmul.f32 %v12372_v40, %v12344_v20  ;;  %v971_v17 = vsel %vm969_vm3, %v12366_v37, %v12370_v39  ;;  %v972_v29 = vsel %vm969_vm3, %v12370_v39, %v12372_v40 }
  0xa3   : > { %v980_v24 = vmul.f32 %v971_v17, %v12417_v8  ;;  %v981_v31 = vmul.f32 %v972_v29, %v12409_v62 }
  0xa4   : > { %998 = vrot.lane.b32.xlu1 %v982_v41, %s12159_s20 }
  0xa5   : > { %v12377_v42 = vpop.permute.xlu1 %1179  ;;  %v1178_v43 = vpop.permute.xlu0 %1177 }
  0xa6   : > { %v1194_v44 = vmul.f32 0.0, %v1178_v43  ;;  %v1186_v26 = vsel %vm1185_vm4, %v1178_v43, %v12377_v42 }
  0xa7   : > { %v1195_v28 = vmul.f32 %v1186_v26, %v12403_v57 }
  0xa8   : > { %1206 = vrot.lane.b32.xlu0 %v1194_v44, %s12158_s17 }
  0xa9   : > { %v12380_v45 = vpop.permute.xlu1 %1183  ;;  %v12382_v46 = vpop.permute.xlu0 %1181 }
  0xaa   : > { %v1198_v47 = vmul.f32 %v12380_v45, %v12344_v20  ;;  %v1188_v30 = vsel %vm1185_vm4, %v12382_v46, %v12380_v45  ;;  %v1187_v33 = vsel %vm1185_vm4, %v12377_v42, %v12382_v46 }
  0xab   : > { %v1197_v32 = vmul.f32 %v1188_v30, %v12409_v62  ;;  %v1196_v35 = vmul.f32 %v1187_v33, %v12417_v8 }
  0xac   : > { %1214 = vrot.lane.b32.xlu0 %v1198_v47, %s12158_s17  ;;  %v1815_v47 = vrot.slane %v12332_v15, %v12225_v4 }
  0xad   : > { %v12387_v48 = vpop.permute.xlu1 %1392  ;;  %v12389_v49 = vpop.permute.xlu0 %1394 }
  0xae   : > { %v1408_v50 = vmul.f32 0.0, %v12387_v48  ;;  %v1400_v37 = vsel %vm1000_vm5, %v12387_v48, %v12389_v49 }
  0xaf   : > { %v1409_v40 = vmul.f32 %v1400_v37, %v12403_v57 }
  0xb0   : > { %1420 = vrot.lane.b32.xlu1 %v1408_v50, %s12157_s14  ;;  %v1811_v50 = vrot.slane %v12332_v15, %v12231_v7 }
  0xb1   : > { %v12393_v51 = vpop.permute.xlu1 %1396  ;;  %v12395_v52 = vpop.permute.xlu0 %1398 }
  0xb2   : > { %v1412_v53 = vmul.f32 %v12395_v52, %v12344_v20  ;;  %v1401_v34 = vsel %vm1000_vm5, %v12389_v49, %v12393_v51  ;;  %v1402_v42 = vsel %vm1000_vm5, %v12393_v51, %v12395_v52  ;;  %v1819_v52 = vrot.slane %v12332_v15, %v12229_v6 }
  0xb3   : > { %v1410_v36 = vmul.f32 %v1401_v34, %v12417_v8  ;;  %v1411_v44 = vmul.f32 %v1402_v42, %v12409_v62 }
  0xb4   : > { %1428 = vrot.lane.b32.xlu1 %v1412_v53, %s12157_s14 }
  0xb5   : > { %v12401_v55 = vpop.permute.xlu1 %1608  ;;  %v1607_v56 = vpop.permute.xlu0 %1606 }
  0xb6   : > { %v1622_v58 = vmul.f32 0.0, %v1607_v56  ;;  %v1614_v38 = vsel %vm784_vm6, %v1607_v56, %v12401_v55 }
  0xb7   : > { %v1623_v41 = vmul.f32 %v1614_v38, %v12403_v57 }
  0xb8   : > { %1634 = vrot.lane.b32.xlu0 %v1622_v58, %s12156_s11  ;;  %394 = vrot.lane.b32.xlu1 %v381_v59, %s12161_s29 }
  0xb9   : > { %v1613_v61 = vpop.permute.xlu1 %1612  ;;  %v1611_v39 = vpop.permute.xlu0 %1610 }
  0xba   : > { %v1626_v63 = vmul.f32 %v1613_v61, %v12344_v20  ;;  %v1616_v43 = vsel %vm784_vm6, %v1611_v39, %v1613_v61  ;;  %v1615_v46 = vsel %vm784_vm6, %v12401_v55, %v1611_v39 }
  0xbb   : > { %v1625_v45 = vmul.f32 %v1616_v43, %v12409_v62  ;;  %v1624_v48 = vmul.f32 %v1615_v46, %v12417_v8 }
  0xbc   : > { %1642 = vrot.lane.b32.xlu0 %v1626_v63, %s12156_s11  ;;  %398 = vrot.lane.b32.xlu1 %v383_v0, %s12161_s29 }
  0xbd   : > { %v12504_v49 = vpop.permute.xlu1 %1820 }
  0xbe   : > { %v1836_v51 = vmul.f32 0.0, %v12504_v49 }
  0xc0   : > { %396 = vrot.lane.b32.xlu0 %v382_v9, %s12161_s29  ;;  %566 = vrot.lane.b32.xlu1 %v340_v10, %s12162_s30 }
  0xc4   : > { %564 = vrot.lane.b32.xlu0 %v339_v13, %s12162_s30  ;;  %776 = vrot.lane.b32.xlu1 %v763_v14, %s12160_s26 }
  0xc8   : > { %568 = vrot.lane.b32.xlu0 %v341_v18, %s12162_s30  ;;  %780 = vrot.lane.b32.xlu1 %v765_v22, %s12160_s26  ;;  %v11890_v18 = vld [vmem:[%s15128_s2 + $0x8] sm:$0xff] }
  0xcc   : > { %778 = vrot.lane.b32.xlu0 %v764_v21, %s12160_s26  ;;  %994 = vrot.lane.b32.xlu1 %v980_v24, %s12159_s20 }
  0xd0   : > { %992 = vrot.lane.b32.xlu0 %v979_v27, %s12159_s20  ;;  %1208 = vrot.lane.b32.xlu1 %v1195_v28, %s12158_s17 }
  0xd4   : > { %996 = vrot.lane.b32.xlu0 %v981_v31, %s12159_s20  ;;  %1212 = vrot.lane.b32.xlu1 %v1197_v32, %s12158_s17 }
  0xd8   : > { %1210 = vrot.lane.b32.xlu0 %v1196_v35, %s12158_s17  ;;  %1424 = vrot.lane.b32.xlu1 %v1410_v36, %s12157_s14  ;;  %v11896_v35 = vld [vmem:[%s15128_s2 + $0x10] sm:$0xff] }
  0xdc   : > { %1422 = vrot.lane.b32.xlu0 %v1409_v40, %s12157_s14  ;;  %1636 = vrot.lane.b32.xlu1 %v1623_v41, %s12156_s11  ;;  %v11900_v41 = vld [vmem:[%s15128_s2 + $0x18] sm:$0xff] }
  0xe0   : > { %1426 = vrot.lane.b32.xlu0 %v1411_v44, %s12157_s14  ;;  %1640 = vrot.lane.b32.xlu1 %v1625_v45, %s12156_s11 }
  0xe4   : > { %1638 = vrot.lane.b32.xlu0 %v1624_v48, %s12156_s11  ;;  %1824 = vrot.lane.b32.xlu1 %v1815_v47, %s12161_s29 }
  0xe8   : > { %1822 = vrot.lane.b32.xlu0 %v1811_v50, %s12161_s29  ;;  %1848 = vrot.lane.b32.xlu1 %v1836_v51, %s12155_s8 }
  0xec   : > { %1826 = vrot.lane.b32.xlu0 %v1819_v52, %s12161_s29  ;;  %v11904_v52 = vld [vmem:[%s15128_s2 + $0x20] sm:$0xff] }
  0xfa   : > { %v563_v54 = vpop.permute.xlu1 %562 }
  0xfe   : > { %v571_v56 = vpop.permute.xlu1 %570 }
 0x102   : > { %v393_v53 = vpop.permute.xlu0 %392 }
 0x106   : > { %v401_v55 = vpop.permute.xlu0 %400 }
 0x10a   : > { %v775_v58 = vpop.permute.xlu0 %774 }
 0x10e   : > { %v783_v60 = vpop.permute.xlu0 %782 }
 0x112   : > { %v12516_v59 = vpop.permute.xlu1 %990 }
 0x116   : > { %v12518_v61 = vpop.permute.xlu1 %998 }
 0x11a   : > { %v12520_v63 = vpop.permute.xlu0 %1206 }
 0x11e   : > { %v12524_v1 = vpop.permute.xlu0 %1214 }
 0x122   : > { %v12522_v0 = vpop.permute.xlu1 %1420 }
 0x126   : > { %v12526_v15 = vpop.permute.xlu1 %1428 }
 0x12a   : > { %v12528_v2 = vpop.permute.xlu0 %1634  ;;  %v395_v9 = vpop.permute.xlu1 %394 }
 0x12b   : > { %v403_v22 = vsel %vm402_vm7, %v393_v53, %v395_v9 }
 0x12e   : > { %v12530_v10 = vpop.permute.xlu0 %1642  ;;  %v399_v11 = vpop.permute.xlu1 %398 }
 0x12f   : > { %v406_v12 = vsel %vm402_vm7, %v399_v11, %v401_v55 }
 0x130   : > { %516 = vmatprep.subr.mxu1 %v406_v12 }
 0x132   : > { %v397_v13 = vpop.permute.xlu0 %396  ;;  %v567_v14 = vpop.permute.xlu1 %566 }
 0x133   : > { %v404_v16 = vsel %vm402_vm7, %v395_v9, %v397_v13  ;;  %v405_v19 = vsel %vm402_vm7, %v397_v13, %v399_v11 }
 0x134   : > { %445 = vmatprep.subr.mxu0 %v404_v16  ;;  %517 = vmatpush1.msra.mxu1 %v405_v19 }
 0x135   : > { %446 = vmatpush1.msra.mxu0 %v403_v22  ;;  %11892 = vmatmul.mubr.msk.f32.vlgmr.msra.gmra.mxu1 %vm411_vm8, %v11890_v18 }
 0x136   : > { %v565_v23 = vpop.permute.xlu0 %564  ;;  %v777_v17 = vpop.permute.xlu1 %776  ;;  %11891 = vmatmul.mubr.msk.f32.vlgmr.msra.gmra.mxu0 %vm411_vm8, %v11890_v18  ;;  %719 = vmatprep.mubr.f32.mxu1 %v12153_v3 }
 0x137   : > { %v574_v21 = vsel %vm572_vm9, %v565_v23, %v567_v14  ;;  %v573_v24 = vsel %vm572_vm9, %v563_v54, %v565_v23  ;;  %648 = vmatprep.mubr.f32.mxu0 %v12153_v3  ;;  %v785_v36 = vsel %vm784_vm6, %v775_v58, %v777_v17 }
 0x138   : > { %614 = vmatprep.subr.mxu0 %v574_v21 }
 0x139   : > { %615 = vmatpush1.msra.mxu0 %v573_v24 }
 0x13a   : > { %v569_v26 = vpop.permute.xlu0 %568  ;;  %v781_v27 = vpop.permute.xlu1 %780  ;;  %11893 = vmatmul.mubr.msk.f32.vlgmr.msra.gmra.mxu0 %vm411_vm8, %v343_v25 }
 0x13b   : > { %v576_v28 = vsel %vm572_vm9, %v569_v26, %v571_v56  ;;  %v575_v29 = vsel %vm572_vm9, %v567_v14, %v569_v26  ;;  %860 = vmatprep.mubr.f32.mxu0 %v12153_v3  ;;  %v788_v30 = vsel %vm784_vm6, %v781_v27, %v783_v60 }
 0x13c   : > { %685 = vmatprep.subr.mxu1 %v576_v28 }
 0x13d   : > { %686 = vmatpush1.msra.mxu1 %v575_v29 }
 0x13e   : > { %v779_v31 = vpop.permute.xlu0 %778  ;;  %897 = vmatprep.subr.mxu1 %v788_v30  ;;  %v995_v32 = vpop.permute.xlu1 %994  ;;  %11894 = vmatmul.mubr.msk.f32.vlgmr.msra.gmra.mxu1 %vm411_vm8, %v343_v25 }
 0x13f   : > { %v786_v33 = vsel %vm784_vm6, %v777_v17, %v779_v31  ;;  %v787_v34 = vsel %vm784_vm6, %v779_v31, %v781_v27  ;;  %931 = vmatprep.mubr.f32.mxu1 %v12153_v3 }
 0x140   : > { %826 = vmatprep.subr.mxu0 %v786_v33  ;;  %898 = vmatpush1.msra.mxu1 %v787_v34 }
 0x141   : > { %827 = vmatpush1.msra.mxu0 %v785_v36 }
 0x142   : > { %v993_v37 = vpop.permute.xlu0 %992  ;;  %v1209_v38 = vpop.permute.xlu1 %1208  ;;  %11897 = vmatmul.mubr.msk.f32.vlgmr.msra.gmra.mxu0 %vm411_vm8, %v11896_v35  ;;  %11898 = vmatmul.mubr.msk.f32.vlgmr.msra.gmra.mxu1 %vm411_vm8, %v11896_v35  ;;  %v11916_v35 = vld [vmem:[%s15128_s2 + $0x38] sm:$0xff] }
 0x143   : > { %v1002_v39 = vsel %vm1000_vm5, %v993_v37, %v995_v32  ;;  %v1001_v40 = vsel %vm1000_vm5, %v12516_v59, %v993_v37  ;;  %1147 = vmatprep.mubr.f32.mxu1 %v12153_v3  ;;  %1076 = vmatprep.mubr.f32.mxu0 %v12153_v3  ;;  %v1216_v53 = vsel %vm1185_vm4, %v12520_v63, %v1209_v38  ;;  %v11908_v59 = vld [vmem:[%s15128_s2 + $0x28] sm:$0xff] }
 0x144   : > { %1042 = vmatprep.subr.mxu0 %v1002_v39 }
 0x145   : > { %1043 = vmatpush1.msra.mxu0 %v1001_v40 }
 0x146   : > { %v997_v42 = vpop.permute.xlu0 %996  ;;  %v1213_v43 = vpop.permute.xlu1 %1212  ;;  %11901 = vmatmul.mubr.msk.f32.vlgmr.msra.gmra.mxu0 %vm411_vm8, %v11900_v41 }
 0x147   : > { %v1004_v44 = vsel %vm1000_vm5, %v997_v42, %v12518_v61  ;;  %v1003_v45 = vsel %vm1000_vm5, %v995_v32, %v997_v42  ;;  %1291 = vmatprep.mubr.f32.mxu0 %v12153_v3  ;;  %v1219_v46 = vsel %vm1185_vm4, %v1213_v43, %v12524_v1 }
 0x148   : > { %1113 = vmatprep.subr.mxu1 %v1004_v44 }
 0x149   : > { %1114 = vmatpush1.msra.mxu1 %v1003_v45 }
 0x14a   : > { %v1211_v47 = vpop.permute.xlu0 %1210  ;;  %1328 = vmatprep.subr.mxu1 %v1219_v46  ;;  %v1425_v48 = vpop.permute.xlu1 %1424  ;;  %11902 = vmatmul.mubr.msk.f32.vlgmr.msra.gmra.mxu1 %vm411_vm8, %v11900_v41 }
 0x14b   : > { %v1217_v50 = vsel %vm1185_vm4, %v1209_v38, %v1211_v47  ;;  %v1218_v51 = vsel %vm1185_vm4, %v1211_v47, %v1213_v43  ;;  %1362 = vmatprep.mubr.f32.mxu1 %v12153_v3  ;;  %v11923_v47 = vld [vmem:[%s15127_s1 + $0x24] sm:$0xf] }
 0x14c   : > { %1257 = vmatprep.subr.mxu0 %v1217_v50  ;;  %1329 = vmatpush1.msra.mxu1 %v1218_v51  ;;  %v2235_v51 = vrot.slane %v11923_v47, %v12227_v5 }
 0x14d   : > { %1258 = vmatpush1.msra.mxu0 %v1216_v53  ;;  %v2239_v53 = vrot.slane %v11923_v47, %v12231_v7 }
 0x14e   : > { %v1423_v54 = vpop.permute.xlu0 %1422  ;;  %v1637_v55 = vpop.permute.xlu1 %1636  ;;  %11905 = vmatmul.mubr.msk.f32.vlgmr.msra.gmra.mxu0 %vm411_vm8, %v11904_v52  ;;  %11906 = vmatmul.mubr.msk.f32.vlgmr.msra.gmra.mxu1 %vm411_vm8, %v11904_v52 }
 0x14f   : > { %v1431_v56 = vsel %vm969_vm3, %v1423_v54, %v1425_v48  ;;  %v1430_v58 = vsel %vm969_vm3, %v12522_v0, %v1423_v54  ;;  %1576 = vmatprep.mubr.f32.mxu1 %v12153_v3  ;;  %1505 = vmatprep.mubr.f32.mxu0 %v12153_v3  ;;  %v1644_v13 = vsel %vm753_vm2, %v12528_v2, %v1637_v55 }
 0x150   : > { %1471 = vmatprep.subr.mxu0 %v1431_v56  ;;  %v2243_v54 = vrot.slane %v11923_v47, %v12225_v4 }
 0x151   : > { %1472 = vmatpush1.msra.mxu0 %v1430_v58 }
 0x152   : > { %v1427_v60 = vpop.permute.xlu0 %1426  ;;  %v1641_v61 = vpop.permute.xlu1 %1640  ;;  %11909 = vmatmul.mubr.msk.f32.vlgmr.msra.gmra.mxu0 %vm411_vm8, %v11908_v59 }
 0x153   : > { %v1433_v63 = vsel %vm969_vm3, %v1427_v60, %v12526_v15  ;;  %v1432_v1 = vsel %vm969_vm3, %v1425_v48, %v1427_v60  ;;  %1719 = vmatprep.mubr.f32.mxu0 %v12153_v3  ;;  %v1647_v0 = vsel %vm753_vm2, %v1641_v61, %v12530_v10  ;;  %v11912_v15 = vld [vmem:[%s15128_s2 + $0x30] sm:$0xff] }
 0x154   : > { %1542 = vmatprep.subr.mxu1 %v1433_v63  ;;  %v11920_v63 = vld [vmem:[%s15128_s2 + $0x40] sm:$0xff] }
 0x155   : > { %1543 = vmatpush1.msra.mxu1 %v1432_v1 }
 0x156   : > { %v1639_v9 = vpop.permute.xlu0 %1638  ;;  %1756 = vmatprep.subr.mxu1 %v1647_v0  ;;  %11910 = vmatmul.mubr.msk.f32.vlgmr.msra.gmra.mxu1 %vm411_vm8, %v11908_v59  ;;  %v1825_v10 = vpop.permute.xlu1 %1824 }
 0x157   : > { %v1645_v11 = vsel %vm753_vm2, %v1637_v55, %v1639_v9  ;;  %v1646_v12 = vsel %vm753_vm2, %v1639_v9, %v1641_v61  ;;  %1790 = vmatprep.mubr.f32.mxu1 %v12153_v3  ;;  %v2247_v55 = vrot.slane %v11923_v47, %v12229_v6 }
 0x158   : > { %1685 = vmatprep.subr.mxu0 %v1645_v11  ;;  %1757 = vmatpush1.msra.mxu1 %v1646_v12 }
 0x159   : > { %1686 = vmatpush1.msra.mxu0 %v1644_v13 }
 0x15a   : > { %v1823_v14 = vpop.permute.xlu0 %1822  ;;  %11913 = vmatmul.mubr.msk.f32.vlgmr.msra.gmra.mxu0 %vm411_vm8, %v11912_v15  ;;  %11914 = vmatmul.mubr.msk.f32.vlgmr.msra.gmra.mxu1 %vm411_vm8, %v11912_v15  ;;  %v1849_v28 = vpop.permute.xlu1 %1848 }
 0x15b   : > { %v1828_v16 = vsel %vm402_vm7, %v12504_v49, %v1823_v14  ;;  %v1829_v19 = vsel %vm402_vm7, %v1823_v14, %v1825_v10  ;;  %1933 = vmatprep.mubr.f32.mxu0 %v12153_v3  ;;  %2004 = vmatprep.mubr.f32.mxu1 %v12153_v3  ;;  %v11919_v49 = vld [vmem:[%s15127_s1 + $0x20] sm:$0xf] }
 0x15c   : > { %v1837_v18 = vmul.f32 %v1828_v16, %v12403_v57  ;;  %v1838_v2 = vmul.f32 %v1829_v19, %v12417_v8  ;;  %v2021_v24 = vrot.slane %v11919_v49, %v12227_v5  ;;  %v2025_v25 = vrot.slane %v11919_v49, %v12231_v7 }
 0x15d   : > { %v2029_v26 = vrot.slane %v11919_v49, %v12225_v4  ;;  %v2033_v27 = vrot.slane %v11919_v49, %v12229_v6 }
 0x15e   : > { %1850 = vrot.lane.b32.xlu0 %v1837_v18, %s12155_s8  ;;  %v1827_v22 = vpop.permute.xlu0 %1826  ;;  %1852 = vrot.lane.b32.xlu1 %v1838_v2, %s12155_s8 }
 0x15f   : > { %v1830_v23 = vsel %vm402_vm7, %v1825_v10, %v1827_v22  ;;  %v1840_v17 = vmul.f32 %v1827_v22, %v12344_v20 }
 0x160   : > { %v1839_v21 = vmul.f32 %v1830_v23, %v12409_v62 }
 0x162   : > { %1854 = vrot.lane.b32.xlu0 %v1839_v21, %s12155_s8  ;;  %1856 = vrot.lane.b32.xlu1 %v1840_v17, %s12155_s8  ;;  %v11927_v17 = vld [vmem:[%s15127_s1 + $0x28] sm:$0xf] }
 0x163   : > { %v2455_v21 = vrot.slane %v11927_v17, %v12231_v7 }
 0x166   : > { %2034 = vrot.lane.b32.xlu0 %v2021_v24, %s12162_s30  ;;  %2036 = vrot.lane.b32.xlu1 %v2025_v25, %s12162_s30  ;;  %v2463_v24 = vrot.slane %v11927_v17, %v12229_v6  ;;  %v11931_v25 = vld [vmem:[%s15127_s1 + $0x2c] sm:$0xf] }
 0x16a   : > { %2038 = vrot.lane.b32.xlu0 %v2029_v26, %s12162_s30  ;;  %2040 = vrot.lane.b32.xlu1 %v2033_v27, %s12162_s30  ;;  %v2666_v26 = vrot.slane %v11931_v25, %v12227_v5  ;;  %v2670_v27 = vrot.slane %v11931_v25, %v12231_v7 }
 0x1d0   : > { %v1851_v29 = vpop.permute.xlu0 %1850  ;;  %v1853_v30 = vpop.permute.xlu1 %1852 }
 0x1d1   : > { %v1859_v31 = vsel %vm371_vm0, %v1851_v29, %v1853_v30  ;;  %v1858_v32 = vsel %vm371_vm0, %v1849_v28, %v1851_v29  ;;  %v2674_v28 = vrot.slane %v11931_v25, %v12225_v4  ;;  %v2678_v29 = vrot.slane %v11931_v25, %v12229_v6 }
 0x1d2   : > { %1899 = vmatprep.subr.mxu0 %v1859_v31 }
 0x1d3   : > { %1900 = vmatpush1.msra.mxu0 %v1858_v32 }
 0x1d4   : > { %v1855_v33 = vpop.permute.xlu0 %1854  ;;  %v1857_v34 = vpop.permute.xlu1 %1856  ;;  %11917 = vmatmul.mubr.msk.f32.vlgmr.msra.gmra.mxu0 %vm411_vm8, %v11916_v35 }
 0x1d5   : > { %v1861_v36 = vsel %vm371_vm0, %v1855_v33, %v1857_v34  ;;  %v1860_v37 = vsel %vm371_vm0, %v1853_v30, %v1855_v33  ;;  %2147 = vmatprep.mubr.f32.mxu0 %v12153_v3  ;;  %v11935_v30 = vld [vmem:[%s15127_s1 + $0x30] sm:$0xf] }
 0x1d6   : > { %1970 = vmatprep.subr.mxu1 %v1861_v36  ;;  %v2882_v31 = vrot.slane %v11935_v30, %v12227_v5  ;;  %v2886_v32 = vrot.slane %v11935_v30, %v12231_v7  ;;  %v2890_v33 = vrot.slane %v11935_v30, %v12225_v4  ;;  %v2894_v34 = vrot.slane %v11935_v30, %v12229_v6 }
 0x1d7   : > { %1971 = vmatpush1.msra.mxu1 %v1860_v37 }
 0x1d8   : > { %v2035_v38 = vpop.permute.xlu0 %2034  ;;  %v2037_v39 = vpop.permute.xlu1 %2036  ;;  %11918 = vmatmul.mubr.msk.f32.vlgmr.msra.gmra.mxu1 %vm411_vm8, %v11916_v35  ;;  %v11943_v35 = vld [vmem:[%s15127_s1 + $0x38] sm:$0xf] }
 0x1d9   : > { %v2050_v40 = vmul.f32 0.0, %v2035_v38  ;;  %v2042_v41 = vsel %vm572_vm9, %v2035_v38, %v2037_v39  ;;  %2218 = vmatprep.mubr.f32.mxu1 %v12153_v3  ;;  %v3281_v36 = vrot.slane %v11943_v35, %v12227_v5  ;;  %v3285_v37 = vrot.slane %v11943_v35, %v12231_v7 }
 0x1da   : > { %v2051_v42 = vmul.f32 %v2042_v41, %v12403_v57  ;;  %v3289_v38 = vrot.slane %v11943_v35, %v12225_v4 }
 0x1db   : > { %2062 = vrot.lane.b32.xlu0 %v2050_v40, %s12154_s25  ;;  %v11947_v40 = vld [vmem:[%s15127_s1 + $0x3c] sm:$0xf] }
 0x1dc   : > { %v2039_v43 = vpop.permute.xlu0 %2038  ;;  %2064 = vrot.lane.b32.xlu1 %v2051_v42, %s12154_s25  ;;  %v2041_v44 = vpop.permute.xlu1 %2040  ;;  %v3495_v41 = vrot.slane %v11947_v40, %v12227_v5  ;;  %v3499_v42 = vrot.slane %v11947_v40, %v12231_v7 }
 0x1dd   : > { %v2043_v45 = vsel %vm572_vm9, %v2037_v39, %v2039_v43  ;;  %v2044_v46 = vsel %vm572_vm9, %v2039_v43, %v2041_v44  ;;  %v2054_v52 = vmul.f32 %v2041_v44, %v12344_v20  ;;  %v3293_v39 = vrot.slane %v11943_v35, %v12229_v6 }
 0x1de   : > { %v2052_v48 = vmul.f32 %v2043_v45, %v12417_v8  ;;  %v2053_v50 = vmul.f32 %v2044_v46, %v12409_v62  ;;  %v3503_v43 = vrot.slane %v11947_v40, %v12225_v4  ;;  %v3507_v44 = vrot.slane %v11947_v40, %v12229_v6  ;;  %v11951_v45 = vld [vmem:[%s15127_s1 + $0x40] sm:$0xf] }
 0x1df   : > { %v3709_v46 = vrot.slane %v11951_v45, %v12227_v5  ;;  %v3713_v47 = vrot.slane %v11951_v45, %v12231_v7 }
 0x1e0   : > { %2066 = vrot.lane.b32.xlu0 %v2052_v48, %s12154_s25  ;;  %2068 = vrot.lane.b32.xlu1 %v2053_v50, %s12154_s25  ;;  %v3717_v48 = vrot.slane %v11951_v45, %v12225_v4  ;;  %v3721_v50 = vrot.slane %v11951_v45, %v12229_v6 }
 0x1e4   : > { %2070 = vrot.lane.b32.xlu0 %v2054_v52, %s12154_s25  ;;  %2248 = vrot.lane.b32.xlu1 %v2235_v51, %s12163_s18  ;;  %v11955_v51 = vld [vmem:[%s15127_s1 + $0x44] sm:$0xf] }
 0x1e5   : > { %v3923_v52 = vrot.slane %v11955_v51, %v12227_v5 }
 0x1e8   : > { %2250 = vrot.lane.b32.xlu0 %v2239_v53, %s12163_s18  ;;  %2252 = vrot.lane.b32.xlu1 %v2243_v54, %s12163_s18  ;;  %v3927_v53 = vrot.slane %v11955_v51, %v12231_v7  ;;  %v3931_v54 = vrot.slane %v11955_v51, %v12225_v4 }
 0x1ec   : > { %2254 = vrot.lane.b32.xlu0 %v2247_v55, %s12163_s18  ;;  %v3935_v55 = vrot.slane %v11955_v51, %v12229_v6 }
 0x24d   : > { %v2063_v56 = vpop.permute.xlu0 %2062 }
 0x24e   : > { %v2065_v58 = vpop.permute.xlu1 %2064 }
 0x24f   : > { %v2072_v1 = vsel %vm329_vm1, %v2063_v56, %v2065_v58  ;;  %v11959_v56 = vld [vmem:[%s15127_s1 + $0x48] sm:$0xf] }
 0x252   : > { %v2067_v59 = vpop.permute.xlu0 %2066  ;;  %v2069_v60 = vpop.permute.xlu1 %2068 }
 0x253   : > { %v2073_v61 = vsel %vm329_vm1, %v2065_v58, %v2067_v59  ;;  %v2074_v15 = vsel %vm329_vm1, %v2067_v59, %v2069_v60  ;;  %v4137_v58 = vrot.slane %v11959_v56, %v12227_v5  ;;  %v4141_v59 = vrot.slane %v11959_v56, %v12231_v7 }
 0x254   : > { %2113 = vmatprep.subr.mxu0 %v2073_v61  ;;  %v4149_v61 = vrot.slane %v11959_v56, %v12229_v6 }
 0x255   : > { %2114 = vmatpush1.msra.mxu0 %v2072_v1 }
 0x256   : > { %v2071_v0 = vpop.permute.xlu0 %2070  ;;  %v2249_v9 = vpop.permute.xlu1 %2248  ;;  %11921 = vmatmul.mubr.msk.f32.vlgmr.msra.gmra.mxu0 %vm411_vm8, %v11920_v63 }
 0x257   : > { %v2265_v11 = vmul.f32 0.0, %v2249_v9  ;;  %v2075_v12 = vsel %vm329_vm1, %v2069_v60, %v2071_v0  ;;  %2363 = vmatprep.mubr.f32.mxu0 %v12153_v3  ;;  %v4145_v60 = vrot.slane %v11959_v56, %v12225_v4 }
 0x258   : > { %2184 = vmatprep.subr.mxu1 %v2075_v12  ;;  %v11967_v12 = vld [vmem:[%s15127_s1 + $0x50] sm:$0xf] }
 0x259   : > { %2185 = vmatpush1.msra.mxu1 %v2074_v15  ;;  %2277 = vrot.lane.b32.xlu1 %v2265_v11, %s12164_s24  ;;  %v4565_v15 = vrot.slane %v11967_v12, %v12227_v5 }
 0x25a   : > { %v2251_v13 = vpop.permute.xlu0 %2250  ;;  %v2253_v10 = vpop.permute.xlu1 %2252  ;;  %11922 = vmatmul.mubr.msk.f32.vlgmr.msra.gmra.mxu1 %vm411_vm8, %v11920_v63  ;;  %v11963_v63 = vld [vmem:[%s15127_s1 + $0x4c] sm:$0xf] }
 0x25b   : > { %v2257_v14 = vsel %vm15133_vm10, %v2249_v9, %v2251_v13  ;;  %v2258_v16 = vsel %vm15133_vm10, %v2251_v13, %v2253_v10  ;;  %2434 = vmatprep.mubr.f32.mxu1 %v12153_v3  ;;  %v2451_v3 = vrot.slane %v11927_v17, %v12227_v5  ;;  %v4351_v1 = vrot.slane %v11963_v63, %v12227_v5 }
 0x25c   : > { %v2266_v19 = vmul.f32 %v2257_v14, %v12403_v57  ;;  %v2267_v18 = vmul.f32 %v2258_v16, %v12417_v8  ;;  %v4355_v0 = vrot.slane %v11963_v63, %v12231_v7  ;;  %v4359_v9 = vrot.slane %v11963_v63, %v12225_v4  ;;  %v11971_v16 = vld [vmem:[%s15127_s1 + $0x54] sm:$0xf] }
 0x25d   : > { %v4363_v11 = vrot.slane %v11963_v63, %v12229_v6  ;;  %v4569_v13 = vrot.slane %v11967_v12, %v12231_v7  ;;  %v4577_v14 = vrot.slane %v11967_v12, %v12229_v6 }
 0x25e   : > { %v2255_v2 = vpop.permute.xlu0 %2254  ;;  %2279 = vrot.lane.b32.xlu0 %v2266_v19, %s12164_s24  ;;  %2281 = vrot.lane.b32.xlu1 %v2267_v18, %s12164_s24  ;;  %v4779_v19 = vrot.slane %v11971_v16, %v12227_v5  ;;  %v4783_v18 = vrot.slane %v11971_v16, %v12231_v7 }
 0x25f   : > { %v2259_v22 = vsel %vm15133_vm10, %v2253_v10, %v2255_v2  ;;  %v2269_v23 = vmul.f32 %v2255_v2, %v12344_v20  ;;  %v2459_v20 = vrot.slane %v11927_v17, %v12225_v4  ;;  %v4573_v10 = vrot.slane %v11967_v12, %v12225_v4 }
 0x260   : > { %v2268_v49 = vmul.f32 %v2259_v22, %v12409_v62  ;;  %v4787_v2 = vrot.slane %v11971_v16, %v12225_v4  ;;  %v4791_v22 = vrot.slane %v11971_v16, %v12229_v6  ;;  %vm15135_vm10 = vcmask 56320  }
 0x262   : > { %2283 = vrot.lane.b32.xlu0 %v2268_v49, %s12164_s24  ;;  %2285 = vrot.lane.b32.xlu1 %v2269_v23, %s12164_s24  ;;  %v11975_v23 = vld [vmem:[%s15127_s1 + $0x58] sm:$0xf] }
 0x263   : > { %v4993_v17 = vrot.slane %v11975_v23, %v12227_v5  ;;  %v4997_v49 = vrot.slane %v11975_v23, %v12231_v7 }
 0x266   : > { %2464 = vrot.lane.b32.xlu0 %v2451_v3, %s12165_s7  ;;  %2466 = vrot.lane.b32.xlu1 %v2455_v21, %s12165_s7  ;;  %v5001_v3 = vrot.slane %v11975_v23, %v12225_v4  ;;  %v5005_v21 = vrot.slane %v11975_v23, %v12229_v6  ;;  %v12902_v23 = vld [vmem:[#allocation2 + $0x10] sm:$0xff] }
 0x26a   : > { %2468 = vrot.lane.b32.xlu0 %v2459_v20, %s12165_s7  ;;  %2470 = vrot.lane.b32.xlu1 %v2463_v24, %s12165_s7  ;;  %v11979_v20 = vld [vmem:[%s15127_s1 + $0x5c] sm:$0xf] }
 0x26b   : > { %v5207_v24 = vrot.slane %v11979_v20, %v12227_v5  ;;  %v5211_v25 = vrot.slane %v11979_v20, %v12231_v7 }
 0x26e   : > { %2679 = vrot.lane.b32.xlu0 %v2666_v26, %s12166_s12  ;;  %2681 = vrot.lane.b32.xlu1 %v2670_v27, %s12166_s12  ;;  %v5215_v26 = vrot.slane %v11979_v20, %v12225_v4  ;;  %v5219_v27 = vrot.slane %v11979_v20, %v12229_v6 }
 0x272   : > { %2683 = vrot.lane.b32.xlu0 %v2674_v28, %s12166_s12  ;;  %2685 = vrot.lane.b32.xlu1 %v2678_v29, %s12166_s12  ;;  %v11983_v28 = vld [vmem:[%s15127_s1 + $0x60] sm:$0xf] }
 0x273   : > { %v5421_v29 = vrot.slane %v11983_v28, %v12227_v5  ;;  %v5425_v30 = vrot.slane %v11983_v28, %v12231_v7 }
 0x276   : > { %2895 = vrot.lane.b32.xlu0 %v2882_v31, %s12167_s16  ;;  %2897 = vrot.lane.b32.xlu1 %v2886_v32, %s12167_s16  ;;  %v5429_v32 = vrot.slane %v11983_v28, %v12225_v4 }
 0x27a   : > { %2899 = vrot.lane.b32.xlu0 %v2890_v33, %s12167_s16  ;;  %2901 = vrot.lane.b32.xlu1 %v2894_v34, %s12167_s16  ;;  %v5433_v33 = vrot.slane %v11983_v28, %v12229_v6  ;;  %v11987_v34 = vld [vmem:[%s15127_s1 + $0x64] sm:$0xf] }
 0x27b   : > { %v5639_v40 = vrot.slane %v11987_v34, %v12231_v7  ;;  %v5643_v45 = vrot.slane %v11987_v34, %v12225_v4 }
 0x27e   : > { %3294 = vrot.lane.b32.xlu0 %v3281_v36, %s12168_s27  ;;  %3296 = vrot.lane.b32.xlu1 %v3285_v37, %s12168_s27 }
 0x282   : > { %3298 = vrot.lane.b32.xlu0 %v3289_v38, %s12168_s27  ;;  %3300 = vrot.lane.b32.xlu1 %v3293_v39, %s12168_s27  ;;  %v5635_v39 = vrot.slane %v11987_v34, %v12227_v5 }
 0x286   : > { %3508 = vrot.lane.b32.xlu0 %v3495_v41, %s12169_s10  ;;  %3510 = vrot.lane.b32.xlu1 %v3499_v42, %s12169_s10 }
 0x28a   : > { %3512 = vrot.lane.b32.xlu0 %v3503_v43, %s12169_s10  ;;  %3514 = vrot.lane.b32.xlu1 %v3507_v44, %s12169_s10 }
 0x28e   : > { %3722 = vrot.lane.b32.xlu0 %v3709_v46, %s12170_s19  ;;  %3724 = vrot.lane.b32.xlu1 %v3713_v47, %s12170_s19  ;;  %v5647_v46 = vrot.slane %v11987_v34, %v12229_v6 }
 0x292   : > { %3726 = vrot.lane.b32.xlu0 %v3717_v48, %s12170_s19  ;;  %3728 = vrot.lane.b32.xlu1 %v3721_v50, %s12170_s19  ;;  %v11924_v50 = vld [vmem:[%s15128_s2 + $0x48] sm:$0xff] }
 0x296   : > { %3936 = vrot.lane.b32.xlu0 %v3923_v52, %s12164_s24  ;;  %3938 = vrot.lane.b32.xlu1 %v3927_v53, %s12164_s24  ;;  %v12871_v52 = vld [vmem:[#allocation2 + $0x28] sm:$0xff] }
 0x29a   : > { %3940 = vrot.lane.b32.xlu0 %v3931_v54, %s12164_s24  ;;  %3942 = vrot.lane.b32.xlu1 %v3935_v55, %s12164_s24 }
 0x29e   : > { %4150 = vrot.lane.b32.xlu0 %v4137_v58, %s12154_s25  ;;  %4152 = vrot.lane.b32.xlu1 %v4141_v59, %s12154_s25 }
 0x2a2   : > { %4154 = vrot.lane.b32.xlu0 %v4145_v60, %s12154_s25  ;;  %4156 = vrot.lane.b32.xlu1 %v4149_v61, %s12154_s25 }
 0x2a6   : > { %4364 = vrot.lane.b32.xlu0 %v4351_v1, %s12155_s8  ;;  %4366 = vrot.lane.b32.xlu1 %v4355_v0, %s12155_s8  ;;  %v12886_v1 = vld [vmem:[#allocation2 + $0x18] sm:$0xff] }
 0x2aa   : > { %4368 = vrot.lane.b32.xlu0 %v4359_v9, %s12155_s8  ;;  %4370 = vrot.lane.b32.xlu1 %v4363_v11, %s12155_s8 }
 0x2ae   : > { %4578 = vrot.lane.b32.xlu0 %v4565_v15, %s12156_s11  ;;  %4580 = vrot.lane.b32.xlu1 %v4569_v13, %s12156_s11 }
 0x2b2   : > { %4582 = vrot.lane.b32.xlu0 %v4573_v10, %s12156_s11  ;;  %4584 = vrot.lane.b32.xlu1 %v4577_v14, %s12156_s11 }
 0x2b6   : > { %4792 = vrot.lane.b32.xlu0 %v4779_v19, %s12157_s14  ;;  %4794 = vrot.lane.b32.xlu1 %v4783_v18, %s12157_s14 }
 0x2ba   : > { %4796 = vrot.lane.b32.xlu0 %v4787_v2, %s12157_s14  ;;  %4798 = vrot.lane.b32.xlu1 %v4791_v22, %s12157_s14 }
 0x2be   : > { %5006 = vrot.lane.b32.xlu0 %v4993_v17, %s12158_s17  ;;  %5008 = vrot.lane.b32.xlu1 %v4997_v49, %s12158_s17 }
 0x2c2   : > { %5010 = vrot.lane.b32.xlu0 %v5001_v3, %s12158_s17  ;;  %5012 = vrot.lane.b32.xlu1 %v5005_v21, %s12158_s17 }
 0x2c6   : > { %5220 = vrot.lane.b32.xlu0 %v5207_v24, %s12159_s20  ;;  %5222 = vrot.lane.b32.xlu1 %v5211_v25, %s12159_s20  ;;  %v12909_v24 = vld [vmem:[#allocation2] sm:$0xff] }
 0x2ca   : > { %5224 = vrot.lane.b32.xlu0 %v5215_v26, %s12159_s20  ;;  %5226 = vrot.lane.b32.xlu1 %v5219_v27, %s12159_s20 }
 0x2cb   : > { %v2278_v31 = vpop.permute.xlu1 %2277 }
 0x2ce   : > { %5434 = vrot.lane.b32.xlu0 %v5421_v29, %s12160_s26  ;;  %5436 = vrot.lane.b32.xlu1 %v5425_v30, %s12160_s26 }
 0x2d0   : > { %v2280_v35 = vpop.permute.xlu0 %2279  ;;  %v2282_v36 = vpop.permute.xlu1 %2281 }
 0x2d1   : > { %v2289_v37 = vsel %vm15134_vm11, %v2280_v35, %v2282_v36  ;;  %v2288_v38 = vsel %vm15134_vm11, %v2278_v31, %v2280_v35  ;;  %v12922_v35 = vld [vmem:[#allocation2 + $0x8] sm:$0xff] }
 0x2d2   : > { %5438 = vrot.lane.b32.xlu0 %v5429_v32, %s12160_s26  ;;  %2329 = vmatprep.subr.mxu0 %v2289_v37 }
 0x2d3   : > { %2330 = vmatpush1.msra.mxu0 %v2288_v38  ;;  %5440 = vrot.lane.b32.xlu1 %v5433_v33, %s12160_s26 }
 0x2d4   : > { %v2284_v41 = vpop.permute.xlu0 %2283  ;;  %v2286_v42 = vpop.permute.xlu1 %2285  ;;  %11925 = vmatmul.mubr.msk.f32.vlgmr.msra.gmra.mxu0 %vm411_vm8, %v11924_v50 }
 0x2d5   : > { %v2291_v43 = vsel %vm15134_vm11, %v2284_v41, %v2286_v42  ;;  %v2290_v44 = vsel %vm15134_vm11, %v2282_v36, %v2284_v41  ;;  %2578 = vmatprep.mubr.f32.mxu0 %v12871_v52 }
 0x2d6   : > { %5648 = vrot.lane.b32.xlu0 %v5635_v39, %s12161_s29  ;;  %2400 = vmatprep.subr.mxu1 %v2291_v43 }
 0x2d7   : > { %2401 = vmatpush1.msra.mxu1 %v2290_v44  ;;  %5650 = vrot.lane.b32.xlu1 %v5639_v40, %s12161_s29 }
 0x2d8   : > { %v2465_v47 = vpop.permute.xlu0 %2464  ;;  %v2467_v48 = vpop.permute.xlu1 %2466  ;;  %11926 = vmatmul.mubr.msk.f32.vlgmr.msra.gmra.mxu1 %vm411_vm8, %v11924_v50 }
 0x2d9   : > { %v2473_v51 = vsel %vm2472_vm12, %v2465_v47, %v2467_v48  ;;  %2649 = vmatprep.mubr.f32.mxu1 %v12871_v52  ;;  %v2481_v9 = vmul.f32 %v12871_v52, %v2465_v47  ;;  %v12936_v47 = vld [vmem:[#allocation2 + $0x18] sm:$0xff] }
 0x2da   : > { %5652 = vrot.lane.b32.xlu0 %v5643_v45, %s12161_s29  ;;  %v2482_v53 = vmul.f32 %v2473_v51, %v12403_v57  ;;  %v11991_v57 = vld [vmem:[%s15127_s1 + $0x68] sm:$0xf] }
 0x2db   : > { %5654 = vrot.lane.b32.xlu1 %v5647_v46, %s12161_s29  ;;  %v5849_v12 = vrot.slane %v11991_v57, %v12227_v5  ;;  %v5853_v15 = vrot.slane %v11991_v57, %v12231_v7  ;;  %v5857_v14 = vrot.slane %v11991_v57, %v12225_v4  ;;  %v5861_v16 = vrot.slane %v11991_v57, %v12229_v6 }
 0x2dc   : > { %v2469_v54 = vpop.permute.xlu0 %2468  ;;  %v2471_v55 = vpop.permute.xlu1 %2470 }
 0x2dd   : > { %v2474_v56 = vsel %vm2472_vm12, %v2467_v48, %v2469_v54  ;;  %v2475_v58 = vsel %vm2472_vm12, %v2469_v54, %v2471_v55  ;;  %v2485_v0 = vmul.f32 %v12886_v1, %v2471_v55  ;;  %v12171_v54 = vmov 0  }
 0x2de   : > { %v2483_v59 = vmul.f32 %v2474_v56, %v12417_v8  ;;  %2495 = vrot.lane.b32.xlu0 %v2482_v53, %s12170_s19  ;;  %v2484_v60 = vmul.f32 %v2475_v58, %v12409_v62 }
 0x2df   : > { %12132 = vset.pattern.permute.xlu0 %v12171_v54 }
 0x2e0   : > { %v2680_v61 = vpop.permute.xlu0 %2679  ;;  %2497 = vrot.lane.b32.xlu1 %v2483_v59, %s12170_s19  ;;  %v2682_v63 = vpop.permute.xlu1 %2681 }
 0x2e1   : > { %v2688_v19 = vsel %vm2687_vm13, %v2680_v61, %v2682_v63 }
 0x2e2   : > { %2499 = vrot.lane.b32.xlu0 %v2484_v60, %s12170_s19  ;;  %v2697_v17 = vmul.f32 %v12902_v23, %v2688_v19 }
 0x2e4   : > { %v2684_v11 = vpop.permute.xlu0 %2683  ;;  %2501 = vrot.lane.b32.xlu1 %v2485_v0, %s12170_s19  ;;  %v2686_v62 = vpop.permute.xlu1 %2685 }
 0x2e5   : > { %v2689_v22 = vsel %vm2687_vm13, %v2682_v63, %v2684_v11  ;;  %v2690_v49 = vsel %vm2687_vm13, %v2684_v11, %v2686_v62  ;;  %v2700_v26 = vmul.f32 %v12886_v1, %v2686_v62 }
 0x2e6   : > { %2493 = vrot.lane.b32.xlu0 %v2481_v9, %s12170_s19  ;;  %v2698_v3 = vmul.f32 %v2689_v22, %v12417_v8  ;;  %v2699_v25 = vmul.f32 %v12909_v24, %v2690_v49  ;;  %v2696_v8 = vmul.f32 %v12871_v52, %v2680_v61 }
 0x2e8   : > { %v2896_v13 = vpop.permute.xlu0 %2895  ;;  %5862 = vrot.lane.b32.xlu1 %v5849_v12, %s12162_s30  ;;  %v2898_v10 = vpop.permute.xlu1 %2897 }
 0x2e9   : > { %v2904_v29 = vsel %vm15137_vm14, %v2896_v13, %v2898_v10  ;;  %v2912_v42 = vmul.f32 %v12871_v52, %v2896_v13 }
 0x2ea   : > { %5864 = vrot.lane.b32.xlu0 %v5853_v15, %s12162_s30  ;;  %v2913_v31 = vmul.f32 %v12902_v23, %v2904_v29 }
 0x2ec   : > { %v2900_v18 = vpop.permute.xlu0 %2899  ;;  %5866 = vrot.lane.b32.xlu1 %v5857_v14, %s12162_s30  ;;  %v2902_v2 = vpop.permute.xlu1 %2901 }
 0x2ed   : > { %v2905_v30 = vsel %vm15137_vm14, %v2898_v10, %v2900_v18  ;;  %v2906_v34 = vsel %vm15137_vm14, %v2900_v18, %v2902_v2  ;;  %v2916_v40 = vmul.f32 %v12886_v1, %v2902_v2 }
 0x2ee   : > { %5868 = vrot.lane.b32.xlu0 %v5861_v16, %s12162_s30  ;;  %v2914_v36 = vmul.f32 %v12922_v35, %v2905_v30  ;;  %v2915_v37 = vmul.f32 %v12909_v24, %v2906_v34 }
 0x2f0   : > { %v3295_v21 = vpop.permute.xlu0 %3294  ;;  %2710 = vrot.lane.b32.xlu1 %v2697_v17, %s12169_s10  ;;  %v3297_v20 = vpop.permute.xlu1 %3296 }
 0x2f1   : > { %v3302_v41 = vsel %vm15136_vm15, %v3295_v21, %v3297_v20  ;;  %v3310_v61 = vmul.f32 %v12902_v23, %v3295_v21 }
 0x2f2   : > { %2712 = vrot.lane.b32.xlu0 %v2698_v3, %s12169_s10  ;;  %v3311_v46 = vmul.f32 %v12922_v35, %v3302_v41 }
 0x2f4   : > { %v3299_v27 = vpop.permute.xlu0 %3298  ;;  %2714 = vrot.lane.b32.xlu1 %v2699_v25, %s12169_s10  ;;  %v3301_v28 = vpop.permute.xlu1 %3300 }
 0x2f5   : > { %v3303_v45 = vsel %vm15136_vm15, %v3297_v20, %v3299_v27  ;;  %v3304_v48 = vsel %vm15136_vm15, %v3299_v27, %v3301_v28  ;;  %v3314_v56 = vmul.f32 %v12871_v52, %v3301_v28 }
 0x2f6   : > { %2716 = vrot.lane.b32.xlu0 %v2700_v26, %s12169_s10  ;;  %v3312_v50 = vmul.f32 %v12909_v24, %v3303_v45  ;;  %v3313_v55 = vmul.f32 %v3304_v48, %v12936_v47 }
 0x2f8   : > { %v3509_v32 = vpop.permute.xlu0 %3508  ;;  %2708 = vrot.lane.b32.xlu1 %v2696_v8, %s12169_s10  ;;  %v3511_v33 = vpop.permute.xlu1 %3510 }
 0x2f9   : > { %v3516_v60 = vsel %vm15135_vm10, %v3509_v32, %v3511_v33  ;;  %v3524_v16 = vmul.f32 %v12902_v23, %v3509_v32 }
 0x2fa   : > { %2926 = vrot.lane.b32.xlu0 %v2913_v31, %s12168_s27  ;;  %v3525_v57 = vmul.f32 %v12922_v35, %v3516_v60 }
 0x2fc   : > { %v3513_v38 = vpop.permute.xlu0 %3512  ;;  %2928 = vrot.lane.b32.xlu1 %v2914_v36, %s12168_s27  ;;  %v3515_v39 = vpop.permute.xlu1 %3514 }
 0x2fd   : > { %v3517_v63 = vsel %vm15135_vm10, %v3511_v33, %v3513_v38  ;;  %v3518_v11 = vsel %vm15135_vm10, %v3513_v38, %v3515_v39  ;;  %v3528_v10 = vmul.f32 %v12871_v52, %v3515_v39 }
 0x2fe   : > { %2930 = vrot.lane.b32.xlu0 %v2915_v37, %s12168_s27  ;;  %v3526_v62 = vmul.f32 %v12909_v24, %v3517_v63  ;;  %v3527_v12 = vmul.f32 %v3518_v11, %v12936_v47 }
 0x300   : > { %v3723_v43 = vpop.permute.xlu0 %3722  ;;  %2932 = vrot.lane.b32.xlu1 %v2916_v40, %s12168_s27  ;;  %v3725_v44 = vpop.permute.xlu1 %3724 }
 0x301   : > { %v3730_v14 = vsel %vm411_vm8, %v3723_v43, %v3725_v44  ;;  %v3738_v29 = vmul.f32 %v12902_v23, %v3723_v43 }
 0x302   : > { %2924 = vrot.lane.b32.xlu0 %v2912_v42, %s12168_s27  ;;  %v3739_v22 = vmul.f32 %v12922_v35, %v3730_v14 }
 0x304   : > { %v3727_v51 = vpop.permute.xlu0 %3726  ;;  %3324 = vrot.lane.b32.xlu1 %v3311_v46, %s12167_s16  ;;  %v3729_v53 = vpop.permute.xlu1 %3728 }
 0x305   : > { %v3731_v2 = vsel %vm411_vm8, %v3725_v44, %v3727_v51  ;;  %v3732_v17 = vsel %vm411_vm8, %v3727_v51, %v3729_v53  ;;  %v3742_v25 = vmul.f32 %v12871_v52, %v3729_v53 }
 0x306   : > { %3326 = vrot.lane.b32.xlu0 %v3312_v50, %s12167_s16  ;;  %v3740_v49 = vmul.f32 %v12909_v24, %v3731_v2  ;;  %v3741_v20 = vmul.f32 %v3732_v17, %v12936_v47 }
 0x308   : > { %v3937_v58 = vpop.permute.xlu0 %3936  ;;  %3328 = vrot.lane.b32.xlu1 %v3313_v55, %s12167_s16  ;;  %v3939_v59 = vpop.permute.xlu1 %3938 }
 0x309   : > { %v3944_v28 = vsel %vm15134_vm11, %v3937_v58, %v3939_v59  ;;  %v3952_v41 = vmul.f32 %v12902_v23, %v3937_v58 }
 0x30a   : > { %3330 = vrot.lane.b32.xlu0 %v3314_v56, %s12167_s16  ;;  %v3953_v30 = vmul.f32 %v12922_v35, %v3944_v28 }
 0x30c   : > { %v3941_v0 = vpop.permute.xlu0 %3940  ;;  %3322 = vrot.lane.b32.xlu1 %v3310_v61, %s12167_s16  ;;  %v3943_v9 = vpop.permute.xlu1 %3942 }
 0x30d   : > { %v3945_v8 = vsel %vm15134_vm11, %v3939_v59, %v3941_v0  ;;  %v3946_v33 = vsel %vm15134_vm11, %v3941_v0, %v3943_v9  ;;  %v3956_v39 = vmul.f32 %v12871_v52, %v3943_v9  ;;  %vm15154_vm11 = vcmask 973824  }
 0x30e   : > { %3538 = vrot.lane.b32.xlu0 %v3525_v57, %s12166_s12  ;;  %v3954_v34 = vmul.f32 %v12909_v24, %v3945_v8  ;;  %v3955_v36 = vmul.f32 %v3946_v33, %v12936_v47 }
 0x310   : > { %v4151_v15 = vpop.permute.xlu0 %4150  ;;  %3540 = vrot.lane.b32.xlu1 %v3526_v62, %s12166_s12  ;;  %v4153_v13 = vpop.permute.xlu1 %4152 }
 0x311   : > { %v4158_v40 = vsel %vm329_vm1, %v4151_v15, %v4153_v13  ;;  %v4166_v59 = vmul.f32 %v12902_v23, %v4151_v15 }
 0x312   : > { %3542 = vrot.lane.b32.xlu0 %v3527_v12, %s12166_s12  ;;  %v4167_v45 = vmul.f32 %v12922_v35, %v4158_v40 }
 0x314   : > { %v4155_v19 = vpop.permute.xlu0 %4154  ;;  %3544 = vrot.lane.b32.xlu1 %v3528_v10, %s12166_s12  ;;  %v4157_v18 = vpop.permute.xlu1 %4156 }
 0x315   : > { %v4159_v44 = vsel %vm329_vm1, %v4153_v13, %v4155_v19  ;;  %v4160_v46 = vsel %vm329_vm1, %v4155_v19, %v4157_v18  ;;  %v4170_v54 = vmul.f32 %v12871_v52, %v4157_v18 }
 0x316   : > { %3536 = vrot.lane.b32.xlu0 %v3524_v16, %s12166_s12  ;;  %v4168_v48 = vmul.f32 %v12909_v24, %v4159_v44  ;;  %v4169_v53 = vmul.f32 %v4160_v46, %v12936_v47 }
 0x318   : > { %v12966_v3 = vpop.permute.xlu0 %4364  ;;  %3752 = vrot.lane.b32.xlu1 %v3739_v22, %s12165_s7  ;;  %v4367_v21 = vpop.permute.xlu1 %4366 }
 0x319   : > { %v4372_v58 = vsel %vm371_vm0, %v12966_v3, %v4367_v21  ;;  %v4380_v10 = vmul.f32 %v12902_v23, %v12966_v3 }
 0x31a   : > { %3754 = vrot.lane.b32.xlu0 %v3740_v49, %s12165_s7  ;;  %v4381_v61 = vmul.f32 %v12922_v35, %v4372_v58 }
 0x31c   : > { %v4369_v26 = vpop.permute.xlu0 %4368  ;;  %3756 = vrot.lane.b32.xlu1 %v3741_v20, %s12165_s7  ;;  %v4371_v27 = vpop.permute.xlu1 %4370 }
 0x31d   : > { %v4373_v60 = vsel %vm371_vm0, %v4367_v21, %v4369_v26  ;;  %v4374_v0 = vsel %vm371_vm0, %v4369_v26, %v4371_v27  ;;  %v4384_v15 = vmul.f32 %v12871_v52, %v4371_v27 }
 0x31e   : > { %3758 = vrot.lane.b32.xlu0 %v3742_v25, %s12165_s7  ;;  %v4382_v9 = vmul.f32 %v12909_v24, %v4373_v60  ;;  %v4383_v11 = vmul.f32 %v4374_v0, %v12936_v47 }
 0x320   : > { %v12978_v31 = vpop.permute.xlu0 %4578  ;;  %3750 = vrot.lane.b32.xlu1 %v3738_v29, %s12165_s7  ;;  %v4581_v32 = vpop.permute.xlu1 %4580 }
 0x321   : > { %v4586_v13 = vsel %vm753_vm2, %v12978_v31, %v4581_v32  ;;  %v4594_v27 = vmul.f32 %v12902_v23, %v12978_v31 }
 0x322   : > { %3966 = vrot.lane.b32.xlu0 %v3953_v30, %s12163_s18  ;;  %v4595_v18 = vmul.f32 %v12922_v35, %v4586_v13 }
 0x324   : > { %v4583_v37 = vpop.permute.xlu0 %4582  ;;  %3968 = vrot.lane.b32.xlu1 %v3954_v34, %s12163_s18  ;;  %v4585_v38 = vpop.permute.xlu1 %4584 }
 0x325   : > { %v4587_v19 = vsel %vm753_vm2, %v4581_v32, %v4583_v37  ;;  %v4588_v2 = vsel %vm753_vm2, %v4583_v37, %v4585_v38  ;;  %v4598_v21 = vmul.f32 %v12871_v52, %v4585_v38 }
 0x326   : > { %3970 = vrot.lane.b32.xlu0 %v3955_v36, %s12163_s18  ;;  %v4596_v22 = vmul.f32 %v12909_v24, %v4587_v19  ;;  %v4597_v3 = vmul.f32 %v4588_v2, %v12936_v47 }
 0x328   : > { %v12990_v42 = vpop.permute.xlu0 %4792  ;;  %3972 = vrot.lane.b32.xlu1 %v3956_v39, %s12163_s18  ;;  %v4795_v43 = vpop.permute.xlu1 %4794 }
 0x329   : > { %v4800_v25 = vsel %vm969_vm3, %v12990_v42, %v4795_v43  ;;  %v4808_v39 = vmul.f32 %v12902_v23, %v12990_v42 }
 0x32a   : > { %3964 = vrot.lane.b32.xlu0 %v3952_v41, %s12163_s18  ;;  %v4809_v29 = vmul.f32 %v12922_v35, %v4800_v25 }
 0x32c   : > { %v4797_v50 = vpop.permute.xlu0 %4796  ;;  %4180 = vrot.lane.b32.xlu1 %v4167_v45, %s12162_s30  ;;  %v4799_v51 = vpop.permute.xlu1 %4798 }
 0x32d   : > { %v4801_v28 = vsel %vm969_vm3, %v4795_v43, %v4797_v50  ;;  %v4802_v30 = vsel %vm969_vm3, %v4797_v50, %v4799_v51  ;;  %v4812_v37 = vmul.f32 %v12871_v52, %v4799_v51 }
 0x32e   : > { %4182 = vrot.lane.b32.xlu0 %v4168_v48, %s12162_s30  ;;  %v4810_v33 = vmul.f32 %v12909_v24, %v4801_v28  ;;  %v4811_v31 = vmul.f32 %v4802_v30, %v12936_v47 }
 0x330   : > { %v13002_v55 = vpop.permute.xlu0 %5006  ;;  %4184 = vrot.lane.b32.xlu1 %v4169_v53, %s12162_s30  ;;  %v5009_v56 = vpop.permute.xlu1 %5008 }
 0x331   : > { %v5014_v38 = vsel %vm1185_vm4, %v13002_v55, %v5009_v56 }
 0x332   : > { %4186 = vrot.lane.b32.xlu0 %v4170_v54, %s12162_s30  ;;  %v5023_v43 = vmul.f32 %v12922_v35, %v5014_v38 }
 0x334   : > { %v5011_v63 = vpop.permute.xlu0 %5010  ;;  %4178 = vrot.lane.b32.xlu1 %v4166_v59, %s12162_s30  ;;  %v13012_v57 = vpop.permute.xlu1 %5012  ;;  %v11928_v59 = vld [vmem:[%s15128_s2 + $0x50] sm:$0xff] }
 0x335   : > { %v5015_v41 = vsel %vm1185_vm4, %v5009_v56, %v5011_v63  ;;  %v5016_v45 = vsel %vm1185_vm4, %v5011_v63, %v13012_v57  ;;  %v5026_v54 = vmul.f32 %v12871_v52, %v13012_v57  ;;  %v5022_v63 = vmul.f32 %v12902_v23, %v13002_v55 }
 0x336   : > { %4394 = vrot.lane.b32.xlu0 %v4381_v61, %s12161_s29  ;;  %v5024_v48 = vmul.f32 %v12909_v24, %v5015_v41  ;;  %v5025_v42 = vmul.f32 %v5016_v45, %v12936_v47 }
 0x338   : > { %v13018_v62 = vpop.permute.xlu0 %5220  ;;  %4396 = vrot.lane.b32.xlu1 %v4382_v9, %s12161_s29  ;;  %v13021_v12 = vpop.permute.xlu1 %5222 }
 0x339   : > { %v5228_v60 = vsel %vm1000_vm5, %v13018_v62, %v13021_v12  ;;  %v5236_v2 = vmul.f32 %v12902_v23, %v13018_v62 }
 0x33a   : > { %4398 = vrot.lane.b32.xlu0 %v4383_v11, %s12161_s29  ;;  %v5237_v9 = vmul.f32 %v12922_v35, %v5228_v60  ;;  %v11936_v60 = vld [vmem:[%s15128_s2 + $0x60] sm:$0xff] }
 0x33c   : > { %v13029_v14 = vpop.permute.xlu0 %5224  ;;  %4400 = vrot.lane.b32.xlu1 %v4384_v15, %s12161_s29  ;;  %v13032_v16 = vpop.permute.xlu1 %5226 }
 0x33d   : > { %v5229_v0 = vsel %vm1000_vm5, %v13021_v12, %v13029_v14  ;;  %v5230_v55 = vsel %vm1000_vm5, %v13029_v14, %v13032_v16  ;;  %v5240_v19 = vmul.f32 %v12871_v52, %v13032_v16 }
 0x33e   : > { %4392 = vrot.lane.b32.xlu0 %v4380_v10, %s12161_s29  ;;  %v5238_v12 = vmul.f32 %v12909_v24, %v5229_v0  ;;  %v5239_v13 = vmul.f32 %v5230_v55, %v12936_v47 }
 0x340   : > { %v13039_v17 = vpop.permute.xlu0 %5434  ;;  %4608 = vrot.lane.b32.xlu1 %v4595_v18, %s12160_s26  ;;  %v13042_v49 = vpop.permute.xlu1 %5436 }
 0x341   : > { %v5442_v18 = vsel %vm784_vm6, %v13039_v17, %v13042_v49  ;;  %v5450_v41 = vmul.f32 %v12902_v23, %v13039_v17 }
 0x342   : > { %4610 = vrot.lane.b32.xlu0 %v4596_v22, %s12160_s26  ;;  %v5451_v16 = vmul.f32 %v12922_v35, %v5442_v18 }
 0x344   : > { %v13047_v20 = vpop.permute.xlu0 %5438  ;;  %4612 = vrot.lane.b32.xlu1 %v4597_v3, %s12160_s26 }
 0x345   : > { %v13052_v26 = vpop.permute.xlu1 %5440  ;;  %v5443_v3 = vsel %vm784_vm6, %v13042_v49, %v13047_v20 }
 0x346   : > { %4614 = vrot.lane.b32.xlu0 %v4598_v21, %s12160_s26  ;;  %v5452_v62 = vmul.f32 %v12909_v24, %v5443_v3 }
 0x348   : > { %v13059_v8 = vpop.permute.xlu0 %5648  ;;  %4606 = vrot.lane.b32.xlu1 %v4594_v27, %s12160_s26  ;;  %v5444_v27 = vsel %vm784_vm6, %v13047_v20, %v13052_v26 }
 0x349   : > { %v13063_v32 = vpop.permute.xlu1 %5650  ;;  %v5453_v49 = vmul.f32 %v5444_v27, %v12936_v47 }
 0x34a   : > { %4822 = vrot.lane.b32.xlu0 %v4809_v29, %s12159_s20 }
 0x34c   : > { %v13068_v34 = vpop.permute.xlu0 %5652  ;;  %4824 = vrot.lane.b32.xlu1 %v4810_v33, %s12159_s20 }
 0x34d   : > { %v13071_v36 = vpop.permute.xlu1 %5654 }
 0x34e   : > { %4826 = vrot.lane.b32.xlu0 %v4811_v31, %s12159_s20  ;;  %v11932_v31 = vld [vmem:[%s15128_s2 + $0x58] sm:$0xff] }
 0x350   : > { %v2496_v40 = vpop.permute.xlu0 %2495  ;;  %4828 = vrot.lane.b32.xlu1 %v4812_v37, %s12159_s20  ;;  %v5454_v37 = vmul.f32 %v12871_v52, %v13052_v26 }
 0x352   : > { %4820 = vrot.lane.b32.xlu0 %v4808_v39, %s12159_s20  ;;  %v2498_v44 = vpop.permute.xlu1 %2497  ;;  %v11939_v39 = vld [vmem:[%s15127_s1 + $0x34] sm:$0xf] }
 0x353   : > { %v2504_v46 = vsel %vm411_vm8, %v2496_v40, %v2498_v44  ;;  %v3102_v45 = vrot.slane %v11939_v39, %v12231_v7  ;;  %v3098_v17 = vrot.slane %v11939_v39, %v12227_v5 }
 0x354   : > { %v2500_v50 = vpop.permute.xlu0 %2499  ;;  %5036 = vrot.lane.b32.xlu1 %v5023_v43, %s12158_s17  ;;  %2544 = vmatprep.subr.mxu0 %v2504_v46  ;;  %v5657_v43 = vsel %vm402_vm7, %v13063_v32, %v13068_v34 }
 0x355   : > { %v2505_v58 = vsel %vm411_vm8, %v2498_v44, %v2500_v50 }
 0x356   : > { %5038 = vrot.lane.b32.xlu0 %v5024_v48, %s12158_s17  ;;  %v2502_v51 = vpop.permute.xlu1 %2501 }
 0x357   : > { %v2506_v53 = vsel %vm411_vm8, %v2500_v50, %v2502_v51  ;;  %v5658_v50 = vsel %vm402_vm7, %v13068_v34, %v13071_v36 }
 0x358   : > { %v2494_v56 = vpop.permute.xlu0 %2493  ;;  %5040 = vrot.lane.b32.xlu1 %v5025_v42, %s12158_s17  ;;  %2615 = vmatprep.subr.mxu1 %v2506_v53  ;;  %v5666_v42 = vmul.f32 %v12909_v24, %v5657_v43 }
 0x359   : > { %v2503_v61 = vsel %vm411_vm8, %v2494_v56, %v2496_v40  ;;  %2616 = vmatpush1.msra.mxu1 %v2505_v58  ;;  %v5656_v40 = vsel %vm402_vm7, %v13059_v8, %v13063_v32  ;;  %v3110_v32 = vrot.slane %v11939_v39, %v12229_v6  ;;  %v3106_v56 = vrot.slane %v11939_v39, %v12225_v4  ;;  %v11948_v39 = vld [vmem:[%s15128_s2 + $0x78] sm:$0xff] }
 0x35a   : > { %5042 = vrot.lane.b32.xlu0 %v5026_v54, %s12158_s17  ;;  %2545 = vmatpush1.msra.mxu0 %v2503_v61  ;;  %v13105_v57 = vpop.permute.xlu1 %5862  ;;  %v5665_v46 = vmul.f32 %v12922_v35, %v5656_v40  ;;  %v3116_v54 = vmul.f32 %v12922_v35, %v3102_v45  ;;  %v5667_v58 = vmul.f32 %v5658_v50, %v12936_v47 }
 0x35b   : > { %11930 = vmatmul.mubr.msk.f32.vlgmr.msra.gmra.mxu1 %vm411_vm8, %v11928_v59  ;;  %11929 = vmatmul.mubr.msk.f32.vlgmr.msra.gmra.mxu0 %vm411_vm8, %v11928_v59  ;;  %v3115_v61 = vmul.f32 %v12902_v23, %v3098_v17  ;;  %v3118_v0 = vmul.f32 %v12886_v1, %v3110_v32 }
 0x35c   : > { %v13113_v11 = vpop.permute.xlu0 %5864  ;;  %5034 = vrot.lane.b32.xlu1 %v5022_v63, %s12158_s17  ;;  %2794 = vmatprep.mubr.f32.mxu0 %v12871_v52 }
 0x35d   : > { %2865 = vmatprep.mubr.f32.mxu1 %v12871_v52 }
 0x35e   : > { %5250 = vrot.lane.b32.xlu0 %v5237_v9, %s12157_s14  ;;  %v13123_v15 = vpop.permute.xlu1 %5866  ;;  %v5668_v9 = vmul.f32 %v12871_v52, %v13071_v36 }
 0x35f   : > { %v5871_v36 = vsel %vm572_vm9, %v13113_v11, %v13123_v15 }
 0x360   : > { %v13126_v10 = vpop.permute.xlu0 %5868  ;;  %5252 = vrot.lane.b32.xlu1 %v5238_v12, %s12157_s14  ;;  %v5870_v12 = vsel %vm572_vm9, %v13105_v57, %v13113_v11  ;;  %v5880_v11 = vmul.f32 %v12909_v24, %v5871_v36 }
 0x361   : > { %v5879_v18 = vmul.f32 %v12922_v35, %v5870_v12  ;;  %v5882_v27 = vmul.f32 %v12871_v52, %v13126_v10 }
 0x362   : > { %5254 = vrot.lane.b32.xlu0 %v5239_v13, %s12157_s14  ;;  %v2711_v14 = vpop.permute.xlu1 %2710  ;;  %v3117_v13 = vmul.f32 %v12909_v24, %v3106_v56  ;;  %v11944_v24 = vld [vmem:[%s15128_s2 + $0x70] sm:$0xff] }
 0x364   : > { %v2713_v22 = vpop.permute.xlu0 %2712  ;;  %5256 = vrot.lane.b32.xlu1 %v5240_v19, %s12157_s14  ;;  %v5664_v19 = vmul.f32 %v12902_v23, %v13059_v8  ;;  %v11940_v8 = vld [vmem:[%s15128_s2 + $0x68] sm:$0xff] }
 0x365   : > { %v2720_v21 = vsel %vm15135_vm10, %v2711_v14, %v2713_v22 }
 0x366   : > { %5248 = vrot.lane.b32.xlu0 %v5236_v2, %s12157_s14  ;;  %2760 = vmatprep.subr.mxu0 %v2720_v21  ;;  %v2715_v25 = vpop.permute.xlu1 %2714 }
 0x367   : > { %v2721_v33 = vsel %vm15135_vm10, %v2713_v22, %v2715_v25  ;;  %v5872_v22 = vsel %vm572_vm9, %v13123_v15, %v13126_v10  ;;  %v6057_v10 = vld [vmem:[%s15129_s3] sm:$0xff] }
 0x368   : > { %v2717_v28 = vpop.permute.xlu0 %2716  ;;  %5464 = vrot.lane.b32.xlu1 %v5451_v16, %s12156_s11  ;;  %v5881_v21 = vmul.f32 %v5872_v22, %v12936_v47  ;;  %v5878_v47 = vmul.f32 %v12902_v23, %v13105_v57 }
 0x369   : > { %v2722_v29 = vsel %vm15135_vm10, %v2715_v25, %v2717_v28 }
 0x36a   : > { %5466 = vrot.lane.b32.xlu0 %v5452_v62, %s12156_s11  ;;  %2831 = vmatprep.subr.mxu1 %v2722_v29  ;;  %v2709_v30 = vpop.permute.xlu1 %2708 }
 0x36b   : > { %v2719_v20 = vsel %vm15135_vm10, %v2709_v30, %v2711_v14  ;;  %2832 = vmatpush1.msra.mxu1 %v2721_v33  ;;  %vm15155_vm10 = vmmov %vm15154_vm11 }
 0x36c   : > { %v2927_v38 = vpop.permute.xlu0 %2926  ;;  %5468 = vrot.lane.b32.xlu1 %v5453_v49, %s12156_s11  ;;  %2761 = vmatpush1.msra.mxu0 %v2719_v20  ;;  %v6088_v49 = vld [vmem:[%s15127_s1] sm:$0xf]  ;;  %v11995_v20 = vld [vmem:[%s15127_s1 + $0x4] sm:$0xf] }
 0x36d   : > { %11933 = vmatmul.mubr.msk.f32.vlgmr.msra.gmra.mxu0 %vm411_vm8, %v11932_v31  ;;  %11934 = vmatmul.mubr.msk.f32.vlgmr.msra.gmra.mxu1 %vm411_vm8, %v11932_v31  ;;  %v6093_v57 = vrot.slane %v6088_v49, %v12227_v5  ;;  %v6101_v33 = vrot.slane %v6088_v49, %v12225_v4  ;;  %v6133_v43 = vrot.slane %v11995_v20, %v12227_v5 }
 0x36e   : > { %5470 = vrot.lane.b32.xlu0 %v5454_v37, %s12156_s11  ;;  %v2929_v26 = vpop.permute.xlu1 %2928  ;;  %3010 = vmatprep.mubr.f32.mxu0 %v12871_v52  ;;  %v6141_v17 = vrot.slane %v11995_v20, %v12225_v4 }
 0x36f   : > { %v2936_v44 = vsel %vm15136_vm15, %v2927_v38, %v2929_v26  ;;  %3081 = vmatprep.mubr.f32.mxu1 %v12871_v52 }
 0x370   : > { %v2931_v48 = vpop.permute.xlu0 %2930  ;;  %5462 = vrot.lane.b32.xlu1 %v5450_v41, %s12156_s11  ;;  %2976 = vmatprep.subr.mxu0 %v2936_v44  ;;  %v6097_v41 = vrot.slane %v6088_v49, %v12231_v7 }
 0x371   : > { %v2937_v34 = vsel %vm15136_vm15, %v2929_v26, %v2931_v48 }
 0x372   : > { %5678 = vrot.lane.b32.xlu0 %v5665_v46, %s12155_s8  ;;  %v2933_v51 = vpop.permute.xlu1 %2932  ;;  %v6105_v46 = vrot.slane %v6088_v49, %v12229_v6 }
 0x373   : > { %v2938_v53 = vsel %vm15136_vm15, %v2931_v48, %v2933_v51 }
 0x374   : > { %v2925_v59 = vpop.permute.xlu0 %2924  ;;  %5680 = vrot.lane.b32.xlu1 %v5666_v42, %s12155_s8  ;;  %3047 = vmatprep.subr.mxu1 %v2938_v53  ;;  %v11952_v42 = vld [vmem:[%s15128_s2 + $0x80] sm:$0xff] }
 0x375   : > { %v2935_v63 = vsel %vm15136_vm15, %v2925_v59, %v2927_v38  ;;  %3048 = vmatpush1.msra.mxu1 %v2937_v34  ;;  %v6145_v34 = vrot.slane %v11995_v20, %v12229_v6  ;;  %vm15156_vm15 = vmmov %vm15155_vm10 }
 0x376   : > { %5682 = vrot.lane.b32.xlu0 %v5667_v58, %s12155_s8  ;;  %2977 = vmatpush1.msra.mxu0 %v2935_v63  ;;  %v3325_v55 = vpop.permute.xlu1 %3324 }
 0x377   : > { %3154 = vmatprep.subr.mxu0 %v3116_v54  ;;  %11937 = vmatmul.mubr.msk.f32.vlgmr.msra.gmra.mxu0 %vm411_vm8, %v11936_v60  ;;  %v6137_v54 = vrot.slane %v11995_v20, %v12231_v7 }
 0x378   : > { %v3327_v1 = vpop.permute.xlu0 %3326  ;;  %5684 = vrot.lane.b32.xlu1 %v5668_v9, %s12155_s8  ;;  %3155 = vmatpush1.msra.mxu0 %v3115_v61  ;;  %v11956_v9 = vld [vmem:[%s15128_s2 + $0x88] sm:$0xff] }
 0x379   : > { %v3333_v14 = vsel %vm15137_vm14, %v3325_v55, %v3327_v1  ;;  %11938 = vmatmul.mubr.msk.f32.vlgmr.msra.gmra.mxu1 %vm411_vm8, %v11936_v60  ;;  %3225 = vmatprep.subr.mxu1 %v3118_v0 }
 0x37a   : > { %5676 = vrot.lane.b32.xlu0 %v5664_v19, %s12155_s8  ;;  %3373 = vmatprep.subr.mxu0 %v3333_v14  ;;  %v3329_v2 = vpop.permute.xlu1 %3328 }
 0x37b   : > { %3226 = vmatpush1.msra.mxu1 %v3117_v13  ;;  %3259 = vmatprep.mubr.f32.mxu1 %v12871_v52  ;;  %v3334_v16 = vsel %vm15137_vm14, %v3327_v1, %v3329_v2 }
 0x37c   : > { %v3331_v3 = vpop.permute.xlu0 %3330  ;;  %5892 = vrot.lane.b32.xlu1 %v5879_v18, %s12154_s25  ;;  %3188 = vmatprep.mubr.f32.mxu0 %v12871_v52 }
 0x37d   : > { %v3335_v35 = vsel %vm15137_vm14, %v3329_v2, %v3331_v3  ;;  %11942 = vmatmul.mubr.msk.f32.vlgmr.msra.gmra.mxu1 %vm411_vm8, %v11940_v8  ;;  %11941 = vmatmul.mubr.msk.f32.vlgmr.msra.gmra.mxu0 %vm411_vm8, %v11940_v8 }
 0x37e   : > { %5894 = vrot.lane.b32.xlu0 %v5880_v11, %s12154_s25  ;;  %3444 = vmatprep.subr.mxu1 %v3335_v35  ;;  %v3323_v15 = vpop.permute.xlu1 %3322  ;;  %v11960_v11 = vld [vmem:[%s15128_s2 + $0x90] sm:$0xff] }
 0x37f   : > { %v3332_v25 = vsel %vm15137_vm14, %v3323_v15, %v3325_v55  ;;  %3445 = vmatpush1.msra.mxu1 %v3334_v16  ;;  %3478 = vmatprep.mubr.f32.mxu1 %v12871_v52  ;;  %vm15157_vm14 = vmmov %vm15155_vm10 }
 0x380   : > { %v3539_v62 = vpop.permute.xlu0 %3538  ;;  %5896 = vrot.lane.b32.xlu1 %v5881_v21, %s12154_s25  ;;  %3374 = vmatpush1.msra.mxu0 %v3332_v25 }
 0x381   : > { %3407 = vmatprep.mubr.f32.mxu0 %v12871_v52  ;;  %11946 = vmatmul.mubr.msk.f32.vlgmr.msra.gmra.mxu1 %vm411_vm8, %v11944_v24 }
 0x382   : > { %5898 = vrot.lane.b32.xlu0 %v5882_v27, %s12154_s25  ;;  %v3541_v28 = vpop.permute.xlu1 %3540  ;;  %11945 = vmatmul.mubr.msk.f32.vlgmr.msra.gmra.mxu0 %vm411_vm8, %v11944_v24 }
 0x383   : > { %v3547_v29 = vsel %vm2687_vm13, %v3539_v62, %v3541_v28  ;;  %3692 = vmatprep.mubr.f32.mxu1 %v12871_v52  ;;  %3621 = vmatprep.mubr.f32.mxu0 %v12871_v52 }
 0x384   : > { %v3543_v23 = vpop.permute.xlu0 %3542  ;;  %5890 = vrot.lane.b32.xlu1 %v5878_v47, %s12154_s25  ;;  %3587 = vmatprep.subr.mxu0 %v3547_v29  ;;  %v11964_v47 = vld [vmem:[%s15128_s2 + $0x98] sm:$0xff] }
 0x385   : > { %v3548_v38 = vsel %vm2687_vm13, %v3541_v28, %v3543_v23 }
 0x386   : > { %6060 = vperm.xlu0 %12132, %v6057_v10   ;;  %v3545_v30 = vpop.permute.xlu1 %3544 }
 0x387   : > { %v3549_v31 = vsel %vm2687_vm13, %v3543_v23, %v3545_v30 }
 0x388   : > { %v3537_v37 = vpop.permute.xlu0 %3536  ;;  %3658 = vmatprep.subr.mxu1 %v3549_v31  ;;  %6106 = vrot.lane.b32.xlu1 %v6093_v57, %s12154_s25 }
 0x389   : > { %v3546_v40 = vsel %vm2687_vm13, %v3537_v37, %v3539_v62  ;;  %3659 = vmatpush1.msra.mxu1 %v3548_v38 }
 0x38a   : > { %3588 = vmatpush1.msra.mxu0 %v3546_v40  ;;  %v3753_v26 = vpop.permute.xlu1 %3752  ;;  %6110 = vrot.lane.b32.xlu0 %v6101_v33, %s12154_s25  ;;  %v11968_v33 = vld [vmem:[%s15128_s2 + $0xa0] sm:$0xff] }
 0x38b   : > { %11950 = vmatmul.mubr.msk.f32.vlgmr.msra.gmra.mxu1 %vm411_vm8, %v11948_v39  ;;  %11949 = vmatmul.mubr.msk.f32.vlgmr.msra.gmra.mxu0 %vm411_vm8, %v11948_v39 }
 0x38c   : > { %v3755_v44 = vpop.permute.xlu0 %3754  ;;  %3906 = vmatprep.mubr.f32.mxu1 %v12871_v52  ;;  %3835 = vmatprep.mubr.f32.mxu0 %v12871_v52 }
 0x38d   : > { %v3761_v45 = vsel %vm2472_vm12, %v3753_v26, %v3755_v44  ;;  %6108 = vrot.lane.b32.xlu1 %v6097_v41, %s12154_s25 }
 0x38e   : > { %3801 = vmatprep.subr.mxu0 %v3761_v45  ;;  %v3757_v48 = vpop.permute.xlu1 %3756  ;;  %6146 = vrot.lane.b32.xlu0 %v6133_v43, %s12155_s8 }
 0x38f   : > { %v3762_v53 = vsel %vm2472_vm12, %v3755_v44, %v3757_v48  ;;  %v11972_v44 = vld [vmem:[%s15128_s2 + $0xa8] sm:$0xff] }
 0x390   : > { %v3759_v50 = vpop.permute.xlu0 %3758 }
 0x391   : > { %v3763_v32 = vsel %vm2472_vm12, %v3757_v48, %v3759_v50  ;;  %6112 = vrot.lane.b32.xlu1 %v6105_v46, %s12154_s25 }
 0x392   : > { %3872 = vmatprep.subr.mxu1 %v3763_v32  ;;  %v3751_v51 = vpop.permute.xlu1 %3750  ;;  %6150 = vrot.lane.b32.xlu0 %v6141_v17, %s12155_s8  ;;  %v13350_v17 = vld [vmem:[#allocation2 + $0x28] sm:$0xff] }
 0x393   : > { %v3760_v56 = vsel %vm2472_vm12, %v3751_v51, %v3753_v26  ;;  %3873 = vmatpush1.msra.mxu1 %v3762_v53 }
 0x394   : > { %v3967_v58 = vpop.permute.xlu0 %3966  ;;  %3802 = vmatpush1.msra.mxu0 %v3760_v56  ;;  %11954 = vmatmul.mubr.msk.f32.vlgmr.msra.gmra.mxu1 %vm411_vm8, %v11952_v42 }
 0x395   : > { %11953 = vmatmul.mubr.msk.f32.vlgmr.msra.gmra.mxu0 %vm411_vm8, %v11952_v42  ;;  %4120 = vmatprep.mubr.f32.mxu1 %v12871_v52 }
 0x396   : > { %v3969_v59 = vpop.permute.xlu1 %3968  ;;  %4049 = vmatprep.mubr.f32.mxu0 %v12871_v52  ;;  %6148 = vrot.lane.b32.xlu1 %v6137_v54, %s12155_s8  ;;  %v11976_v54 = vld [vmem:[%s15128_s2 + $0xb0] sm:$0xff] }
 0x397   : > { %v3975_v60 = vsel %vm15154_vm11, %v3967_v58, %v3969_v59 }
 0x398   : > { %v3971_v61 = vpop.permute.xlu0 %3970  ;;  %4015 = vmatprep.subr.mxu0 %v3975_v60 }
 0x399   : > { %v3976_v12 = vsel %vm15156_vm15, %v3969_v59, %v3971_v61 }
 0x39a   : > { %v3973_v63 = vpop.permute.xlu1 %3972  ;;  %6152 = vrot.lane.b32.xlu1 %v6145_v34, %s12155_s8 }
 0x39b   : > { %v3977_v0 = vsel %vm15155_vm10, %v3971_v61, %v3973_v63 }
 0x39c   : > { %v3965_v55 = vpop.permute.xlu0 %3964  ;;  %4086 = vmatprep.subr.mxu1 %v3977_v0 }
 0x39d   : > { %v3974_v13 = vsel %vm15157_vm14, %v3965_v55, %v3967_v58  ;;  %4087 = vmatpush1.msra.mxu1 %v3976_v12  ;;  %v11980_v55 = vld [vmem:[%s15128_s2 + $0xb8] sm:$0xff] }
 0x39e   : > { %4016 = vmatpush1.msra.mxu0 %v3974_v13  ;;  %v4181_v19 = vpop.permute.xlu1 %4180  ;;  %11958 = vmatmul.mubr.msk.f32.vlgmr.msra.gmra.mxu1 %vm411_vm8, %v11956_v9 }
 0x39f   : > { %11957 = vmatmul.mubr.msk.f32.vlgmr.msra.gmra.mxu0 %vm411_vm8, %v11956_v9  ;;  %4334 = vmatprep.mubr.f32.mxu1 %v12871_v52 }
 0x3a0   : > { %v4183_v1 = vpop.permute.xlu0 %4182  ;;  %4263 = vmatprep.mubr.f32.mxu0 %v12871_v52 }
 0x3a1   : > { %v4189_v36 = vsel %vm572_vm9, %v4181_v19, %v4183_v1 }
 0x3a2   : > { %4229 = vmatprep.subr.mxu0 %v4189_v36  ;;  %v4185_v14 = vpop.permute.xlu1 %4184 }
 0x3a3   : > { %v4190_v22 = vsel %vm572_vm9, %v4183_v1, %v4185_v14 }
 0x3a4   : > { %v4187_v18 = vpop.permute.xlu0 %4186 }
 0x3a5   : > { %v4191_v2 = vsel %vm572_vm9, %v4185_v14, %v4187_v18 }
 0x3a6   : > { %4300 = vmatprep.subr.mxu1 %v4191_v2  ;;  %v4179_v8 = vpop.permute.xlu1 %4178 }
 0x3a7   : > { %v4188_v3 = vsel %vm572_vm9, %v4179_v8, %v4181_v19  ;;  %4301 = vmatpush1.msra.mxu1 %v4190_v22  ;;  %v11984_v22 = vld [vmem:[%s15128_s2 + $0xc0] sm:$0xff] }
 0x3a8   : > { %v4395_v35 = vpop.permute.xlu0 %4394  ;;  %4230 = vmatpush1.msra.mxu0 %v4188_v3  ;;  %11962 = vmatmul.mubr.msk.f32.vlgmr.msra.gmra.mxu1 %vm411_vm8, %v11960_v11 }
 0x3a9   : > { %11961 = vmatmul.mubr.msk.f32.vlgmr.msra.gmra.mxu0 %vm411_vm8, %v11960_v11  ;;  %4548 = vmatprep.mubr.f32.mxu1 %v12871_v52 }
 0x3aa   : > { %v4397_v21 = vpop.permute.xlu1 %4396  ;;  %4477 = vmatprep.mubr.f32.mxu0 %v12871_v52 }
 0x3ab   : > { %v4403_v15 = vsel %vm402_vm7, %v4395_v35, %v4397_v21 }
 0x3ac   : > { %v4399_v16 = vpop.permute.xlu0 %4398  ;;  %4443 = vmatprep.subr.mxu0 %v4403_v15 }
 0x3ad   : > { %v4404_v62 = vsel %vm402_vm7, %v4397_v21, %v4399_v16 }
 0x3ae   : > { %v4401_v24 = vpop.permute.xlu1 %4400 }
 0x3af   : > { %v4405_v25 = vsel %vm402_vm7, %v4399_v16, %v4401_v24 }
 0x3b0   : > { %v4393_v27 = vpop.permute.xlu0 %4392  ;;  %4514 = vmatprep.subr.mxu1 %v4405_v25 }
 0x3b1   : > { %v4402_v28 = vsel %vm402_vm7, %v4393_v27, %v4395_v35  ;;  %4515 = vmatpush1.msra.mxu1 %v4404_v62  ;;  %v11988_v62 = vld [vmem:[%s15128_s2 + $0xc8] sm:$0xff] }
 0x3b2   : > { %4444 = vmatpush1.msra.mxu0 %v4402_v28  ;;  %v4609_v29 = vpop.permute.xlu1 %4608  ;;  %11966 = vmatmul.mubr.msk.f32.vlgmr.msra.gmra.mxu1 %vm411_vm8, %v11964_v47 }
 0x3b3   : > { %11965 = vmatmul.mubr.msk.f32.vlgmr.msra.gmra.mxu0 %vm411_vm8, %v11964_v47  ;;  %4762 = vmatprep.mubr.f32.mxu1 %v12871_v52 }
 0x3b4   : > { %v4611_v10 = vpop.permute.xlu0 %4610  ;;  %4691 = vmatprep.mubr.f32.mxu0 %v12871_v52 }
 0x3b5   : > { %v4617_v49 = vsel %vm784_vm6, %v4609_v29, %v4611_v10 }
 0x3b6   : > { %4657 = vmatprep.subr.mxu0 %v4617_v49  ;;  %v4613_v23 = vpop.permute.xlu1 %4612 }
 0x3b7   : > { %v4618_v20 = vsel %vm784_vm6, %v4611_v10, %v4613_v23 }
 0x3b8   : > { %v4615_v57 = vpop.permute.xlu0 %4614 }
 0x3b9   : > { %v4619_v30 = vsel %vm784_vm6, %v4613_v23, %v4615_v57 }
 0x3ba   : > { %4728 = vmatprep.subr.mxu1 %v4619_v30  ;;  %v4607_v31 = vpop.permute.xlu1 %4606 }
 0x3bb   : > { %v4616_v37 = vsel %vm784_vm6, %v4607_v31, %v4609_v29  ;;  %4729 = vmatpush1.msra.mxu1 %v4618_v20  ;;  %v11992_v20 = vld [vmem:[%s15128_s2 + $0xd0] sm:$0xff] }
 0x3bc   : > { %v4823_v38 = vpop.permute.xlu0 %4822  ;;  %4658 = vmatpush1.msra.mxu0 %v4616_v37  ;;  %11970 = vmatmul.mubr.msk.f32.vlgmr.msra.gmra.mxu1 %vm411_vm8, %v11968_v33 }
 0x3bd   : > { %11969 = vmatmul.mubr.msk.f32.vlgmr.msra.gmra.mxu0 %vm411_vm8, %v11968_v33  ;;  %4976 = vmatprep.mubr.f32.mxu1 %v12871_v52  ;;  %v13399_v33 = vpop.f32.mrf.mxu1 }
 0x3be   : > { %v4825_v39 = vpop.permute.xlu1 %4824  ;;  %4905 = vmatprep.mubr.f32.mxu0 %v12871_v52 }
 0x3bf   : > { %v4831_v40 = vsel %vm1000_vm5, %v4823_v38, %v4825_v39 }
 0x3c0   : > { %v4827_v41 = vpop.permute.xlu0 %4826  ;;  %4871 = vmatprep.subr.mxu0 %v4831_v40  ;;  %v13407_v40 = vpop.f32.mrf.mxu0 }
 0x3c1   : > { %v4832_v46 = vsel %vm1000_vm5, %v4825_v39, %v4827_v41 }
 0x3c2   : > { %v4829_v26 = vpop.permute.xlu1 %4828 }
 0x3c3   : > { %v4833_v43 = vsel %vm1000_vm5, %v4827_v41, %v4829_v26  ;;  %v13410_v41 = vpop.f32.mrf.mxu1 }
 0x3c4   : > { %v4821_v45 = vpop.permute.xlu0 %4820  ;;  %4942 = vmatprep.subr.mxu1 %v4833_v43 }
 0x3c5   : > { %v4830_v48 = vsel %vm1000_vm5, %v4821_v45, %v4823_v38  ;;  %4943 = vmatpush1.msra.mxu1 %v4832_v46  ;;  %v12001_v45 = vld [vmem:[%s15127_s1 + $0x8] sm:$0xf]  ;;  %v13424_v46 = vpop.f32.mrf.mxu1 }
 0x3c6   : > { %4872 = vmatpush1.msra.mxu0 %v4830_v48  ;;  %11974 = vmatmul.mubr.msk.f32.vlgmr.msra.gmra.mxu1 %vm411_vm8, %v11972_v44  ;;  %v5037_v52 = vpop.permute.xlu1 %5036  ;;  %v6514_v48 = vrot.slane %v12001_v45, %v12231_v7 }
 0x3c7   : > { %11973 = vmatmul.mubr.msk.f32.vlgmr.msra.gmra.mxu0 %vm411_vm8, %v11972_v44  ;;  %5190 = vmatprep.mubr.f32.mxu1 %v13350_v17  ;;  %v13419_v44 = vpop.f32.mrf.mxu0 }
 0x3c8   : > { %v5039_v50 = vpop.permute.xlu0 %5038  ;;  %5119 = vmatprep.mubr.f32.mxu0 %v13350_v17 }
 0x3c9   : > { %v5045_v32 = vsel %vm1185_vm4, %v5037_v52, %v5039_v50 }
 0x3ca   : > { %5085 = vmatprep.subr.mxu0 %v5045_v32  ;;  %v5041_v42 = vpop.permute.xlu1 %5040 }
 0x3cb   : > { %v5046_v58 = vsel %vm1185_vm4, %v5039_v50, %v5041_v42  ;;  %v13430_v50 = vpop.f32.mrf.mxu1 }
 0x3cc   : > { %v5043_v51 = vpop.permute.xlu0 %5042 }
 0x3cd   : > { %v5047_v53 = vsel %vm1185_vm4, %v5041_v42, %v5043_v51  ;;  %v6522_v42 = vrot.slane %v12001_v45, %v12229_v6  ;;  %v13439_v51 = vld [vmem:[%s15127_s1 + $0xc] sm:$0xf] }
 0x3ce   : > { %5156 = vmatprep.subr.mxu1 %v5047_v53  ;;  %v5035_v56 = vpop.permute.xlu1 %5034 }
 0x3cf   : > { %v5044_v59 = vsel %vm1185_vm4, %v5035_v56, %v5037_v52  ;;  %5157 = vmatpush1.msra.mxu1 %v5046_v58  ;;  %v13428_v52 = vpop.f32.mrf.mxu0  ;;  %v6723_v58 = vrot.slane %v13439_v51, %v12227_v5 }
 0x3d0   : > { %v5251_v34 = vpop.permute.xlu0 %5250  ;;  %5086 = vmatpush1.msra.mxu0 %v5044_v59  ;;  %11978 = vmatmul.mubr.msk.f32.vlgmr.msra.gmra.mxu1 %vm411_vm8, %v11976_v54 }
 0x3d1   : > { %11977 = vmatmul.mubr.msk.f32.vlgmr.msra.gmra.mxu0 %vm411_vm8, %v11976_v54  ;;  %5404 = vmatprep.mubr.f32.mxu1 %v13350_v17  ;;  %v13441_v53 = vpop.f32.mrf.mxu0  ;;  %v13443_v54 = vpop.f32.mrf.mxu1 }
 0x3d2   : > { %v5253_v60 = vpop.permute.xlu1 %5252  ;;  %5333 = vmatprep.mubr.f32.mxu0 %v13350_v17 }
 0x3d3   : > { %v5259_v61 = vsel %vm969_vm3, %v5251_v34, %v5253_v60  ;;  %v13450_v59 = vpop.f32.mrf.mxu0 }
 0x3d4   : > { %v5255_v63 = vpop.permute.xlu0 %5254  ;;  %5299 = vmatprep.subr.mxu0 %v5259_v61  ;;  %v6731_v61 = vrot.slane %v13439_v51, %v12225_v4 }
 0x3d5   : > { %v5260_v13 = vsel %vm969_vm3, %v5253_v60, %v5255_v63 }
 0x3d6   : > { %v5257_v0 = vpop.permute.xlu1 %5256 }
 0x3d7   : > { %v5261_v9 = vsel %vm969_vm3, %v5255_v63, %v5257_v0  ;;  %v13464_v0 = vld [vmem:[%s15127_s1 + $0x10] sm:$0xf] }
 0x3d8   : > { %v5249_v12 = vpop.permute.xlu0 %5248  ;;  %5370 = vmatprep.subr.mxu1 %v5261_v9  ;;  %v13466_v9 = vpop.f32.mrf.mxu0 }
 0x3d9   : > { %v5258_v19 = vsel %vm969_vm3, %v5249_v12, %v5251_v34  ;;  %5371 = vmatpush1.msra.mxu1 %v5260_v13  ;;  %v13452_v34 = vpop.f32.mrf.mxu1  ;;  %v6936_v13 = vrot.slane %v13464_v0, %v12227_v5 }
 0x3da   : > { %5300 = vmatpush1.msra.mxu0 %v5258_v19  ;;  %11982 = vmatmul.mubr.msk.f32.vlgmr.msra.gmra.mxu1 %vm411_vm8, %v11980_v55  ;;  %v5465_v1 = vpop.permute.xlu1 %5464  ;;  %v13475_v19 = vpop.f32.mrf.mxu0 }
 0x3db   : > { %11981 = vmatmul.mubr.msk.f32.vlgmr.msra.gmra.mxu0 %vm411_vm8, %v11980_v55  ;;  %5618 = vmatprep.mubr.f32.mxu1 %v13350_v17  ;;  %v6510_v55 = vrot.slane %v12001_v45, %v12227_v5  ;;  %v13470_v12 = vpop.f32.mrf.mxu1 }
 0x3dc   : > { %v5467_v36 = vpop.permute.xlu0 %5466  ;;  %5547 = vmatprep.mubr.f32.mxu0 %v13350_v17 }
 0x3dd   : > { %v5473_v14 = vsel %vm753_vm2, %v5465_v1, %v5467_v36 }
 0x3de   : > { %5513 = vmatprep.subr.mxu0 %v5473_v14  ;;  %v5469_v18 = vpop.permute.xlu1 %5468  ;;  %v6944_v14 = vrot.slane %v13464_v0, %v12225_v4 }
 0x3df   : > { %v5474_v3 = vsel %vm753_vm2, %v5467_v36, %v5469_v18  ;;  %v6518_v36 = vrot.slane %v12001_v45, %v12225_v4 }
 0x3e0   : > { %v5471_v2 = vpop.permute.xlu0 %5470 }
 0x3e1   : > { %v5475_v8 = vsel %vm753_vm2, %v5469_v18, %v5471_v2  ;;  %v13487_v18 = vld [vmem:[%s15127_s1 + $0x14] sm:$0xf]  ;;  %v13489_v2 = vpop.f32.mrf.mxu0 }
 0x3e2   : > { %5584 = vmatprep.subr.mxu1 %v5475_v8  ;;  %v5463_v11 = vpop.permute.xlu1 %5462  ;;  %15162 = vst [vmem:[#allocation9_spill] sm:$0xff] %v13487_v18 }
 0x3e3   : > { %v5472_v35 = vsel %vm753_vm2, %v5463_v11, %v5465_v1  ;;  %5585 = vmatpush1.msra.mxu1 %v5474_v3  ;;  %v13478_v1 = vpop.f32.mrf.mxu1  ;;  %v13497_v11 = vpop.f32.mrf.mxu0 }
 0x3e4   : > { %v5679_v21 = vpop.permute.xlu0 %5678  ;;  %5514 = vmatpush1.msra.mxu0 %v5472_v35  ;;  %11986 = vmatmul.mubr.msk.f32.vlgmr.msra.gmra.mxu1 %vm411_vm8, %v11984_v22  ;;  %v7157_v35 = vrot.slane %v13487_v18, %v12225_v4 }
 0x3e5   : > { %11985 = vmatmul.mubr.msk.f32.vlgmr.msra.gmra.mxu0 %vm411_vm8, %v11984_v22  ;;  %5832 = vmatprep.mubr.f32.mxu1 %v13350_v17  ;;  %v13491_v8 = vpop.f32.mrf.mxu1  ;;  %v7149_v22 = vrot.slane %v13487_v18, %v12227_v5 }
 0x3e6   : > { %v5681_v15 = vpop.permute.xlu1 %5680  ;;  %5761 = vmatprep.mubr.f32.mxu0 %v13350_v17 }
 0x3e7   : > { %v5687_v16 = vsel %vm371_vm0, %v5679_v21, %v5681_v15  ;;  %v13499_v3 = vpop.f32.mrf.mxu1 }
 0x3e8   : > { %v5683_v24 = vpop.permute.xlu0 %5682  ;;  %5727 = vmatprep.subr.mxu0 %v5687_v16 }
 0x3e9   : > { %v5688_v28 = vsel %vm371_vm0, %v5681_v15, %v5683_v24  ;;  %v13509_v15 = vpop.f32.mrf.mxu0  ;;  %v13511_v16 = vpop.f32.mrf.mxu1 }
 0x3ea   : > { %v5685_v25 = vpop.permute.xlu1 %5684 }
 0x3eb   : > { %v5689_v27 = vsel %vm371_vm0, %v5683_v24, %v5685_v25  ;;  %v13516_v25 = vpop.f32.mrf.mxu0 }
 0x3ec   : > { %v5677_v47 = vpop.permute.xlu0 %5676  ;;  %5798 = vmatprep.subr.mxu1 %v5689_v27  ;;  %v13518_v27 = vpop.f32.mrf.mxu1 }
 0x3ed   : > { %v5686_v29 = vsel %vm371_vm0, %v5677_v47, %v5679_v21  ;;  %5799 = vmatpush1.msra.mxu1 %v5688_v28  ;;  %v13507_v21 = vld [vmem:[%s15127_s1 + $0x18] sm:$0xf]  ;;  %v13526_v47 = vld [vmem:[%s15127_s1 + $0x1c] sm:$0xf]  ;;  %v13528_v28 = vpop.f32.mrf.mxu0 }
 0x3ee   : > { %5728 = vmatpush1.msra.mxu0 %v5686_v29  ;;  %11990 = vmatmul.mubr.msk.f32.vlgmr.msra.gmra.mxu1 %vm411_vm8, %v11988_v62  ;;  %v5893_v10 = vpop.permute.xlu1 %5892  ;;  %15163 = vst [vmem:[#allocation10_spill] sm:$0xff] %v13507_v21  ;;  %v7362_v24 = vrot.slane %v13507_v21, %v12227_v5  ;;  %15164 = vst [vmem:[#allocation11_spill] sm:$0xff] %v13526_v47  ;;  %v13530_v29 = vpop.f32.mrf.mxu1 }
 0x3ef   : > { %11989 = vmatmul.mubr.msk.f32.vlgmr.msra.gmra.mxu0 %vm411_vm8, %v11988_v62  ;;  %6046 = vmatprep.mubr.f32.mxu1 %v13350_v17  ;;  %v7370_v62 = vrot.slane %v13507_v21, %v12225_v4  ;;  %v651_v21 = vadd.f32 %v13428_v52, %v13407_v40 }
 0x3f0   : > { %v5895_v49 = vpop.permute.xlu0 %5894  ;;  %5975 = vmatprep.mubr.f32.mxu0 %v13350_v17 }
 0x3f1   : > { %v5901_v23 = vsel %vm329_vm1, %v5893_v10, %v5895_v49 }
 0x3f2   : > { %5941 = vmatprep.subr.mxu0 %v5901_v23  ;;  %v5897_v57 = vpop.permute.xlu1 %5896  ;;  %v13537_v23 = vpop.f32.mrf.mxu1 }
 0x3f3   : > { %v5902_v38 = vsel %vm329_vm1, %v5895_v49, %v5897_v57  ;;  %v13535_v49 = vpop.f32.mrf.mxu0 }
 0x3f4   : > { %v5899_v30 = vpop.permute.xlu0 %5898 }
 0x3f5   : > { %v5903_v31 = vsel %vm329_vm1, %v5897_v57, %v5899_v30  ;;  %v7583_v57 = vrot.slane %v13526_v47, %v12225_v4  ;;  %v13542_v30 = vpop.f32.mrf.mxu0 }
 0x3f6   : > { %6012 = vmatprep.subr.mxu1 %v5903_v31  ;;  %v5891_v37 = vpop.permute.xlu1 %5890  ;;  %v13544_v31 = vpop.f32.mrf.mxu1 }
 0x3f7   : > { %v5900_v39 = vsel %vm329_vm1, %v5891_v37, %v5893_v10  ;;  %6013 = vmatpush1.msra.mxu1 %v5902_v38  ;;  %v7575_v10 = vrot.slane %v13526_v47, %v12227_v5 }
 0x3f8   : > { %5942 = vmatpush1.msra.mxu0 %v5900_v39  ;;  %11994 = vmatmul.mubr.msk.f32.vlgmr.msra.gmra.mxu1 %vm411_vm8, %v11992_v20  ;;  %v13549_v37 = vpop.f32.mrf.mxu1 }
 0x3f9   : > { %11993 = vmatmul.mubr.msk.f32.vlgmr.msra.gmra.mxu0 %vm411_vm8, %v11992_v20  ;;  %6330 = vmatprep.mubr.f32.mxu1 %v13350_v17  ;;  %v13547_v20 = vpop.f32.mrf.mxu0 }
 0x3fa   : > { %v13414_v26 = vpop.permute.xlu1 %6106  ;;  %6259 = vmatprep.mubr.f32.mxu0 %v13350_v17  ;;  %v13553_v39 = vpop.f32.mrf.mxu1 }
 0x3fb   : > { %15158 = vst [vmem:[#allocation5_spill] sm:$0xff] %v13414_v26  ;;  %v6122_v43 = vmul.f32 %v13350_v17, %v13414_v26  ;;  %v13551_v38 = vpop.f32.mrf.mxu0 }
 0x3fc   : > { %v13557_v45 = vpop.f32.mrf.mxu1 }
 0x3fd   : > { %6342 = vrot.lane.b32.xlu1 %v6122_v43, %s12162_s30  ;;  %v13555_v43 = vpop.f32.mrf.mxu0 }
 0x401   : > { %v13432_v32 = vpop.permute.xlu0 %6060  ;;  %6525 = vrot.lane.b32.xlu1 %v6514_v48, %s12156_s11  ;;  %v13559_v48 = vpop.f32.mrf.mxu0 }
 0x402   : > { %15159 = vst [vmem:[#allocation6_spill] sm:$0xff] %v13432_v32  ;;  %v722_v32 = vadd.f32 %v13424_v46, %v13399_v33 }
 0x405   : > { %v13445_v56 = vpop.permute.xlu0 %6110  ;;  %6529 = vrot.lane.b32.xlu1 %v6522_v42, %s12156_s11  ;;  %v13561_v42 = vpop.f32.mrf.mxu1 }
 0x406   : > { %15160 = vst [vmem:[#allocation7_spill] sm:$0xff] %v13445_v56 }
 0x409   : > { %v13454_v60 = vpop.permute.xlu0 %6146  ;;  %6736 = vrot.lane.b32.xlu1 %v6723_v58, %s12157_s14  ;;  %v13563_v58 = vpop.f32.mrf.mxu0 }
 0x40a   : > { %15161 = vst [vmem:[#allocation8_spill] sm:$0xff] %v13454_v60  ;;  %v6162_v63 = vmul.f32 %v13350_v17, %v13454_v60 }
 0x40c   : > { %6174 = vrot.lane.b32.xlu0 %v6162_v63, %s12161_s29  ;;  %v13567_v63 = vpop.f32.mrf.mxu0 }
 0x40d   : > { %6740 = vrot.lane.b32.xlu1 %v6731_v61, %s12157_s14  ;;  %v13565_v61 = vpop.f32.mrf.mxu1 }
 0x410   : > { %6523 = vrot.lane.b32.xlu0 %v6510_v55, %s12156_s11 }
 0x411   : > { %6949 = vrot.lane.b32.xlu1 %v6936_v13, %s12158_s17 }
 0x414   : > { %6527 = vrot.lane.b32.xlu0 %v6518_v36, %s12156_s11 }
 0x415   : > { %6953 = vrot.lane.b32.xlu1 %v6944_v14, %s12158_s17 }
 0x419   : > { %7162 = vrot.lane.b32.xlu1 %v7149_v22, %s12159_s20 }
 0x41b   : > { %v13569_v55 = vpop.f32.mrf.mxu1  ;;  %v13571_v13 = vpop.f32.mrf.mxu0 }
 0x41d   : > { %7166 = vrot.lane.b32.xlu1 %v7157_v35, %s12159_s20  ;;  %v13573_v36 = vpop.f32.mrf.mxu1  ;;  %v13575_v14 = vpop.f32.mrf.mxu0 }
 0x421   : > { %7375 = vrot.lane.b32.xlu1 %v7362_v24, %s12160_s26 }
 0x425   : > { %7379 = vrot.lane.b32.xlu1 %v7370_v62, %s12160_s26 }
 0x429   : > { %7588 = vrot.lane.b32.xlu1 %v7575_v10, %s12161_s29 }
 0x42d   : > { %7592 = vrot.lane.b32.xlu1 %v7583_v57, %s12161_s29  ;;  %v13577_v22 = vpop.f32.mrf.mxu1  ;;  %v13579_v35 = vpop.f32.mrf.mxu0 }
 0x42f   : > { %v13581_v24 = vpop.f32.mrf.mxu1  ;;  %v13583_v62 = vpop.f32.mrf.mxu0 }
 0x437   : > { %v13587_v57 = vpop.f32.mrf.mxu0 }
 0x439   : > { %v13585_v10 = vpop.f32.mrf.mxu1  ;;  %v13591_v5 = vpop.f32.mrf.mxu0 }
 0x43a   : > { %15166 = vst [vmem:[#allocation13_spill] sm:$0xff] %v13591_v5  ;;  %v940_v5 = vadd.f32 %v13443_v54, %v722_v32 }
 0x43b   : > { %v13589_v4 = vpop.f32.mrf.mxu1 }
 0x43c   : > { %15165 = vst [vmem:[#allocation12_spill] sm:$0xff] %v13589_v4  ;;  %v724_v4 = vadd.f32 %v13430_v50, %v13410_v41  ;;  %v1156_v40 = vadd.f32 %v13470_v12, %v940_v5 }
 0x43d   : > { %v13593_v56 = vpop.f32.mrf.mxu1  ;;  %v13595_v60 = vpop.f32.mrf.mxu0 }
 0x43e   : > { %15167 = vst [vmem:[#allocation14_spill] sm:$0xff] %v13593_v56  ;;  %15168 = vst [vmem:[#allocation15_spill] sm:$0xff] %v13595_v60  ;;  %v653_v60 = vadd.f32 %v13441_v53, %v13419_v44  ;;  %v941_v46 = vadd.f32 %v13452_v34, %v724_v4  ;;  %v1371_v32 = vadd.f32 %v13491_v8, %v1156_v40 }
 0x43f   : > { %v13597_v26 = vpop.f32.mrf.mxu1  ;;  %v13601_v47 = vpop.f32.mrf.mxu0 }
 0x440   : > { %15169 = vst [vmem:[#allocation16_spill] sm:$0xff] %v13597_v26  ;;  %15170 = vst [vmem:[#allocation17_spill] sm:$0xff] %v13601_v47  ;;  %v938_v26 = vadd.f32 %v13450_v59, %v651_v21  ;;  %v939_v52 = vadd.f32 %v13466_v9, %v653_v60  ;;  %v1157_v44 = vadd.f32 %v13478_v1, %v941_v46  ;;  %v13649_v21 = vpop.permute.xlu0 %6150 }
 0x441   : > { %v13605_v18 = vpop.f32.mrf.mxu1  ;;  %v1585_v34 = vadd.f32 %v13511_v16, %v1371_v32 }
 0x442   : > { %v13612_v56 = vpop.f32.mrf.mxu0  ;;  %v1154_v41 = vadd.f32 %v13475_v19, %v938_v26  ;;  %v1155_v53 = vadd.f32 %v13489_v2, %v939_v52  ;;  %v1372_v5 = vadd.f32 %v13499_v3, %v1157_v44 }
 0x443   : > { %v13615_v33 = vpop.f32.mrf.mxu1  ;;  %v1799_v1 = vadd.f32 %v13530_v29, %v1585_v34 }
 0x444   : > { %v13620_v47 = vpop.f32.mrf.mxu0  ;;  %v1369_v4 = vadd.f32 %v13497_v11, %v1154_v41  ;;  %v1370_v26 = vadd.f32 %v13509_v15, %v1155_v53  ;;  %v1586_v19 = vadd.f32 %v13518_v27, %v1372_v5 }
 0x445   : > { %v2013_v16 = vadd.f32 %v13544_v31, %v1799_v1 }
 0x446   : > { %v1583_v9 = vadd.f32 %v13516_v25, %v1369_v4  ;;  %v1584_v2 = vadd.f32 %v13528_v28, %v1370_v26  ;;  %v1800_v15 = vadd.f32 %v13537_v23, %v1586_v19 }
 0x448   : > { %v1797_v11 = vadd.f32 %v13535_v49, %v1583_v9  ;;  %v1798_v25 = vadd.f32 %v13542_v30, %v1584_v2  ;;  %v2014_v28 = vadd.f32 %v13549_v37, %v1800_v15  ;;  %v2227_v49 = vadd.f32 %v13553_v39, %v2013_v16  ;;  %v15171_v2 = vld [vmem:[#allocation12_spill] sm:$0xff]  ;;  %v15172_v15 = vld [vmem:[#allocation14_spill] sm:$0xff] }
 0x44a   : > { %v2011_v27 = vadd.f32 %v13547_v20, %v1797_v11  ;;  %v2012_v40 = vadd.f32 %v13551_v38, %v1798_v25  ;;  %v2228_v30 = vadd.f32 %v13557_v45, %v2014_v28  ;;  %v2443_v20 = vadd.f32 %v13561_v42, %v2227_v49 }
 0x44b   : > { %v13623_v50 = vpop.f32.mrf.mxu1  ;;  %v13628_v54 = vpop.f32.mrf.mxu0  ;;  %v6727_v45 = vrot.slane %v13439_v51, %v12231_v7 }
 0x44c   : > { %v2225_v23 = vadd.f32 %v13555_v43, %v2011_v27  ;;  %v2226_v44 = vadd.f32 %v13559_v48, %v2012_v40  ;;  %v2444_v43 = vadd.f32 %v13565_v61, %v2228_v30  ;;  %v2658_v4 = vadd.f32 %v13569_v55, %v2443_v20  ;;  %v15174_v27 = vld [vmem:[#allocation15_spill] sm:$0xff]  ;;  %v15176_v30 = vld [vmem:[#allocation9_spill] sm:$0xff] }
 0x44d   : > { %v13631_v59 = vpop.f32.mrf.mxu1  ;;  %v13636_v60 = vpop.f32.mrf.mxu0  ;;  %v6735_v61 = vrot.slane %v13439_v51, %v12229_v6  ;;  %v7153_v20 = vrot.slane %v15176_v30, %v12231_v7 }
 0x44e   : > { %v2441_v39 = vadd.f32 %v13563_v58, %v2225_v23  ;;  %v2442_v48 = vadd.f32 %v13567_v63, %v2226_v44  ;;  %v2659_v58 = vadd.f32 %v13573_v36, %v2444_v43  ;;  %v2874_v34 = vadd.f32 %v13577_v22, %v2658_v4  ;;  %v15177_v44 = vld [vmem:[#allocation17_spill] sm:$0xff] }
 0x44f   : > { %v6940_v36 = vrot.slane %v13464_v0, %v12231_v7 }
 0x450   : > { %v2656_v5 = vadd.f32 %v13571_v13, %v2441_v39  ;;  %v2657_v55 = vadd.f32 %v13575_v14, %v2442_v48  ;;  %v2875_v13 = vadd.f32 %v13581_v24, %v2659_v58  ;;  %v3090_v19 = vadd.f32 %v13585_v10, %v2874_v34  ;;  %v15173_v10 = vld [vmem:[#allocation13_spill] sm:$0xff] }
 0x451   : > { %v6948_v24 = vrot.slane %v13464_v0, %v12229_v6 }
 0x452   : > { %v2872_v63 = vadd.f32 %v13579_v35, %v2656_v5  ;;  %v2873_v22 = vadd.f32 %v13583_v62, %v2657_v55  ;;  %v3091_v11 = vadd.f32 %v15171_v2, %v2875_v13  ;;  %v3268_v35 = vadd.f32 %v15172_v15, %v3090_v19  ;;  %v15175_v62 = vld [vmem:[#allocation16_spill] sm:$0xff] }
 0x454   : > { %v13639_v12 = vpop.f32.mrf.mxu1  ;;  %v3088_v51 = vadd.f32 %v13587_v57, %v2872_v63  ;;  %v3089_v16 = vadd.f32 %v15173_v10, %v2873_v22  ;;  %v3269_v40 = vadd.f32 %v15175_v62, %v3091_v11  ;;  %v3487_v57 = vadd.f32 %v13605_v18, %v3268_v35 }
 0x455   : > { %v13644_v8 = vpop.f32.mrf.mxu0  ;;  %v7161_v18 = vrot.slane %v15176_v30, %v12229_v6 }
 0x456   : > { %v13647_v3 = vpop.f32.mrf.mxu1  ;;  %v3266_v28 = vadd.f32 %v15174_v27, %v3088_v51  ;;  %v3488_v43 = vadd.f32 %v13615_v33, %v3269_v40  ;;  %v3701_v4 = vadd.f32 %v13623_v50, %v3487_v57  ;;  %v15178_v33 = vld [vmem:[#allocation10_spill] sm:$0xff] }
 0x457   : > { %v13654_v46 = vpop.f32.mrf.mxu0  ;;  %v7366_v50 = vrot.slane %v15178_v33, %v12231_v7 }
 0x458   : > { %v3485_v0 = vadd.f32 %v13612_v56, %v3266_v28  ;;  %v3915_v56 = vadd.f32 %v13639_v12, %v3701_v4 }
 0x45a   : > { %v3699_v34 = vadd.f32 %v13628_v54, %v3485_v0 }
 0x45c   : > { %v3913_v19 = vadd.f32 %v13644_v8, %v3699_v34 }
 0x45e   : > { %v13657_v29 = vpop.f32.mrf.mxu1 }
 0x45f   : > { %v13664_v41 = vpop.f32.mrf.mxu0  ;;  %v4129_v54 = vadd.f32 %v13657_v29, %v3915_v56 }
 0x460   : > { %v13667_v31 = vpop.f32.mrf.mxu1  ;;  %v4127_v51 = vadd.f32 %v13664_v41, %v3913_v19 }
 0x461   : > { %v13674_v37 = vpop.f32.mrf.mxu0 }
 0x468   : > { %v13679_v53 = vpop.f32.mrf.mxu1 }
 0x469   : > { %v13687_v42 = vpop.f32.mrf.mxu0  ;;  %v4343_v8 = vadd.f32 %v13679_v53, %v4129_v54 }
 0x46b   : > { %v13698_v26 = vpop.f32.mrf.mxu0 }
 0x473   : > { %v4479_v1 = vpop.f32.mrf.mxu0 }
 0x475   : > { %v4481_v25 = vpop.f32.mrf.mxu0 }
 0x47d   : > { %v4693_v23 = vpop.f32.mrf.mxu0 }
 0x47e   : > { %v13662_v52 = vpop.permute.xlu0 %6174 }
 0x482   : > { %v13672_v32 = vpop.permute.xlu0 %6523 }
 0x483   : > { %v6539_v38 = vmul.f32 %v13350_v17, %v13672_v32  ;;  %v13690_v17 = vpop.f32.mrf.mxu1 }
 0x485   : > { %6551 = vrot.lane.b32.xlu0 %v6539_v38, %s12160_s26  ;;  %v4550_v9 = vpop.f32.mrf.mxu1  ;;  %v3267_v38 = vadd.f32 %v15177_v44, %v3089_v16 }
 0x486   : > { %v4557_v16 = vadd.f32 %v4550_v9, %v4343_v8 }
 0x487   : > { %v4552_v14 = vpop.f32.mrf.mxu1  ;;  %v3486_v48 = vadd.f32 %v13620_v47, %v3267_v38 }
 0x489   : > { %6738 = vrot.lane.b32.xlu0 %v6727_v45, %s12157_s14  ;;  %v4764_v49 = vpop.f32.mrf.mxu1  ;;  %v4695_v45 = vpop.f32.mrf.mxu0  ;;  %v3700_v55 = vadd.f32 %v13636_v60, %v3486_v48 }
 0x48a   : > { %v4771_v57 = vadd.f32 %v4764_v49, %v4557_v16 }
 0x48b   : > { %v4766_v39 = vpop.f32.mrf.mxu1  ;;  %v4907_v58 = vpop.f32.mrf.mxu0  ;;  %v3914_v12 = vadd.f32 %v13654_v46, %v3700_v55  ;;  %v4341_v46 = vadd.f32 %v13687_v42, %v4127_v51 }
 0x48d   : > { %6742 = vrot.lane.b32.xlu0 %v6735_v61, %s12157_s14  ;;  %v4978_v5 = vpop.f32.mrf.mxu1  ;;  %v3702_v61 = vadd.f32 %v13631_v59, %v3488_v43  ;;  %v4909_v13 = vpop.f32.mrf.mxu0  ;;  %v7374_v59 = vrot.slane %v15178_v33, %v12229_v6  ;;  %v4128_v15 = vadd.f32 %v13674_v37, %v3914_v12  ;;  %v4555_v28 = vadd.f32 %v4479_v1, %v4341_v46 }
 0x48e   : > { %v4985_v42 = vadd.f32 %v4978_v5, %v4771_v57 }
 0x48f   : > { %v4980_v63 = vpop.f32.mrf.mxu1  ;;  %v4769_v44 = vadd.f32 %v4693_v23, %v4555_v28 }
 0x491   : > { %6951 = vrot.lane.b32.xlu0 %v6940_v36, %s12158_s17  ;;  %v5192_v47 = vpop.f32.mrf.mxu1  ;;  %v3916_v36 = vadd.f32 %v13647_v3, %v3702_v61  ;;  %v5121_v22 = vpop.f32.mrf.mxu0  ;;  %v15179_v3 = vld [vmem:[#allocation11_spill] sm:$0xff] }
 0x492   : > { %v7579_v29 = vrot.slane %v15179_v3, %v12231_v7  ;;  %v5199_v4 = vadd.f32 %v5192_v47, %v4985_v42 }
 0x493   : > { %v5194_v60 = vpop.f32.mrf.mxu1  ;;  %v4130_v2 = vadd.f32 %v13667_v31, %v3916_v36  ;;  %v5123_v11 = vpop.f32.mrf.mxu0  ;;  %v4342_v31 = vadd.f32 %v13698_v26, %v4128_v15 }
 0x495   : > { %6955 = vrot.lane.b32.xlu0 %v6948_v24, %s12158_s17  ;;  %v13749_v24 = vpop.permute.xlu1 %6108  ;;  %v4344_v41 = vadd.f32 %v13690_v17, %v4130_v2  ;;  %v4983_v17 = vadd.f32 %v4907_v58, %v4769_v44 }
 0x497   : > { %v4558_v37 = vadd.f32 %v4552_v14, %v4344_v41  ;;  %v5197_v48 = vadd.f32 %v5121_v22, %v4983_v17  ;;  %v15183_v17 = vld [vmem:[#allocation7_spill] sm:$0xff] }
 0x499   : > { %7164 = vrot.lane.b32.xlu0 %v7153_v20, %s12159_s20  ;;  %v13755_v40 = vpop.permute.xlu1 %6112  ;;  %v4556_v20 = vadd.f32 %v4481_v25, %v4342_v31  ;;  %v4772_v38 = vadd.f32 %v4766_v39, %v4558_v37  ;;  %v15181_v31 = vld [vmem:[#allocation5_spill] sm:$0xff] }
 0x49a   : > { %v5406_v35 = vpop.f32.mrf.mxu1 }
 0x49b   : > { %v5335_v10 = vpop.f32.mrf.mxu0  ;;  %v4770_v0 = vadd.f32 %v4695_v45, %v4556_v20  ;;  %v4986_v43 = vadd.f32 %v4980_v63, %v4772_v38  ;;  %v5413_v56 = vadd.f32 %v5406_v35, %v5199_v4 }
 0x49c   : > { %v5408_v53 = vpop.f32.mrf.mxu1  ;;  %v5411_v33 = vadd.f32 %v5335_v10, %v5197_v48 }
 0x49d   : > { %7168 = vrot.lane.b32.xlu0 %v7161_v18, %s12159_s20  ;;  %v5337_v27 = vpop.f32.mrf.mxu0  ;;  %v4984_v26 = vadd.f32 %v4909_v13, %v4770_v0  ;;  %v13757_v1 = vpop.permute.xlu1 %6148  ;;  %v5200_v61 = vadd.f32 %v5194_v60, %v4986_v43  ;;  %v15180_v60 = vld [vmem:[#allocation6_spill] sm:$0xff] }
 0x49f   : > { %v5198_v49 = vadd.f32 %v5123_v11, %v4984_v26  ;;  %v5414_v25 = vadd.f32 %v5408_v53, %v5200_v61  ;;  %v6114_v53 = vsel %vm329_vm1, %v15181_v31, %v13749_v24  ;;  %v6528_v26 = vpop.permute.xlu0 %6527 }
 0x4a1   : > { %7377 = vrot.lane.b32.xlu0 %v7366_v50, %s12160_s26  ;;  %v5412_v39 = vadd.f32 %v5337_v27, %v5198_v49  ;;  %v6153_v58 = vpop.permute.xlu1 %6152 }
 0x4a2   : > { %v6156_v43 = vsel %vm371_vm0, %v13649_v21, %v6153_v58 }
 0x4a4   : > { %v5620_v62 = vpop.f32.mrf.mxu1 }
 0x4a5   : > { %7381 = vrot.lane.b32.xlu0 %v7374_v59, %s12160_s26  ;;  %v5549_v30 = vpop.f32.mrf.mxu0  ;;  %v5627_v23 = vadd.f32 %v5620_v62, %v5413_v56  ;;  %v13761_v35 = vpop.permute.xlu1 %6342  ;;  %v15182_v62 = vld [vmem:[#allocation8_spill] sm:$0xff] }
 0x4a6   : > { %v5622_v9 = vpop.f32.mrf.mxu1  ;;  %v5625_v5 = vadd.f32 %v5549_v30, %v5411_v33  ;;  %v6154_v37 = vsel %vm371_vm0, %v15182_v62, %v13757_v1 }
 0x4a7   : > { %v5551_v18 = vpop.f32.mrf.mxu0  ;;  %v5628_v50 = vadd.f32 %v5622_v9, %v5414_v25  ;;  %v6116_v9 = vsel %vm329_vm1, %v15183_v17, %v13755_v40 }
 0x4a8   : > { %v5626_v19 = vadd.f32 %v5551_v18, %v5412_v39  ;;  %v12025_v39 = vld [vmem:[%s15127_s1 + $0x20] sm:$0xf] }
 0x4a9   : > { %7590 = vrot.lane.b32.xlu0 %v7579_v29, %s12161_s29  ;;  %v6526_v0 = vpop.permute.xlu1 %6525 }
 0x4aa   : > { %v6531_v61 = vsel %vm753_vm2, %v13672_v32, %v6526_v0 }
 0x4ad   : > { %v6530_v48 = vpop.permute.xlu1 %6529 }
 0x4ae   : > { %v5834_v34 = vpop.f32.mrf.mxu1  ;;  %v6533_v49 = vsel %vm753_vm2, %v6528_v26, %v6530_v48 }
 0x4af   : > { %v5763_v14 = vpop.f32.mrf.mxu0  ;;  %v5841_v55 = vadd.f32 %v5834_v34, %v5627_v23  ;;  %v6155_v34 = vsel %vm371_vm0, %v13757_v1, %v13649_v21  ;;  %v6532_v23 = vsel %vm753_vm2, %v6526_v0, %v6528_v26  ;;  %v6115_v21 = vsel %vm329_vm1, %v13749_v24, %v15183_v17  ;;  %v12053_v17 = vld [vmem:[%s15127_s1 + $0x3c] sm:$0xf] }
 0x4b0   : > { %v5836_v45 = vpop.f32.mrf.mxu1  ;;  %v5839_v13 = vadd.f32 %v5763_v14, %v5625_v5  ;;  %v7587_v24 = vrot.slane %v15179_v3, %v12229_v6  ;;  %v7800_v3 = vrot.slane %v12025_v39, %v12229_v6  ;;  %v9252_v26 = vrot.slane %v12053_v17, %v12231_v7 }
 0x4b1   : > { %v5765_v63 = vpop.f32.mrf.mxu0  ;;  %v5842_v36 = vadd.f32 %v5836_v45, %v5628_v50 }
 0x4b2   : > { %v5840_v59 = vadd.f32 %v5765_v63, %v5626_v19  ;;  %v15185_v63 = vld [vmem:[#allocation3_spill] sm:$0xff] }
 0x4b3   : > { %v7796_v19 = vrot.slane %v12025_v39, %v15185_v63 }
 0x4b8   : > { %v6048_v47 = vpop.f32.mrf.mxu1 }
 0x4b9   : > { %v6055_v54 = vadd.f32 %v6048_v47, %v5841_v55  ;;  %v5977_v22 = vpop.f32.mrf.mxu0  ;;  %v7792_v55 = vrot.slane %v12025_v39, %v12231_v7 }
 0x4ba   : > { %v6053_v12 = vadd.f32 %v5977_v22, %v5839_v13  ;;  %v6050_v51 = vpop.f32.mrf.mxu1 }
 0x4bb   : > { %v6065_v2 = vadd.f32 %v15180_v60, %v6055_v54  ;;  %v6056_v8 = vadd.f32 %v6050_v51, %v5842_v36  ;;  %v5979_v11 = vpop.f32.mrf.mxu0  ;;  %v12033_v54 = vld [vmem:[%s15127_s1 + $0x28] sm:$0xf] }
 0x4bc   : > { %v6063_v29 = vadd.f32 %v15180_v60, %v6053_v12  ;;  %v6054_v15 = vadd.f32 %v5979_v11, %v5840_v59  ;;  %v8218_v12 = vrot.slane %v12033_v54, %v12231_v7  ;;  %v8222_v51 = vrot.slane %v12033_v54, %v15185_v63 }
 0x4bd   : > { %vm6069_vm10 = vcmp.ge.f32.partialorder %v6065_v2, 0.0  ;;  %v6073_v10 = vmul.f32 0.01, %v6065_v2  ;;  %v6066_v46 = vadd.f32 %v15180_v60, %v6056_v8 }
 0x4be   : > { %vm6067_vm11 = vcmp.ge.f32.partialorder %v6063_v29, 0.0  ;;  %v6071_v41 = vmul.f32 0.01, %v6063_v29  ;;  %v6064_v16 = vadd.f32 %v15180_v60, %v6054_v15  ;;  %v12037_v60 = vld [vmem:[%s15127_s1 + $0x2c] sm:$0xf] }
 0x4bf   : > { %v13768_v27 = vsel %vm6069_vm10, %v6065_v2, %v6073_v10  ;;  %vm6070_vm14 = vcmp.ge.f32.partialorder %v6066_v46, 0.0  ;;  %v6074_v28 = vmul.f32 0.01, %v6066_v46  ;;  %v8226_v2 = vrot.slane %v12033_v54, %v12229_v6  ;;  %v12041_v15 = vld [vmem:[%s15127_s1 + $0x30] sm:$0xf] }
 0x4c0   : > { %6081 = vst [vmem:[#allocation2] sm:$0xff] %v13768_v27  ;;  %v13774_v57 = vsel %vm6067_vm11, %v6063_v29, %v6071_v41  ;;  %vm6068_vm15 = vcmp.ge.f32.partialorder %v6064_v16, 0.0  ;;  %v6072_v30 = vmul.f32 0.01, %v6064_v16  ;;  %v6125_v4 = vmul.f32 %v6116_v9, %v13768_v27 }
 0x4c1   : > { %6079 = vst [vmem:[#allocation2 + $0x10] sm:$0xff] %v13774_v57  ;;  %v13777_v20 = vsel %vm6070_vm14, %v6066_v46, %v6074_v28  ;;  %v6123_v44 = vmul.f32 %v6114_v53, %v13774_v57  ;;  %v6163_v38 = vmul.f32 %v6154_v37, %v13774_v57  ;;  %v6165_v18 = vmul.f32 %v6156_v43, %v13768_v27  ;;  %v12049_v28 = vld [vmem:[%s15127_s1 + $0x38] sm:$0xf] }
 0x4c2   : > { %6082 = vst [vmem:[#allocation2 + $0x18] sm:$0xff] %v13777_v20  ;;  %v13782_v42 = vsel %vm6068_vm15, %v6064_v16, %v6072_v30  ;;  %v6540_v14 = vmul.f32 %v6531_v61, %v13774_v57  ;;  %v6542_v33 = vmul.f32 %v6533_v49, %v13768_v27  ;;  %v6166_v25 = vmul.f32 %v6153_v58, %v13777_v20  ;;  %v15184_v58 = vld [vmem:[#allocation4_spill] sm:$0xff]  ;;  %v13875_v16 = vpop.permute.xlu1 %6736 }
 0x4c3   : > { %6080 = vst [vmem:[#allocation2 + $0x8] sm:$0xff] %v13782_v42  ;;  %6344 = vrot.lane.b32.xlu0 %v6123_v44, %s12162_s30  ;;  %6176 = vrot.lane.b32.xlu1 %v6163_v38, %s12161_s29  ;;  %v6164_v56 = vmul.f32 %v6155_v34, %v13782_v42  ;;  %v6541_v32 = vmul.f32 %v6532_v23, %v13782_v42  ;;  %v12057_v34 = vld [vmem:[%s15127_s1 + $0x40] sm:$0xf]  ;;  %vm15186_vm10 = vcmask 973824   ;;  %vm15189_vm15 = vcmask 1039360  }
 0x4c4   : > { %v6124_v1 = vmul.f32 %v6115_v21, %v13782_v42  ;;  %v6543_v5 = vmul.f32 %v6530_v48, %v13777_v20  ;;  %v6126_v45 = vmul.f32 %v13755_v40, %v13777_v20  ;;  %v7788_v50 = vrot.slane %v12025_v39, %v15184_v58  ;;  %v12029_v40 = vld [vmem:[%s15127_s1 + $0x24] sm:$0xf]  ;;  %vm15187_vm11 = vmmov %vm15186_vm10 }
 0x4c5   : > { %v8001_v13 = vrot.slane %v12029_v40, %v15184_v58  ;;  %v8005_v47 = vrot.slane %v12029_v40, %v12231_v7  ;;  %v8009_v36 = vrot.slane %v12029_v40, %v15185_v63  ;;  %v8013_v22 = vrot.slane %v12029_v40, %v12229_v6  ;;  %vm15188_vm14 = vmmov %vm15186_vm10 }
 0x4c6   : > { %v8214_v59 = vrot.slane %v12033_v54, %v15184_v58  ;;  %v8427_v8 = vrot.slane %v12037_v60, %v15184_v58  ;;  %v8431_v11 = vrot.slane %v12037_v60, %v12231_v7  ;;  %v8435_v29 = vrot.slane %v12037_v60, %v15185_v63  ;;  %v6741_v44 = vpop.permute.xlu1 %6740 }
 0x4c7   : > { %6348 = vrot.lane.b32.xlu0 %v6125_v4, %s12162_s30  ;;  %6180 = vrot.lane.b32.xlu1 %v6165_v18, %s12161_s29  ;;  %v8439_v10 = vrot.slane %v12037_v60, %v12229_v6  ;;  %v8640_v46 = vrot.slane %v12041_v15, %v15184_v58  ;;  %v8644_v31 = vrot.slane %v12041_v15, %v12231_v7 }
 0x4c8   : > { %v8648_v53 = vrot.slane %v12041_v15, %v15185_v63  ;;  %v8652_v62 = vrot.slane %v12041_v15, %v12229_v6  ;;  %v9035_v37 = vrot.slane %v12049_v28, %v15184_v58  ;;  %v9039_v38 = vrot.slane %v12049_v28, %v12231_v7 }
 0x4c9   : > { %v9043_v0 = vrot.slane %v12049_v28, %v15185_v63  ;;  %v9047_v4 = vrot.slane %v12049_v28, %v12229_v6  ;;  %v9248_v18 = vrot.slane %v12053_v17, %v15184_v58  ;;  %v9256_v48 = vrot.slane %v12053_v17, %v15185_v63 }
 0x4ca   : > { %v13897_v43 = vpop.permute.xlu1 %6949  ;;  %v9461_v49 = vrot.slane %v12057_v34, %v15184_v58  ;;  %v9465_v23 = vrot.slane %v12057_v34, %v12231_v7  ;;  %v9469_v21 = vrot.slane %v12057_v34, %v15185_v63 }
 0x4cb   : > { %6178 = vrot.lane.b32.xlu0 %v6164_v56, %s12161_s29  ;;  %6553 = vrot.lane.b32.xlu1 %v6540_v14, %s12160_s26  ;;  %v9260_v14 = vrot.slane %v12053_v17, %v12229_v6 }
 0x4ce   : > { %v13912_v56 = vpop.permute.xlu1 %6953 }
 0x4cf   : > { %6182 = vrot.lane.b32.xlu0 %v6166_v25, %s12161_s29  ;;  %6557 = vrot.lane.b32.xlu1 %v6542_v33, %s12160_s26 }
 0x4d2   : > { %v13920_v25 = vpop.permute.xlu1 %7162 }
 0x4d3   : > { %6555 = vrot.lane.b32.xlu0 %v6541_v32, %s12160_s26  ;;  %6346 = vrot.lane.b32.xlu1 %v6124_v1, %s12162_s30  ;;  %v12061_v32 = vld [vmem:[%s15127_s1 + $0x44] sm:$0xf]  ;;  %v9473_v1 = vrot.slane %v12057_v34, %v12229_v6 }
 0x4d4   : > { %v9674_v39 = vrot.slane %v12061_v32, %v15184_v58 }
 0x4d7   : > { %6559 = vrot.lane.b32.xlu0 %v6543_v5, %s12160_s26  ;;  %6350 = vrot.lane.b32.xlu1 %v6126_v45, %s12162_s30  ;;  %v13935_v45 = vpop.permute.xlu1 %7166 }
 0x4db   : > { %7594 = vrot.lane.b32.xlu0 %v7587_v24, %s12161_s29  ;;  %7801 = vrot.lane.b32.xlu1 %v7788_v50, %s12162_s30  ;;  %v9678_v24 = vrot.slane %v12061_v32, %v12231_v7  ;;  %v9682_v50 = vrot.slane %v12061_v32, %v15185_v63  ;;  %v13946_v40 = vpop.permute.xlu1 %7375 }
 0x4df   : > { %7803 = vrot.lane.b32.xlu0 %v7792_v55, %s12162_s30  ;;  %7805 = vrot.lane.b32.xlu1 %v7796_v19, %s12162_s30  ;;  %v12065_v55 = vld [vmem:[%s15127_s1 + $0x48] sm:$0xf] }
 0x4e3   : > { %7807 = vrot.lane.b32.xlu0 %v7800_v3, %s12162_s30  ;;  %8014 = vrot.lane.b32.xlu1 %v8001_v13, %s12163_s18  ;;  %v9686_v3 = vrot.slane %v12061_v32, %v12229_v6  ;;  %v9887_v13 = vrot.slane %v12065_v55, %v15184_v58  ;;  %v12073_v32 = vld [vmem:[%s15127_s1 + $0x50] sm:$0xf] }
 0x4e7   : > { %8016 = vrot.lane.b32.xlu0 %v8005_v47, %s12163_s18  ;;  %8018 = vrot.lane.b32.xlu1 %v8009_v36, %s12163_s18  ;;  %v9891_v47 = vrot.slane %v12065_v55, %v12231_v7  ;;  %v9895_v36 = vrot.slane %v12065_v55, %v15185_v63 }
 0x4eb   : > { %8020 = vrot.lane.b32.xlu0 %v8013_v22, %s12163_s18  ;;  %8227 = vrot.lane.b32.xlu1 %v8214_v59, %s12165_s7  ;;  %v13958_v22 = vpop.permute.xlu1 %7379 }
 0x4ef   : > { %8229 = vrot.lane.b32.xlu0 %v8218_v12, %s12165_s7  ;;  %8231 = vrot.lane.b32.xlu1 %v8222_v51, %s12165_s7  ;;  %v9899_v12 = vrot.slane %v12065_v55, %v12229_v6 }
 0x4f3   : > { %8233 = vrot.lane.b32.xlu0 %v8226_v2, %s12165_s7  ;;  %8440 = vrot.lane.b32.xlu1 %v8427_v8, %s12166_s12 }
 0x4f7   : > { %8442 = vrot.lane.b32.xlu0 %v8431_v11, %s12166_s12  ;;  %8444 = vrot.lane.b32.xlu1 %v8435_v29, %s12166_s12  ;;  %v13873_v41 = vpop.permute.xlu0 %6551  ;;  %v13971_v11 = vpop.permute.xlu1 %7588 }
 0x4fb   : > { %8446 = vrot.lane.b32.xlu0 %v8439_v10, %s12166_s12  ;;  %8653 = vrot.lane.b32.xlu1 %v8640_v46, %s12167_s16  ;;  %v6739_v30 = vpop.permute.xlu0 %6738  ;;  %v12069_v10 = vld [vmem:[%s15127_s1 + $0x4c] sm:$0xf] }
 0x4fc   : > { %v6744_v59 = vsel %vm969_vm3, %v13875_v16, %v6739_v30  ;;  %v6745_v60 = vsel %vm969_vm3, %v6739_v30, %v6741_v44  ;;  %v13982_v46 = vld [vmem:[#allocation2 + $0x28] sm:$0xff]  ;;  %v10100_v30 = vrot.slane %v12069_v10, %v15184_v58 }
 0x4fd   : > { %v6753_v51 = vmul.f32 %v6744_v59, %v13774_v57  ;;  %v6754_v29 = vmul.f32 %v6745_v60, %v13782_v42  ;;  %v10317_v59 = vrot.slane %v12073_v32, %v12231_v7 }
 0x4ff   : > { %8655 = vrot.lane.b32.xlu0 %v8644_v31, %s12167_s16  ;;  %8657 = vrot.lane.b32.xlu1 %v8648_v53, %s12167_s16  ;;  %v13895_v9 = vpop.permute.xlu0 %6742  ;;  %v6752_v31 = vmul.f32 %v13982_v46, %v13875_v16  ;;  %v10112_v16 = vrot.slane %v12069_v10, %v12229_v6 }
 0x500   : > { %v6746_v2 = vsel %vm969_vm3, %v6741_v44, %v13895_v9  ;;  %v6756_v53 = vmul.f32 %v13895_v9, %v13777_v20 }
 0x501   : > { %v6755_v15 = vmul.f32 %v6746_v2, %v13768_v27 }
 0x503   : > { %8659 = vrot.lane.b32.xlu0 %v8652_v62, %s12167_s16  ;;  %9048 = vrot.lane.b32.xlu1 %v9035_v37, %s12168_s27  ;;  %v13910_v61 = vpop.permute.xlu0 %6951  ;;  %v13990_v62 = vpop.permute.xlu1 %7592  ;;  %v10104_v37 = vrot.slane %v12069_v10, %v12231_v7 }
 0x507   : > { %9050 = vrot.lane.b32.xlu0 %v9039_v38, %s12168_s27  ;;  %9052 = vrot.lane.b32.xlu1 %v9043_v0, %s12168_s27  ;;  %v13918_v33 = vpop.permute.xlu0 %6955  ;;  %v10108_v0 = vrot.slane %v12069_v10, %v15185_v63  ;;  %v10325_v10 = vrot.slane %v12073_v32, %v12229_v6 }
 0x50b   : > { %9054 = vrot.lane.b32.xlu0 %v9047_v4, %s12168_s27  ;;  %9261 = vrot.lane.b32.xlu1 %v9248_v18, %s12169_s10  ;;  %v13933_v5 = vpop.permute.xlu0 %7164  ;;  %v6957_v4 = vsel %vm1185_vm4, %v13897_v43, %v13910_v61  ;;  %v6958_v18 = vsel %vm1185_vm4, %v13910_v61, %v13912_v56  ;;  %v11996_v61 = vld [vmem:[%s15130_s4 + $0x8] sm:$0xff] }
 0x50f   : > { %9263 = vrot.lane.b32.xlu0 %v9252_v26, %s12169_s10  ;;  %9265 = vrot.lane.b32.xlu1 %v9256_v48, %s12169_s10  ;;  %v13944_v19 = vpop.permute.xlu0 %7168  ;;  %v6966_v26 = vmul.f32 %v6957_v4, %v13774_v57  ;;  %v6967_v48 = vmul.f32 %v6958_v18, %v13782_v42 }
 0x510   : > { %v7182_v18 = vmul.f32 %v13944_v19, %v13777_v20 }
 0x513   : > { %9267 = vrot.lane.b32.xlu0 %v9260_v14, %s12169_s10  ;;  %9474 = vrot.lane.b32.xlu1 %v9461_v49, %s12170_s19  ;;  %v13956_v54 = vpop.permute.xlu0 %7377  ;;  %v6959_v49 = vsel %vm1185_vm4, %v13912_v56, %v13918_v33 }
 0x514   : > { %v6968_v56 = vmul.f32 %v6959_v49, %v13768_v27 }
 0x517   : > { %9476 = vrot.lane.b32.xlu0 %v9465_v23, %s12170_s19  ;;  %9478 = vrot.lane.b32.xlu1 %v9469_v21, %s12170_s19  ;;  %v13969_v8 = vpop.permute.xlu0 %7381 }
 0x51b   : > { %9480 = vrot.lane.b32.xlu0 %v9473_v1, %s12170_s19  ;;  %9687 = vrot.lane.b32.xlu1 %v9674_v39, %s12164_s24  ;;  %v13988_v28 = vpop.permute.xlu0 %7590  ;;  %v6969_v1 = vmul.f32 %v13918_v33, %v13777_v20  ;;  %v6965_v33 = vmul.f32 %v13982_v46, %v13897_v43 }
 0x51f   : > { %9689 = vrot.lane.b32.xlu0 %v9678_v24, %s12164_s24  ;;  %9691 = vrot.lane.b32.xlu1 %v9682_v50, %s12164_s24 }
 0x523   : > { %9693 = vrot.lane.b32.xlu0 %v9686_v3, %s12164_s24  ;;  %9900 = vrot.lane.b32.xlu1 %v9887_v13, %s12154_s25 }
 0x527   : > { %9902 = vrot.lane.b32.xlu0 %v9891_v47, %s12154_s25  ;;  %9904 = vrot.lane.b32.xlu1 %v9895_v36, %s12154_s25  ;;  %v6127_v36 = vld [vmem:[%s15130_s4] sm:$0xff] }
 0x52b   : > { %9906 = vrot.lane.b32.xlu0 %v9899_v12, %s12154_s25  ;;  %6766 = vrot.lane.b32.xlu1 %v6753_v51, %s12159_s20  ;;  %v10321_v12 = vrot.slane %v12073_v32, %v15185_v63 }
 0x52f   : > { %6770 = vrot.lane.b32.xlu1 %v6755_v15, %s12159_s20  ;;  %6768 = vrot.lane.b32.xlu0 %v6754_v29, %s12159_s20 }
 0x533   : > { %6764 = vrot.lane.b32.xlu1 %v6752_v31, %s12159_s20  ;;  %6772 = vrot.lane.b32.xlu0 %v6756_v53, %s12159_s20 }
 0x535   : > { %v6345_v44 = vpop.permute.xlu0 %6344  ;;  %v6177_v38 = vpop.permute.xlu1 %6176 }
 0x536   : > { %v6184_v21 = vsel %vm402_vm7, %v13662_v52, %v6177_v38  ;;  %v10313_v52 = vrot.slane %v12073_v32, %v15184_v58  ;;  %v6352_v43 = vsel %vm572_vm9, %v13761_v35, %v6345_v44  ;;  %v7170_v35 = vsel %vm1000_vm5, %v13920_v25, %v13933_v5 }
 0x537   : > { %10115 = vrot.lane.b32.xlu1 %v10104_v37, %s12155_s8  ;;  %10113 = vrot.lane.b32.xlu0 %v10100_v30, %s12155_s8  ;;  %v12002_v30 = vld [vmem:[%s15130_s4 + $0x10] sm:$0xff] }
 0x539   : > { %v6349_v17 = vpop.permute.xlu0 %6348  ;;  %v6181_v9 = vpop.permute.xlu1 %6180 }
 0x53b   : > { %10119 = vrot.lane.b32.xlu1 %v10112_v16, %s12155_s8  ;;  %10117 = vrot.lane.b32.xlu0 %v10108_v0, %s12155_s8  ;;  %v7172_v0 = vsel %vm1000_vm5, %v13935_v45, %v13944_v19 }
 0x53c   : > { %v7181_v4 = vmul.f32 %v7172_v0, %v13768_v27 }
 0x53d   : > { %v6179_v34 = vpop.permute.xlu0 %6178  ;;  %v6554_v14 = vpop.permute.xlu1 %6553 }
 0x53e   : > { %v6185_v23 = vsel %vm402_vm7, %v6177_v38, %v6179_v34  ;;  %v6186_v55 = vsel %vm402_vm7, %v6179_v34, %v6181_v9  ;;  %v6561_v29 = vsel %vm784_vm6, %v13873_v41, %v6554_v14  ;;  %v7171_v38 = vsel %vm1000_vm5, %v13933_v5, %v13935_v45  ;;  %v12077_v45 = vld [vmem:[%s15127_s1 + $0x54] sm:$0xf] }
 0x53f   : > { %6979 = vrot.lane.b32.xlu0 %v6966_v26, %s12158_s17  ;;  %6981 = vrot.lane.b32.xlu1 %v6967_v48, %s12158_s17  ;;  %v7178_v34 = vmul.f32 %v13982_v46, %v13920_v25  ;;  %v10530_v49 = vrot.slane %v12077_v45, %v12231_v7  ;;  %v10534_v19 = vrot.slane %v12077_v45, %v15185_v63 }
 0x540   : > { %6225 = vmatprep.subr.mxu0 %v6185_v23  ;;  %v10538_v25 = vrot.slane %v12077_v45, %v12229_v6 }
 0x541   : > { %6226 = vmatpush1.msra.mxu0 %v6184_v21  ;;  %v6183_v39 = vpop.permute.xlu0 %6182  ;;  %v6558_v24 = vpop.permute.xlu1 %6557 }
 0x542   : > { %v6187_v50 = vsel %vm402_vm7, %v6181_v9, %v6183_v39  ;;  %11997 = vmatmul.mubr.msk.f32.vlgmr.msra.gmra.mxu0 %vm411_vm8, %v11996_v61 }
 0x543   : > { %6983 = vrot.lane.b32.xlu0 %v6968_v56, %s12158_s17  ;;  %6985 = vrot.lane.b32.xlu1 %v6969_v1, %s12158_s17  ;;  %v7383_v56 = vsel %vm784_vm6, %v13946_v40, %v13956_v54  ;;  %v7384_v1 = vsel %vm784_vm6, %v13956_v54, %v13958_v22 }
 0x544   : > { %6296 = vmatprep.subr.mxu1 %v6187_v50  ;;  %6427 = vmatprep.mubr.f32.mxu0 %v13982_v46  ;;  %v7392_v39 = vmul.f32 %v7383_v56, %v13774_v57 }
 0x545   : > { %6297 = vmatpush1.msra.mxu1 %v6186_v55  ;;  %v6556_v3 = vpop.permute.xlu0 %6555  ;;  %v6347_v13 = vpop.permute.xlu1 %6346  ;;  %v7385_v55 = vsel %vm784_vm6, %v13958_v22, %v13969_v8 }
 0x546   : > { %v6353_v47 = vsel %vm572_vm9, %v6345_v44, %v6347_v13  ;;  %11998 = vmatmul.mubr.msk.f32.vlgmr.msra.gmra.mxu1 %vm411_vm8, %v11996_v61  ;;  %v6562_v60 = vsel %vm784_vm6, %v6554_v14, %v6556_v3  ;;  %v6354_v31 = vsel %vm572_vm9, %v6347_v13, %v6349_v17  ;;  %v7179_v44 = vmul.f32 %v7170_v35, %v13774_v57  ;;  %v12081_v13 = vld [vmem:[%s15127_s1 + $0x58] sm:$0xf] }
 0x547   : > { %6977 = vrot.lane.b32.xlu0 %v6965_v33, %s12158_s17  ;;  %10326 = vrot.lane.b32.xlu1 %v10313_v52, %s12156_s11  ;;  %v6563_v16 = vsel %vm784_vm6, %v6556_v3, %v6558_v24  ;;  %v10526_v14 = vrot.slane %v12077_v45, %v15184_v58  ;;  %v7393_v52 = vmul.f32 %v7384_v1, %v13782_v42 }
 0x548   : > { %6393 = vmatprep.subr.mxu0 %v6353_v47  ;;  %6498 = vmatprep.mubr.f32.mxu1 %v13982_v46  ;;  %v7394_v54 = vmul.f32 %v7385_v55, %v13768_v27  ;;  %v7395_v47 = vmul.f32 %v13969_v8, %v13777_v20  ;;  %v10739_v22 = vrot.slane %v12081_v13, %v15184_v58 }
 0x549   : > { %6394 = vmatpush1.msra.mxu0 %v6352_v43  ;;  %v6560_v51 = vpop.permute.xlu0 %6559  ;;  %v6351_v2 = vpop.permute.xlu1 %6350  ;;  %v10747_v8 = vrot.slane %v12081_v13, %v15185_v63 }
 0x54a   : > { %6602 = vmatprep.subr.mxu0 %v6562_v60  ;;  %11999 = vmatmul.mubr.msk.f32.vlgmr.msra.gmra.mxu0 %vm411_vm8, %v6127_v36  ;;  %v6355_v15 = vsel %vm572_vm9, %v6349_v17, %v6351_v2  ;;  %v6564_v41 = vsel %vm784_vm6, %v6558_v24, %v6560_v51  ;;  %v7180_v17 = vmul.f32 %v7171_v38, %v13782_v42 }
 0x54b   : > { %6603 = vmatpush1.msra.mxu0 %v6561_v29  ;;  %10328 = vrot.lane.b32.xlu0 %v10317_v59, %s12156_s11  ;;  %v10751_v2 = vrot.slane %v12081_v13, %v12229_v6 }
 0x54c   : > { %10330 = vrot.lane.b32.xlu1 %v10321_v12, %s12156_s11  ;;  %6464 = vmatprep.subr.mxu1 %v6355_v15  ;;  %v10743_v12 = vrot.slane %v12081_v13, %v12231_v7 }
 0x54d   : > { %6465 = vmatpush1.msra.mxu1 %v6354_v31  ;;  %v14060_v53 = vpop.permute.xlu0 %7594  ;;  %v14063_v37 = vpop.permute.xlu1 %7801  ;;  %6636 = vmatprep.mubr.f32.mxu0 %v13982_v46 }
 0x54e   : > { %6673 = vmatprep.subr.mxu1 %v6564_v41  ;;  %12000 = vmatmul.mubr.msk.f32.vlgmr.msra.gmra.mxu1 %vm411_vm8, %v6127_v36  ;;  %v7391_v36 = vmul.f32 %v13982_v46, %v13946_v40  ;;  %v7596_v40 = vsel %vm402_vm7, %v13971_v11, %v13988_v28  ;;  %v7598_v31 = vsel %vm402_vm7, %v13990_v62, %v14060_v53 }
 0x54f   : > { %6674 = vmatpush1.msra.mxu1 %v6563_v16  ;;  %10332 = vrot.lane.b32.xlu0 %v10325_v10, %s12156_s11  ;;  %v7605_v35 = vmul.f32 %v7596_v40, %v13774_v57  ;;  %v7597_v10 = vsel %vm402_vm7, %v13988_v28, %v13990_v62  ;;  %v7607_v38 = vmul.f32 %v7598_v31, %v13768_v27  ;;  %v12085_v28 = vld [vmem:[%s15127_s1 + $0x5c] sm:$0xf] }
 0x550   : > { %7192 = vrot.lane.b32.xlu1 %v7179_v44, %s12157_s14  ;;  %12003 = vmatmul.mubr.msk.f32.vlgmr.msra.gmra.mxu0 %vm411_vm8, %v12002_v30  ;;  %v7606_v41 = vmul.f32 %v7597_v10, %v13782_v42  ;;  %v7608_v62 = vmul.f32 %v14060_v53, %v13777_v20  ;;  %v10956_v45 = vrot.slane %v12085_v28, %v12231_v7 }
 0x551   : > { %v14082_v9 = vpop.permute.xlu0 %7803  ;;  %v14084_v5 = vpop.permute.xlu1 %7805  ;;  %6707 = vmatprep.mubr.f32.mxu1 %v13982_v46  ;;  %6849 = vmatprep.mubr.f32.mxu0 %v13982_v46  ;;  %v10960_v53 = vrot.slane %v12085_v28, %v15185_v63 }
 0x552   : > { %12004 = vmatmul.mubr.msk.f32.vlgmr.msra.gmra.mxu1 %vm411_vm8, %v12002_v30 }
 0x553   : > { %7194 = vrot.lane.b32.xlu0 %v7180_v17, %s12157_s14  ;;  %6920 = vmatprep.mubr.f32.mxu1 %v13982_v46  ;;  %v7604_v17 = vmul.f32 %v13982_v46, %v13971_v11  ;;  %v10964_v11 = vrot.slane %v12085_v28, %v12229_v6 }
 0x554   : > { %7196 = vrot.lane.b32.xlu1 %v7181_v4, %s12157_s14  ;;  %v10952_v4 = vrot.slane %v12085_v28, %v15184_v58 }
 0x555   : > { %v14098_v26 = vpop.permute.xlu0 %7807  ;;  %v14100_v48 = vpop.permute.xlu1 %8014 }
 0x556   : > { %v7811_v55 = vsel %vm572_vm9, %v14084_v5, %v14098_v26 }
 0x557   : > { %7198 = vrot.lane.b32.xlu0 %v7182_v18, %s12157_s14 }
 0x558   : > { %7190 = vrot.lane.b32.xlu1 %v7178_v34, %s12157_s14 }
 0x559   : > { %v14108_v23 = vpop.permute.xlu0 %8016  ;;  %v14110_v61 = vpop.permute.xlu1 %8018 }
 0x55a   : > { %v8023_v28 = vsel %vm15187_vm11, %v14108_v23, %v14110_v61 }
 0x55b   : > { %10539 = vrot.lane.b32.xlu0 %v10526_v14, %s12157_s14 }
 0x55c   : > { %10541 = vrot.lane.b32.xlu1 %v10530_v49, %s12157_s14 }
 0x55d   : > { %v14116_v21 = vpop.permute.xlu0 %8020  ;;  %v14118_v32 = vpop.permute.xlu1 %8227 }
 0x55f   : > { %10543 = vrot.lane.b32.xlu0 %v10534_v19, %s12157_s14  ;;  %v7809_v19 = vsel %vm572_vm9, %v14063_v37, %v14082_v9 }
 0x560   : > { %10545 = vrot.lane.b32.xlu1 %v10538_v25, %s12157_s14  ;;  %v7810_v25 = vsel %vm572_vm9, %v14082_v9, %v14084_v5  ;;  %v7818_v56 = vmul.f32 %v7809_v19, %v13774_v57  ;;  %v7820_v9 = vmul.f32 %v7811_v55, %v13768_v27 }
 0x561   : > { %v14129_v24 = vpop.permute.xlu0 %8229  ;;  %v14131_v50 = vpop.permute.xlu1 %8231 }
 0x563   : > { %7405 = vrot.lane.b32.xlu0 %v7392_v39, %s12156_s11 }
 0x564   : > { %7407 = vrot.lane.b32.xlu1 %v7393_v52, %s12156_s11  ;;  %v7819_v52 = vmul.f32 %v7810_v25, %v13782_v42  ;;  %v8030_v25 = vmul.f32 %v13982_v46, %v14100_v48 }
 0x565   : > { %v14140_v33 = vpop.permute.xlu0 %8233  ;;  %v14142_v3 = vpop.permute.xlu1 %8440 }
 0x567   : > { %7409 = vrot.lane.b32.xlu0 %v7394_v54, %s12156_s11 }
 0x568   : > { %7411 = vrot.lane.b32.xlu1 %v7395_v47, %s12156_s11  ;;  %v12089_v47 = vld [vmem:[%s15127_s1 + $0x60] sm:$0xf] }
 0x569   : > { %v14154_v59 = vpop.permute.xlu0 %8442  ;;  %v14156_v43 = vpop.permute.xlu1 %8444  ;;  %v11165_v5 = vrot.slane %v12089_v47, %v15184_v58  ;;  %v11169_v40 = vrot.slane %v12089_v47, %v12231_v7  ;;  %v11177_v10 = vrot.slane %v12089_v47, %v12229_v6 }
 0x56b   : > { %7403 = vrot.lane.b32.xlu0 %v7391_v36, %s12156_s11  ;;  %v7817_v36 = vmul.f32 %v13982_v46, %v14063_v37  ;;  %v8022_v37 = vsel %vm15186_vm10, %v14100_v48, %v14108_v23  ;;  %v12093_v23 = vld [vmem:[%s15127_s1 + $0x64] sm:$0xf]  ;;  %vm15190_vm10 = vmmov %vm15189_vm15 }
 0x56c   : > { %10752 = vrot.lane.b32.xlu1 %v10739_v22, %s12158_s17  ;;  %v7821_v22 = vmul.f32 %v14098_v26, %v13777_v20  ;;  %v11173_v26 = vrot.slane %v12089_v47, %v15185_v63  ;;  %v11390_v48 = vrot.slane %v12093_v23, %v12229_v6  ;;  %vm15191_vm11 = vmmov %vm15190_vm10 }
 0x56d   : > { %v14162_v51 = vpop.permute.xlu0 %8446  ;;  %v14164_v60 = vpop.permute.xlu1 %8653 }
 0x56f   : > { %10754 = vrot.lane.b32.xlu0 %v10743_v12, %s12158_s17 }
 0x570   : > { %10756 = vrot.lane.b32.xlu1 %v10747_v8, %s12158_s17 }
 0x571   : > { %v14172_v29 = vpop.permute.xlu0 %8655  ;;  %v14174_v15 = vpop.permute.xlu1 %8657 }
 0x573   : > { %10758 = vrot.lane.b32.xlu0 %v10751_v2, %s12158_s17 }
 0x574   : > { %7618 = vrot.lane.b32.xlu1 %v7605_v35, %s12155_s8 }
 0x575   : > { %v14186_v30 = vpop.permute.xlu0 %8659  ;;  %v14188_v44 = vpop.permute.xlu1 %9048 }
 0x577   : > { %7620 = vrot.lane.b32.xlu0 %v7606_v41, %s12155_s8 }
 0x578   : > { %7622 = vrot.lane.b32.xlu1 %v7607_v38, %s12155_s8  ;;  %v8031_v38 = vmul.f32 %v8022_v37, %v13774_v57  ;;  %v8236_v37 = vsel %vm2472_vm12, %v14129_v24, %v14131_v50 }
 0x579   : > { %v14198_v16 = vpop.permute.xlu0 %9050  ;;  %v14200_v0 = vpop.permute.xlu1 %9052 }
 0x57b   : > { %7624 = vrot.lane.b32.xlu0 %v7608_v62, %s12155_s8  ;;  %v8024_v62 = vsel %vm15188_vm14, %v14110_v61, %v14116_v21  ;;  %v8034_v61 = vmul.f32 %v14116_v21, %v13777_v20  ;;  %v11386_v21 = vrot.slane %v12093_v23, %v15185_v63  ;;  %vm15192_vm14 = vcmask 7168  }
 0x57c   : > { %7616 = vrot.lane.b32.xlu1 %v7604_v17, %s12155_s8  ;;  %v8032_v17 = vmul.f32 %v8023_v28, %v13782_v42 }
 0x57d   : > { %v14208_v18 = vpop.permute.xlu0 %9054  ;;  %v14210_v34 = vpop.permute.xlu1 %9261 }
 0x57f   : > { %10965 = vrot.lane.b32.xlu0 %v10952_v4, %s12159_s20 }
 0x580   : > { %10967 = vrot.lane.b32.xlu1 %v10956_v45, %s12159_s20 }
 0x581   : > { %v14216_v14 = vpop.permute.xlu0 %9263  ;;  %v14218_v49 = vpop.permute.xlu1 %9265 }
 0x583   : > { %10969 = vrot.lane.b32.xlu0 %v10960_v53, %s12159_s20  ;;  %v8033_v53 = vmul.f32 %v8024_v62, %v13768_v27 }
 0x584   : > { %10971 = vrot.lane.b32.xlu1 %v10964_v11, %s12159_s20 }
 0x585   : > { %v14229_v1 = vpop.permute.xlu0 %9267  ;;  %v14231_v39 = vpop.permute.xlu1 %9474 }
 0x587   : > { %7831 = vrot.lane.b32.xlu0 %v7818_v56, %s12154_s25  ;;  %v11378_v56 = vrot.slane %v12093_v23, %v15184_v58 }
 0x588   : > { %7833 = vrot.lane.b32.xlu1 %v7819_v52, %s12154_s25  ;;  %v11382_v52 = vrot.slane %v12093_v23, %v12231_v7 }
 0x589   : > { %v14240_v54 = vpop.permute.xlu0 %9476  ;;  %v14242_v13 = vpop.permute.xlu1 %9478 }
 0x58b   : > { %7835 = vrot.lane.b32.xlu0 %v7820_v9, %s12154_s25 }
 0x58c   : > { %7837 = vrot.lane.b32.xlu1 %v7821_v22, %s12154_s25 }
 0x58d   : > { %v14254_v12 = vpop.permute.xlu0 %9480  ;;  %v14256_v8 = vpop.permute.xlu1 %9687 }
 0x58f   : > { %7829 = vrot.lane.b32.xlu0 %v7817_v36, %s12154_s25  ;;  %v8235_v36 = vsel %vm2472_vm12, %v14118_v32, %v14129_v24  ;;  %v8245_v24 = vmul.f32 %v8236_v37, %v13782_v42 }
 0x590   : > { %11178 = vrot.lane.b32.xlu1 %v11165_v5, %s12160_s26  ;;  %v8244_v28 = vmul.f32 %v8235_v36, %v13774_v57 }
 0x591   : > { %v14262_v2 = vpop.permute.xlu0 %9689  ;;  %v14264_v35 = vpop.permute.xlu1 %9691 }
 0x593   : > { %11180 = vrot.lane.b32.xlu0 %v11169_v40, %s12160_s26 }
 0x594   : > { %11182 = vrot.lane.b32.xlu1 %v11173_v26, %s12160_s26 }
 0x595   : > { %v14272_v31 = vpop.permute.xlu0 %9693  ;;  %v14274_v41 = vpop.permute.xlu1 %9900 }
 0x597   : > { %11184 = vrot.lane.b32.xlu0 %v11177_v10, %s12160_s26  ;;  %v12006_v10 = vld [vmem:[%s15130_s4 + $0x18] sm:$0xff] }
 0x598   : > { %8044 = vrot.lane.b32.xlu1 %v8031_v38, %s12164_s24 }
 0x599   : > { %v14286_v4 = vpop.permute.xlu0 %9902  ;;  %v14288_v45 = vpop.permute.xlu1 %9904 }
 0x59b   : > { %8046 = vrot.lane.b32.xlu0 %v8032_v17, %s12164_s24 }
 0x59c   : > { %8048 = vrot.lane.b32.xlu1 %v8033_v53, %s12164_s24  ;;  %v8237_v53 = vsel %vm2472_vm12, %v14131_v50, %v14140_v33  ;;  %v12097_v50 = vld [vmem:[%s15127_s1 + $0x68] sm:$0xf] }
 0x59d   : > { %v14298_v11 = vpop.permute.xlu0 %9906  ;;  %v6767_v19 = vpop.permute.xlu1 %6766  ;;  %v8246_v23 = vmul.f32 %v8237_v53, %v13768_v27  ;;  %v8450_v53 = vsel %vm2687_vm13, %v14156_v43, %v14162_v51 }
 0x59f   : > { %8050 = vrot.lane.b32.xlu0 %v8034_v61, %s12164_s24 }
 0x5a0   : > { %8042 = vrot.lane.b32.xlu1 %v8030_v25, %s12164_s24  ;;  %v8247_v25 = vmul.f32 %v14140_v33, %v13777_v20  ;;  %v11599_v33 = vrot.slane %v12097_v50, %v15185_v63 }
 0x5a1   : > { %v6769_v55 = vpop.permute.xlu0 %6768  ;;  %v6771_v9 = vpop.permute.xlu1 %6770 }
 0x5a2   : > { %v6775_v47 = vsel %vm1000_vm5, %v6767_v19, %v6769_v55  ;;  %v6776_v38 = vsel %vm1000_vm5, %v6769_v55, %v6771_v9 }
 0x5a3   : > { %11391 = vrot.lane.b32.xlu0 %v11378_v56, %s12161_s29  ;;  %6815 = vmatprep.subr.mxu0 %v6775_v47  ;;  %v11591_v56 = vrot.slane %v12097_v50, %v15184_v58 }
 0x5a4   : > { %11393 = vrot.lane.b32.xlu1 %v11382_v52, %s12161_s29  ;;  %v8243_v52 = vmul.f32 %v13982_v46, %v14118_v32  ;;  %v12010_v32 = vld [vmem:[%s15130_s4 + $0x20] sm:$0xff] }
 0x5a5   : > { %v6773_v22 = vpop.permute.xlu0 %6772  ;;  %v6765_v5 = vpop.permute.xlu1 %6764 }
 0x5a6   : > { %v6774_v40 = vsel %vm1000_vm5, %v6765_v5, %v6767_v19  ;;  %v6777_v26 = vsel %vm1000_vm5, %v6771_v9, %v6773_v22 }
 0x5a7   : > { %11395 = vrot.lane.b32.xlu0 %v11386_v21, %s12161_s29  ;;  %6816 = vmatpush1.msra.mxu0 %v6774_v40  ;;  %v11595_v21 = vrot.slane %v12097_v50, %v12231_v7  ;;  %v8448_v40 = vsel %vm2687_vm13, %v14142_v3, %v14154_v59 }
 0x5a8   : > { %11397 = vrot.lane.b32.xlu1 %v11390_v48, %s12161_s29  ;;  %6886 = vmatprep.subr.mxu1 %v6777_v26  ;;  %v11603_v26 = vrot.slane %v12097_v50, %v12229_v6 }
 0x5a9   : > { %6887 = vmatpush1.msra.mxu1 %v6776_v38  ;;  %v14326_v62 = vpop.permute.xlu0 %10113  ;;  %v14328_v17 = vpop.permute.xlu1 %10115  ;;  %12007 = vmatmul.mubr.msk.f32.vlgmr.msra.gmra.mxu0 %vm411_vm8, %v12006_v10  ;;  %v8457_v38 = vmul.f32 %v8448_v40, %v13774_v57 }
 0x5aa   : > { %12008 = vmatmul.mubr.msk.f32.vlgmr.msra.gmra.mxu1 %vm411_vm8, %v12006_v10  ;;  %7062 = vmatprep.mubr.f32.mxu0 %v13982_v46 }
 0x5ab   : > { %8257 = vrot.lane.b32.xlu0 %v8244_v28, %s12170_s19  ;;  %7133 = vmatprep.mubr.f32.mxu1 %v13982_v46  ;;  %v8449_v28 = vsel %vm2687_vm13, %v14154_v59, %v14156_v43  ;;  %v8459_v59 = vmul.f32 %v8450_v53, %v13768_v27  ;;  %v8460_v43 = vmul.f32 %v14162_v51, %v13777_v20  ;;  %v14455_v53 = vld [vmem:[#allocation2 + $0x18] sm:$0xff] }
 0x5ac   : > { %8259 = vrot.lane.b32.xlu1 %v8245_v24, %s12170_s19 }
 0x5ad   : > { %v14341_v61 = vpop.permute.xlu0 %10117  ;;  %v14343_v19 = vpop.permute.xlu1 %10119 }
 0x5af   : > { %8261 = vrot.lane.b32.xlu0 %v8246_v23, %s12170_s19  ;;  %v8458_v23 = vmul.f32 %v8449_v28, %v13782_v42 }
 0x5b0   : > { %8263 = vrot.lane.b32.xlu1 %v8247_v25, %s12170_s19 }
 0x5b1   : > { %v6980_v55 = vpop.permute.xlu0 %6979  ;;  %v6982_v9 = vpop.permute.xlu1 %6981 }
 0x5b2   : > { %v6988_v47 = vsel %vm1185_vm4, %v6980_v55, %v6982_v9 }
 0x5b3   : > { %8255 = vrot.lane.b32.xlu0 %v8243_v52, %s12170_s19  ;;  %7028 = vmatprep.subr.mxu0 %v6988_v47  ;;  %v8456_v52 = vmul.f32 %v13982_v46, %v14142_v3  ;;  %v8662_v47 = vsel %vm15190_vm10, %v14172_v29, %v14174_v15  ;;  %v8663_v3 = vsel %vm15191_vm11, %v14174_v15, %v14186_v30  ;;  %vm15194_vm10 = vmmov %vm15192_vm14  ;;  %vm15195_vm11 = vcmask 56320  }
 0x5b4   : > { %11604 = vrot.lane.b32.xlu1 %v11591_v56, %s12162_s30  ;;  %v9056_v15 = vsel %vm15192_vm14, %v14188_v44, %v14198_v16 }
 0x5b5   : > { %v6984_v48 = vpop.permute.xlu0 %6983  ;;  %v6986_v22 = vpop.permute.xlu1 %6985 }
 0x5b6   : > { %v6990_v5 = vsel %vm1185_vm4, %v6984_v48, %v6986_v22  ;;  %v6989_v36 = vsel %vm1185_vm4, %v6982_v9, %v6984_v48 }
 0x5b7   : > { %11606 = vrot.lane.b32.xlu0 %v11595_v21, %s12162_s30  ;;  %7099 = vmatprep.subr.mxu1 %v6990_v5 }
 0x5b8   : > { %11608 = vrot.lane.b32.xlu1 %v11599_v33, %s12162_s30  ;;  %7100 = vmatpush1.msra.mxu1 %v6989_v36  ;;  %v8671_v33 = vmul.f32 %v8662_v47, %v13782_v42 }
 0x5b9   : > { %v6978_v37 = vpop.permute.xlu0 %6977  ;;  %v14371_v10 = vpop.permute.xlu1 %10326  ;;  %12012 = vmatmul.mubr.msk.f32.vlgmr.msra.gmra.mxu1 %vm411_vm8, %v12010_v32 }
 0x5ba   : > { %v6987_v24 = vsel %vm1185_vm4, %v6978_v37, %v6980_v55  ;;  %7346 = vmatprep.mubr.f32.mxu1 %v13982_v46  ;;  %v8661_v55 = vsel %vm15189_vm15, %v14164_v60, %v14172_v29  ;;  %v8672_v29 = vmul.f32 %v8663_v3, %v13768_v27  ;;  %v12014_v27 = vld [vmem:[%s15130_s4 + $0x28] sm:$0xff]  ;;  %v9065_v37 = vmul.f32 %v9056_v15, %v13782_v42  ;;  %vm15193_vm15 = vmmov %vm15192_vm14  ;;  %v14450_v42 = vld [vmem:[#allocation2] sm:$0xff] }
 0x5bb   : > { %11610 = vrot.lane.b32.xlu0 %v11603_v26, %s12162_s30  ;;  %7029 = vmatpush1.msra.mxu0 %v6987_v24  ;;  %v8670_v51 = vmul.f32 %v8661_v55, %v13774_v57  ;;  %v8673_v57 = vmul.f32 %v14186_v30, %v13777_v20  ;;  %v8669_v30 = vmul.f32 %v13982_v46, %v14164_v60  ;;  %vm15196_vm14 = vmmov %vm15195_vm11 }
 0x5bc   : > { %8470 = vrot.lane.b32.xlu1 %v8457_v38, %s12169_s10  ;;  %12011 = vmatmul.mubr.msk.f32.vlgmr.msra.gmra.mxu0 %vm411_vm8, %v12010_v32  ;;  %v9057_v38 = vsel %vm15193_vm15, %v14198_v16, %v14200_v0  ;;  %v9058_v60 = vsel %vm15194_vm10, %v14200_v0, %v14208_v18  ;;  %v9068_v0 = vmul.f32 %v13982_v46, %v14208_v18  ;;  %v14477_v18 = vld [vmem:[#allocation2 + $0x8] sm:$0xff]  ;;  %vm15197_vm15 = vmmov %vm15195_vm11  ;;  %vm15198_vm10 = vcmask 72704  }
 0x5bd   : > { %v14387_v50 = vpop.permute.xlu0 %10328  ;;  %7275 = vmatprep.mubr.f32.mxu0 %v13982_v46  ;;  %v9066_v16 = vmul.f32 %v14450_v42, %v9057_v38  ;;  %v9484_v38 = vsel %vm411_vm8, %v14242_v13, %v14254_v12 }
 0x5be   : > { %v14391_v25 = vpop.permute.xlu1 %10330 }
 0x5bf   : > { %8472 = vrot.lane.b32.xlu0 %v8458_v23, %s12169_s10  ;;  %v9067_v23 = vmul.f32 %v14455_v53, %v9058_v60 }
 0x5c0   : > { %8474 = vrot.lane.b32.xlu1 %v8459_v59, %s12169_s10 }
 0x5c1   : > { %v14397_v56 = vpop.permute.xlu0 %10332 }
 0x5c2   : > { %v7193_v9 = vpop.permute.xlu1 %7192 }
 0x5c3   : > { %8476 = vrot.lane.b32.xlu0 %v8460_v43, %s12169_s10 }
 0x5c4   : > { %8468 = vrot.lane.b32.xlu1 %v8456_v52, %s12169_s10  ;;  %v14464_v52 = vld [vmem:[#allocation2 + $0x10] sm:$0xff] }
 0x5c5   : > { %v7195_v21 = vpop.permute.xlu0 %7194  ;;  %v9064_v55 = vmul.f32 %v14464_v52, %v14188_v44 }
 0x5c6   : > { %v7197_v48 = vpop.permute.xlu1 %7196  ;;  %v7201_v22 = vsel %vm969_vm3, %v7193_v9, %v7195_v21 }
 0x5c7   : > { %8683 = vrot.lane.b32.xlu0 %v8670_v51, %s12168_s27  ;;  %7241 = vmatprep.subr.mxu0 %v7201_v22  ;;  %v7202_v20 = vsel %vm969_vm3, %v7195_v21, %v7197_v48  ;;  %v9270_v51 = vsel %vm15196_vm14, %v14216_v14, %v14218_v49  ;;  %vm15200_vm14 = vmmov %vm15198_vm10 }
 0x5c8   : > { %8685 = vrot.lane.b32.xlu1 %v8671_v33, %s12168_s27  ;;  %v9279_v3 = vmul.f32 %v14450_v42, %v9270_v51 }
 0x5c9   : > { %v7199_v5 = vpop.permute.xlu0 %7198 }
 0x5ca   : > { %v7191_v36 = vpop.permute.xlu1 %7190  ;;  %v7203_v32 = vsel %vm969_vm3, %v7197_v48, %v7199_v5  ;;  %v9271_v48 = vsel %vm15197_vm15, %v14218_v49, %v14229_v1  ;;  %v12018_v5 = vld [vmem:[%s15130_s4 + $0x30] sm:$0xff]  ;;  %v9281_v49 = vmul.f32 %v13982_v46, %v14229_v1  ;;  %v9277_v1 = vmul.f32 %v14464_v52, %v14210_v34  ;;  %vm15201_vm15 = vmmov %vm15198_vm10 }
 0x5cb   : > { %v7200_v40 = vsel %vm969_vm3, %v7191_v36, %v7193_v9  ;;  %8687 = vrot.lane.b32.xlu0 %v8672_v29, %s12168_s27  ;;  %7312 = vmatprep.subr.mxu1 %v7203_v32  ;;  %v9269_v9 = vsel %vm15195_vm11, %v14210_v34, %v14216_v14  ;;  %vm15199_vm11 = vmmov %vm15198_vm10 }
 0x5cc   : > { %8689 = vrot.lane.b32.xlu1 %v8673_v57, %s12168_s27  ;;  %7242 = vmatpush1.msra.mxu0 %v7200_v40  ;;  %v9278_v44 = vmul.f32 %v14477_v18, %v9269_v9  ;;  %v9280_v57 = vmul.f32 %v14455_v53, %v9271_v48  ;;  %v9482_v40 = vsel %vm411_vm8, %v14231_v39, %v14240_v54 }
 0x5cd   : > { %7313 = vmatpush1.msra.mxu1 %v7202_v20  ;;  %v14433_v26 = vpop.permute.xlu0 %10539  ;;  %12015 = vmatmul.mubr.msk.f32.vlgmr.msra.gmra.mxu0 %vm411_vm8, %v12014_v27  ;;  %v9491_v20 = vmul.f32 %v14477_v18, %v9482_v40  ;;  %v9910_v40 = vsel %vm329_vm1, %v14288_v45, %v14298_v11 }
 0x5ce   : > { %v14440_v28 = vpop.permute.xlu1 %10541  ;;  %12016 = vmatmul.mubr.msk.f32.vlgmr.msra.gmra.mxu1 %vm411_vm8, %v12014_v27  ;;  %7488 = vmatprep.mubr.f32.mxu0 %v13982_v46 }
 0x5cf   : > { %8681 = vrot.lane.b32.xlu0 %v8669_v30, %s12168_s27  ;;  %7559 = vmatprep.mubr.f32.mxu1 %v13982_v46  ;;  %v9483_v30 = vsel %vm411_vm8, %v14240_v54, %v14242_v13  ;;  %v9494_v54 = vmul.f32 %v13982_v46, %v14254_v12  ;;  %v9490_v13 = vmul.f32 %v14464_v52, %v14231_v39 }
 0x5d0   : > { %9078 = vrot.lane.b32.xlu1 %v9065_v37, %s12167_s16  ;;  %v9492_v34 = vmul.f32 %v14450_v42, %v9483_v30 }
 0x5d1   : > { %v14453_v24 = vpop.permute.xlu0 %10543 }
 0x5d2   : > { %v14458_v59 = vpop.permute.xlu1 %10545 }
 0x5d3   : > { %9080 = vrot.lane.b32.xlu0 %v9066_v16, %s12167_s16  ;;  %v9493_v16 = vmul.f32 %v14455_v53, %v9484_v38 }
 0x5d4   : > { %9082 = vrot.lane.b32.xlu1 %v9067_v23, %s12167_s16 }
 0x5d5   : > { %v7406_v43 = vpop.permute.xlu0 %7405 }
 0x5d6   : > { %v7408_v47 = vpop.permute.xlu1 %7407 }
 0x5d7   : > { %9084 = vrot.lane.b32.xlu0 %v9068_v0, %s12167_s16  ;;  %v7414_v21 = vsel %vm753_vm2, %v7406_v43, %v7408_v47 }
 0x5d8   : > { %9076 = vrot.lane.b32.xlu1 %v9064_v55, %s12167_s16  ;;  %7454 = vmatprep.subr.mxu0 %v7414_v21  ;;  %v9697_v21 = vsel %vm15200_vm14, %v14264_v35, %v14272_v31  ;;  %vm15203_vm14 = vmmov %vm15198_vm10 }
 0x5d9   : > { %v7410_v33 = vpop.permute.xlu0 %7409 }
 0x5da   : > { %v7412_v22 = vpop.permute.xlu1 %7411  ;;  %v7415_v14 = vsel %vm753_vm2, %v7408_v47, %v7410_v33  ;;  %v9696_v47 = vsel %vm15199_vm11, %v14262_v2, %v14264_v35  ;;  %vm15202_vm11 = vmmov %vm15198_vm10 }
 0x5db   : > { %9291 = vrot.lane.b32.xlu0 %v9278_v44, %s12166_s12  ;;  %v7416_v29 = vsel %vm753_vm2, %v7410_v33, %v7412_v22  ;;  %v9705_v39 = vmul.f32 %v14450_v42, %v9696_v47  ;;  %v9706_v22 = vmul.f32 %v14455_v53, %v9697_v21  ;;  %v10334_v21 = vsel %vm753_vm2, %v14371_v10, %v14387_v50 }
 0x5dc   : > { %9293 = vrot.lane.b32.xlu1 %v9279_v3, %s12166_s12  ;;  %7525 = vmatprep.subr.mxu1 %v7416_v29 }
 0x5dd   : > { %7526 = vmatpush1.msra.mxu1 %v7415_v14  ;;  %v7404_v36 = vpop.permute.xlu0 %7403  ;;  %v9707_v14 = vmul.f32 %v13982_v46, %v14272_v31 }
 0x5de   : > { %v7413_v32 = vsel %vm753_vm2, %v7404_v36, %v7406_v43  ;;  %v14495_v15 = vpop.permute.xlu1 %10752  ;;  %12020 = vmatmul.mubr.msk.f32.vlgmr.msra.gmra.mxu1 %vm411_vm8, %v12018_v5  ;;  %v9695_v43 = vsel %vm15198_vm10, %v14256_v8, %v14262_v2  ;;  %v12022_v2 = vld [vmem:[%s15130_s4 + $0x38] sm:$0xff] }
 0x5df   : > { %9295 = vrot.lane.b32.xlu0 %v9280_v57, %s12166_s12  ;;  %7455 = vmatpush1.msra.mxu0 %v7413_v32  ;;  %v9704_v12 = vmul.f32 %v14477_v18, %v9695_v43  ;;  %v9703_v57 = vmul.f32 %v14464_v52, %v14256_v8 }
 0x5e0   : > { %9297 = vrot.lane.b32.xlu1 %v9281_v49, %s12166_s12  ;;  %12019 = vmatmul.mubr.msk.f32.vlgmr.msra.gmra.mxu0 %vm411_vm8, %v12018_v5  ;;  %v9908_v5 = vsel %vm329_vm1, %v14274_v41, %v14286_v4  ;;  %v9909_v49 = vsel %vm329_vm1, %v14286_v4, %v14288_v45  ;;  %v9920_v45 = vmul.f32 %v13982_v46, %v14298_v11  ;;  %v12026_v11 = vld [vmem:[%s15130_s4 + $0x40] sm:$0xff] }
 0x5e1   : > { %v14506_v27 = vpop.permute.xlu0 %10754  ;;  %7772 = vmatprep.mubr.f32.mxu1 %v13982_v46  ;;  %7701 = vmatprep.mubr.f32.mxu0 %v13982_v46  ;;  %v9917_v36 = vmul.f32 %v14477_v18, %v9908_v5  ;;  %v9918_v8 = vmul.f32 %v14450_v42, %v9909_v49  ;;  %v10547_v49 = vsel %vm969_vm3, %v14433_v26, %v14440_v28 }
 0x5e2   : > { %v14514_v37 = vpop.permute.xlu1 %10756 }
 0x5e3   : > { %9289 = vrot.lane.b32.xlu0 %v9277_v1, %s12166_s12 }
 0x5e4   : > { %9504 = vrot.lane.b32.xlu1 %v9491_v20, %s12165_s7  ;;  %v9919_v20 = vmul.f32 %v14455_v53, %v9910_v40 }
 0x5e5   : > { %v14522_v60 = vpop.permute.xlu0 %10758 }
 0x5e6   : > { %v7619_v23 = vpop.permute.xlu1 %7618 }
 0x5e7   : > { %9506 = vrot.lane.b32.xlu0 %v9492_v34, %s12165_s7  ;;  %v9916_v34 = vmul.f32 %v14464_v52, %v14274_v41 }
 0x5e8   : > { %9508 = vrot.lane.b32.xlu1 %v9493_v16, %s12165_s7  ;;  %v10121_v16 = vsel %vm371_vm0, %v14326_v62, %v14328_v17 }
 0x5e9   : > { %v7621_v0 = vpop.permute.xlu0 %7620  ;;  %v10130_v41 = vmul.f32 %v14477_v18, %v10121_v16 }
 0x5ea   : > { %v7623_v55 = vpop.permute.xlu1 %7622  ;;  %v7627_v9 = vsel %vm371_vm0, %v7619_v23, %v7621_v0 }
 0x5eb   : > { %9510 = vrot.lane.b32.xlu0 %v9494_v54, %s12165_s7  ;;  %7667 = vmatprep.subr.mxu0 %v7627_v9  ;;  %v7628_v48 = vsel %vm371_vm0, %v7621_v0, %v7623_v55  ;;  %v10122_v0 = vsel %vm371_vm0, %v14328_v17, %v14341_v61  ;;  %v10123_v17 = vsel %vm371_vm0, %v14341_v61, %v14343_v19 }
 0x5ec   : > { %9502 = vrot.lane.b32.xlu1 %v9490_v13, %s12165_s7  ;;  %v10133_v61 = vmul.f32 %v13982_v46, %v14343_v19  ;;  %v10335_v19 = vsel %vm753_vm2, %v14387_v50, %v14391_v25  ;;  %v10346_v50 = vmul.f32 %v13982_v46, %v14397_v56 }
 0x5ed   : > { %v7625_v51 = vpop.permute.xlu0 %7624 }
 0x5ee   : > { %v7617_v44 = vpop.permute.xlu1 %7616  ;;  %v7629_v33 = vsel %vm371_vm0, %v7623_v55, %v7625_v51  ;;  %v10131_v55 = vmul.f32 %v14450_v42, %v10122_v0  ;;  %v10555_v0 = vmul.f32 %v14464_v52, %v14433_v26 }
 0x5ef   : > { %v7626_v3 = vsel %vm371_vm0, %v7617_v44, %v7619_v23  ;;  %9717 = vrot.lane.b32.xlu0 %v9704_v12, %s12163_s18  ;;  %7738 = vmatprep.subr.mxu1 %v7629_v33  ;;  %v10132_v12 = vmul.f32 %v14455_v53, %v10123_v17  ;;  %v10129_v44 = vmul.f32 %v14464_v52, %v14326_v62 }
 0x5f0   : > { %9719 = vrot.lane.b32.xlu1 %v9705_v39, %s12163_s18  ;;  %7668 = vmatpush1.msra.mxu0 %v7626_v3  ;;  %v10343_v3 = vmul.f32 %v14477_v18, %v10334_v21 }
 0x5f1   : > { %7739 = vmatpush1.msra.mxu1 %v7628_v48  ;;  %v14554_v35 = vpop.permute.xlu0 %10965  ;;  %12023 = vmatmul.mubr.msk.f32.vlgmr.msra.gmra.mxu0 %vm411_vm8, %v12022_v2  ;;  %v10336_v48 = vsel %vm753_vm2, %v14391_v25, %v14397_v56  ;;  %v10556_v56 = vmul.f32 %v14477_v18, %v10547_v49 }
 0x5f2   : > { %v14559_v29 = vpop.permute.xlu1 %10967  ;;  %12024 = vmatmul.mubr.msk.f32.vlgmr.msra.gmra.mxu1 %vm411_vm8, %v12022_v2  ;;  %7914 = vmatprep.mubr.f32.mxu0 %v13982_v46 }
 0x5f3   : > { %9721 = vrot.lane.b32.xlu0 %v9706_v22, %s12163_s18  ;;  %7985 = vmatprep.mubr.f32.mxu1 %v13982_v46  ;;  %v10344_v22 = vmul.f32 %v14450_v42, %v10335_v19  ;;  %v10973_v19 = vsel %vm1000_vm5, %v14554_v35, %v14559_v29 }
 0x5f4   : > { %9723 = vrot.lane.b32.xlu1 %v9707_v14, %s12163_s18  ;;  %v10345_v14 = vmul.f32 %v14455_v53, %v10336_v48 }
 0x5f5   : > { %v14571_v31 = vpop.permute.xlu0 %10969 }
 0x5f6   : > { %v14577_v32 = vpop.permute.xlu1 %10971 }
 0x5f7   : > { %9715 = vrot.lane.b32.xlu0 %v9703_v57, %s12163_s18 }
 0x5f8   : > { %9930 = vrot.lane.b32.xlu1 %v9917_v36, %s12162_s30  ;;  %v10342_v36 = vmul.f32 %v14464_v52, %v14371_v10 }
 0x5f9   : > { %v7832_v1 = vpop.permute.xlu0 %7831 }
 0x5fa   : > { %v7834_v30 = vpop.permute.xlu1 %7833 }
 0x5fb   : > { %9932 = vrot.lane.b32.xlu0 %v9918_v8, %s12162_s30  ;;  %v7840_v4 = vsel %vm329_vm1, %v7832_v1, %v7834_v30 }
 0x5fc   : > { %9934 = vrot.lane.b32.xlu1 %v9919_v20, %s12162_s30  ;;  %7880 = vmatprep.subr.mxu0 %v7840_v4  ;;  %v10549_v4 = vsel %vm969_vm3, %v14453_v24, %v14458_v59 }
 0x5fd   : > { %v7836_v38 = vpop.permute.xlu0 %7835 }
 0x5fe   : > { %v7838_v23 = vpop.permute.xlu1 %7837  ;;  %v7841_v54 = vsel %vm329_vm1, %v7834_v30, %v7836_v38 }
 0x5ff   : > { %9936 = vrot.lane.b32.xlu0 %v9920_v45, %s12162_s30  ;;  %v7842_v13 = vsel %vm329_vm1, %v7836_v38, %v7838_v23  ;;  %v14679_v38 = vld [vmem:[#allocation2 + $0x28] sm:$0xff] }
 0x600   : > { %9928 = vrot.lane.b32.xlu1 %v9916_v34, %s12162_s30  ;;  %7951 = vmatprep.subr.mxu1 %v7842_v13  ;;  %v10558_v34 = vmul.f32 %v14455_v53, %v10549_v4  ;;  %v10772_v21 = vmul.f32 %v14679_v38, %v14522_v60 }
 0x601   : > { %7952 = vmatpush1.msra.mxu1 %v7841_v54  ;;  %v7830_v43 = vpop.permute.xlu0 %7829  ;;  %v10760_v54 = vsel %vm1185_vm4, %v14495_v15, %v14506_v27 }
 0x602   : > { %v7839_v9 = vsel %vm329_vm1, %v7830_v43, %v7832_v1  ;;  %v14612_v47 = vpop.permute.xlu1 %11178  ;;  %12028 = vmatmul.mubr.msk.f32.vlgmr.msra.gmra.mxu1 %vm411_vm8, %v12026_v11  ;;  %v10548_v1 = vsel %vm969_vm3, %v14440_v28, %v14453_v24  ;;  %v10559_v24 = vmul.f32 %v14679_v38, %v14458_v59  ;;  %v10761_v59 = vsel %vm1185_vm4, %v14506_v27, %v14514_v37 }
 0x603   : > { %10143 = vrot.lane.b32.xlu0 %v10130_v41, %s12161_s29  ;;  %7881 = vmatpush1.msra.mxu0 %v7839_v9  ;;  %v10557_v28 = vmul.f32 %v14450_v42, %v10548_v1  ;;  %v10762_v43 = vsel %vm1185_vm4, %v14514_v37, %v14522_v60  ;;  %v10770_v26 = vmul.f32 %v14450_v42, %v10761_v59  ;;  %v12034_v37 = vld [vmem:[%s15130_s4 + $0x50] sm:$0xff] }
 0x604   : > { %10145 = vrot.lane.b32.xlu1 %v10131_v55, %s12161_s29  ;;  %12027 = vmatmul.mubr.msk.f32.vlgmr.msra.gmra.mxu0 %vm411_vm8, %v12026_v11  ;;  %v10769_v11 = vmul.f32 %v14477_v18, %v10760_v54  ;;  %v10771_v9 = vmul.f32 %v14455_v53, %v10762_v43  ;;  %v11194_v54 = vmul.f32 %v14464_v52, %v14612_v47 }
 0x605   : > { %v14619_v51 = vpop.permute.xlu0 %11180  ;;  %8198 = vmatprep.mubr.f32.mxu1 %v13982_v46  ;;  %8127 = vmatprep.mubr.f32.mxu0 %v13982_v46  ;;  %v12030_v46 = vld [vmem:[%s15130_s4 + $0x48] sm:$0xff] }
 0x606   : > { %v14625_v39 = vpop.permute.xlu1 %11182 }
 0x607   : > { %10147 = vrot.lane.b32.xlu0 %v10132_v12, %s12161_s29 }
 0x608   : > { %10149 = vrot.lane.b32.xlu1 %v10133_v61, %s12161_s29 }
 0x609   : > { %v14634_v33 = vpop.permute.xlu0 %11184 }
 0x60a   : > { %v8045_v2 = vpop.permute.xlu1 %8044 }
 0x60b   : > { %10141 = vrot.lane.b32.xlu0 %v10129_v44, %s12161_s29 }
 0x60c   : > { %10356 = vrot.lane.b32.xlu1 %v10343_v3, %s12160_s26  ;;  %v10768_v3 = vmul.f32 %v14464_v52, %v14495_v15  ;;  %v10982_v15 = vmul.f32 %v14477_v18, %v10973_v19 }
 0x60d   : > { %v8047_v62 = vpop.permute.xlu0 %8046 }
 0x60e   : > { %v8049_v5 = vpop.permute.xlu1 %8048  ;;  %v8053_v57 = vsel %vm15201_vm15, %v8045_v2, %v8047_v62  ;;  %vm15204_vm15 = vcmask 56320  }
 0x60f   : > { %10358 = vrot.lane.b32.xlu0 %v10344_v22, %s12160_s26  ;;  %8093 = vmatprep.subr.mxu0 %v8053_v57  ;;  %v8054_v10 = vsel %vm15203_vm14, %v8047_v62, %v8049_v5  ;;  %v10974_v22 = vsel %vm1000_vm5, %v14559_v29, %v14571_v31  ;;  %v10975_v29 = vsel %vm1000_vm5, %v14571_v31, %v14577_v32 }
 0x610   : > { %10360 = vrot.lane.b32.xlu1 %v10345_v14, %s12160_s26  ;;  %v10983_v62 = vmul.f32 %v14450_v42, %v10974_v22  ;;  %v10981_v31 = vmul.f32 %v14464_v52, %v14554_v35 }
 0x611   : > { %v8051_v25 = vpop.permute.xlu0 %8050 }
 0x612   : > { %v8043_v40 = vpop.permute.xlu1 %8042  ;;  %v8055_v8 = vsel %vm15198_vm10, %v8049_v5, %v8051_v25  ;;  %v10984_v5 = vmul.f32 %v14455_v53, %v10975_v29  ;;  %vm15205_vm10 = vmmov %vm15204_vm15 }
 0x613   : > { %v8052_v20 = vsel %vm15202_vm11, %v8043_v40, %v8045_v2  ;;  %10362 = vrot.lane.b32.xlu0 %v10346_v50, %s12160_s26  ;;  %8164 = vmatprep.subr.mxu1 %v8055_v8  ;;  %v10985_v50 = vmul.f32 %v14679_v38, %v14577_v32  ;;  %v11187_v8 = vsel %vm784_vm6, %v14619_v51, %v14625_v39  ;;  %vm15206_vm11 = vmmov %vm15205_vm10 }
 0x614   : > { %10354 = vrot.lane.b32.xlu1 %v10342_v36, %s12160_s26  ;;  %8094 = vmatpush1.msra.mxu0 %v8052_v20  ;;  %v11186_v36 = vsel %vm784_vm6, %v14612_v47, %v14619_v51  ;;  %v11188_v20 = vsel %vm784_vm6, %v14625_v39, %v14634_v33  ;;  %v11196_v35 = vmul.f32 %v14450_v42, %v11187_v8  ;;  %v12038_v39 = vld [vmem:[%s15130_s4 + $0x58] sm:$0xff]  ;;  %vm15207_vm14 = vmmov %vm15205_vm10 }
 0x615   : > { %8165 = vmatpush1.msra.mxu1 %v8054_v10  ;;  %v14669_v30 = vpop.permute.xlu0 %11391  ;;  %12031 = vmatmul.mubr.msk.f32.vlgmr.msra.gmra.mxu0 %vm411_vm8, %v12030_v46  ;;  %v11195_v40 = vmul.f32 %v14477_v18, %v11186_v36  ;;  %v11197_v10 = vmul.f32 %v14455_v53, %v11188_v20 }
 0x616   : > { %v14676_v45 = vpop.permute.xlu1 %11393  ;;  %12032 = vmatmul.mubr.msk.f32.vlgmr.msra.gmra.mxu1 %vm411_vm8, %v12030_v46  ;;  %8340 = vmatprep.mubr.f32.mxu0 %v14679_v38 }
 0x617   : > { %10569 = vrot.lane.b32.xlu0 %v10556_v56, %s12159_s20  ;;  %8411 = vmatprep.mubr.f32.mxu1 %v14679_v38 }
 0x618   : > { %10571 = vrot.lane.b32.xlu1 %v10557_v28, %s12159_s20 }
 0x619   : > { %v14686_v16 = vpop.permute.xlu0 %11395 }
 0x61a   : > { %v14690_v23 = vpop.permute.xlu1 %11397 }
 0x61b   : > { %10573 = vrot.lane.b32.xlu0 %v10558_v34, %s12159_s20  ;;  %v11198_v34 = vmul.f32 %v14679_v38, %v14634_v33  ;;  %v11400_v33 = vsel %vm402_vm7, %v14676_v45, %v14686_v16 }
 0x61c   : > { %10575 = vrot.lane.b32.xlu1 %v10559_v24, %s12159_s20 }
 0x61d   : > { %v8258_v13 = vpop.permute.xlu0 %8257 }
 0x61e   : > { %v8260_v41 = vpop.permute.xlu1 %8259 }
 0x61f   : > { %10567 = vrot.lane.b32.xlu0 %v10555_v0, %s12159_s20  ;;  %v8266_v55 = vsel %vm411_vm8, %v8258_v13, %v8260_v41  ;;  %v11399_v0 = vsel %vm402_vm7, %v14669_v30, %v14676_v45  ;;  %v11401_v45 = vsel %vm402_vm7, %v14686_v16, %v14690_v23 }
 0x620   : > { %10782 = vrot.lane.b32.xlu1 %v10769_v11, %s12158_s17  ;;  %8306 = vmatprep.subr.mxu0 %v8266_v55  ;;  %v12045_v11 = vld [vmem:[%s15127_s1 + $0x34] sm:$0xf] }
 0x621   : > { %v8262_v17 = vpop.permute.xlu0 %8261  ;;  %v8865_v59 = vrot.slane %v12045_v11, %v12229_v6  ;;  %v8861_v55 = vrot.slane %v12045_v11, %v15185_v63  ;;  %v12042_v6 = vld [vmem:[%s15130_s4 + $0x60] sm:$0xff]  ;;  %v8853_v16 = vrot.slane %v12045_v11, %v15184_v58 }
 0x622   : > { %v8267_v12 = vsel %vm411_vm8, %v8260_v41, %v8262_v17  ;;  %v8264_v27 = vpop.permute.xlu1 %8263  ;;  %v11408_v41 = vmul.f32 %v14477_v18, %v11399_v0  ;;  %v12058_v0 = vld [vmem:[%s15130_s4 + $0x80] sm:$0xff] }
 0x623   : > { %10784 = vrot.lane.b32.xlu0 %v10770_v26, %s12158_s17  ;;  %v8268_v61 = vsel %vm411_vm8, %v8262_v17, %v8264_v27  ;;  %v11409_v26 = vmul.f32 %v14450_v42, %v11400_v33  ;;  %v8857_v27 = vrot.slane %v12045_v11, %v12231_v7  ;;  %v8873_v63 = vmul.f32 %v14455_v53, %v8865_v59 }
 0x624   : > { %10786 = vrot.lane.b32.xlu1 %v10771_v9, %s12158_s17  ;;  %8377 = vmatprep.subr.mxu1 %v8268_v61  ;;  %v11410_v61 = vmul.f32 %v14455_v53, %v11401_v45  ;;  %v12062_v45 = vld [vmem:[%s15130_s4 + $0x88] sm:$0xff] }
 0x625   : > { %8378 = vmatpush1.msra.mxu1 %v8267_v12  ;;  %v8256_v44 = vpop.permute.xlu0 %8255  ;;  %v8871_v58 = vmul.f32 %v14477_v18, %v8857_v27 }
 0x626   : > { %v8265_v2 = vsel %vm411_vm8, %v8256_v44, %v8258_v13  ;;  %v14726_v48 = vpop.permute.xlu1 %11604  ;;  %12036 = vmatmul.mubr.msk.f32.vlgmr.msra.gmra.mxu1 %vm411_vm8, %v12034_v37  ;;  %v11411_v44 = vmul.f32 %v14679_v38, %v14690_v23  ;;  %v8870_v23 = vmul.f32 %v14464_v52, %v8853_v16 }
 0x627   : > { %10788 = vrot.lane.b32.xlu0 %v10772_v21, %s12158_s17  ;;  %8307 = vmatpush1.msra.mxu0 %v8265_v2  ;;  %v8872_v21 = vmul.f32 %v14450_v42, %v8861_v55  ;;  %v11407_v2 = vmul.f32 %v14464_v52, %v14669_v30  ;;  %v12046_v30 = vld [vmem:[%s15130_s4 + $0x68] sm:$0xff]  ;;  %v11620_v8 = vmul.f32 %v14464_v52, %v14726_v48 }
 0x628   : > { %10780 = vrot.lane.b32.xlu1 %v10768_v3, %s12158_s17  ;;  %12035 = vmatmul.mubr.msk.f32.vlgmr.msra.gmra.mxu0 %vm411_vm8, %v12034_v37 }
 0x629   : > { %v14736_v60 = vpop.permute.xlu0 %11606  ;;  %8624 = vmatprep.mubr.f32.mxu1 %v14679_v38  ;;  %8553 = vmatprep.mubr.f32.mxu0 %v14679_v38 }
 0x62a   : > { %v14744_v14 = vpop.permute.xlu1 %11608  ;;  %v11612_v19 = vsel %vm572_vm9, %v14726_v48, %v14736_v60 }
 0x62b   : > { %10995 = vrot.lane.b32.xlu0 %v10982_v15, %s12157_s14  ;;  %v11621_v15 = vmul.f32 %v14477_v18, %v11612_v19 }
 0x62c   : > { %10997 = vrot.lane.b32.xlu1 %v10983_v62, %s12157_s14  ;;  %v11613_v62 = vsel %vm572_vm9, %v14736_v60, %v14744_v14 }
 0x62d   : > { %v14749_v57 = vpop.permute.xlu0 %11610  ;;  %v11622_v18 = vmul.f32 %v14450_v42, %v11613_v62  ;;  %v12050_v42 = vld [vmem:[%s15130_s4 + $0x70] sm:$0xff]  ;;  %v12070_v62 = vld [vmem:[%s15130_s4 + $0x98] sm:$0xff] }
 0x62e   : > { %v8471_v25 = vpop.permute.xlu1 %8470 }
 0x62f   : > { %10999 = vrot.lane.b32.xlu0 %v10984_v5, %s12157_s14 }
 0x630   : > { %11001 = vrot.lane.b32.xlu1 %v10985_v50, %s12157_s14  ;;  %v11614_v50 = vsel %vm572_vm9, %v14744_v14, %v14749_v57 }
 0x631   : > { %v8473_v49 = vpop.permute.xlu0 %8472 }
 0x632   : > { %v8475_v32 = vpop.permute.xlu1 %8474  ;;  %v8479_v1 = vsel %vm15204_vm15, %v8471_v25, %v8473_v49  ;;  %vm15208_vm15 = vcmask 7168  }
 0x633   : > { %10993 = vrot.lane.b32.xlu0 %v10981_v31, %s12157_s14  ;;  %8519 = vmatprep.subr.mxu0 %v8479_v1  ;;  %v8480_v4 = vsel %vm15207_vm14, %v8473_v49, %v8475_v32 }
 0x634   : > { %11208 = vrot.lane.b32.xlu1 %v11195_v40, %s12156_s11 }
 0x635   : > { %v8477_v46 = vpop.permute.xlu0 %8476 }
 0x636   : > { %v8469_v56 = vpop.permute.xlu1 %8468  ;;  %v8481_v51 = vsel %vm15205_vm10, %v8475_v32, %v8477_v46  ;;  %vm15209_vm10 = vmmov %vm15208_vm15  ;;  %v12054_v46 = vld [vmem:[%s15130_s4 + $0x78] sm:$0xff] }
 0x637   : > { %v8478_v28 = vsel %vm15206_vm11, %v8469_v56, %v8471_v25  ;;  %11210 = vrot.lane.b32.xlu0 %v11196_v35, %s12156_s11  ;;  %8590 = vmatprep.subr.mxu1 %v8481_v51  ;;  %vm15210_vm11 = vmmov %vm15209_vm10  ;;  %v11623_v25 = vmul.f32 %v14455_v53, %v11614_v50  ;;  %v11624_v53 = vmul.f32 %v14679_v38, %v14749_v57  ;;  %v11799_v57 = vld [vmem:[%s15131_s5] sm:$0xff] }
 0x638   : > { %11212 = vrot.lane.b32.xlu1 %v11197_v10, %s12156_s11  ;;  %8520 = vmatpush1.msra.mxu0 %v8478_v28  ;;  %vm15211_vm14 = vmmov %vm15209_vm10 }
 0x639   : > { %8591 = vmatpush1.msra.mxu1 %v8480_v4  ;;  %v8684_v24 = vpop.permute.xlu0 %8683  ;;  %12039 = vmatmul.mubr.msk.f32.vlgmr.msra.gmra.mxu0 %vm411_vm8, %v12038_v39 }
 0x63a   : > { %v8686_v13 = vpop.permute.xlu1 %8685  ;;  %12040 = vmatmul.mubr.msk.f32.vlgmr.msra.gmra.mxu1 %vm411_vm8, %v12038_v39  ;;  %8766 = vmatprep.mubr.f32.mxu0 %v14679_v38 }
 0x63b   : > { %11214 = vrot.lane.b32.xlu0 %v11198_v34, %s12156_s11  ;;  %v8692_v47 = vsel %vm15208_vm15, %v8684_v24, %v8686_v13  ;;  %8837 = vmatprep.mubr.f32.mxu1 %v14679_v38  ;;  %vm15212_vm15 = vcmask 1039360  }
 0x63c   : > { %11206 = vrot.lane.b32.xlu1 %v11194_v54, %s12156_s11  ;;  %8732 = vmatprep.subr.mxu0 %v8692_v47 }
 0x63d   : > { %v8688_v43 = vpop.permute.xlu0 %8687 }
 0x63e   : > { %v8693_v17 = vsel %vm15209_vm10, %v8686_v13, %v8688_v43  ;;  %v8690_v9 = vpop.permute.xlu1 %8689  ;;  %vm15213_vm10 = vmmov %vm15212_vm15 }
 0x63f   : > { %11421 = vrot.lane.b32.xlu0 %v11408_v41, %s12155_s8  ;;  %v8694_v12 = vsel %vm15210_vm11, %v8688_v43, %v8690_v9  ;;  %vm15214_vm11 = vmmov %vm15213_vm10 }
 0x640   : > { %11423 = vrot.lane.b32.xlu1 %v11409_v26, %s12155_s8  ;;  %8803 = vmatprep.subr.mxu1 %v8694_v12 }
 0x641   : > { %8804 = vmatpush1.msra.mxu1 %v8693_v17  ;;  %v8682_v37 = vpop.permute.xlu0 %8681 }
 0x642   : > { %v8691_v3 = vsel %vm15211_vm14, %v8682_v37, %v8684_v24  ;;  %8980 = vmatprep.subr.mxu1 %v8873_v63  ;;  %v9079_v7 = vpop.permute.xlu1 %9078  ;;  %12044 = vmatmul.mubr.msk.f32.vlgmr.msra.gmra.mxu1 %vm411_vm8, %v12042_v6  ;;  %vm15215_vm14 = vmmov %vm15213_vm10 }
 0x643   : > { %8981 = vmatpush1.msra.mxu1 %v8872_v21  ;;  %11425 = vrot.lane.b32.xlu0 %v11410_v61, %s12155_s8  ;;  %v12066_v21 = vld [vmem:[%s15130_s4 + $0x90] sm:$0xff] }
 0x644   : > { %11427 = vrot.lane.b32.xlu1 %v11411_v44, %s12155_s8  ;;  %8733 = vmatpush1.msra.mxu0 %v8691_v3 }
 0x645   : > { %8909 = vmatprep.subr.mxu0 %v8871_v58  ;;  %v9081_v22 = vpop.permute.xlu0 %9080  ;;  %12043 = vmatmul.mubr.msk.f32.vlgmr.msra.gmra.mxu0 %vm411_vm8, %v12042_v6 }
 0x646   : > { %8910 = vmatpush1.msra.mxu0 %v8870_v23  ;;  %v9083_v29 = vpop.permute.xlu1 %9082  ;;  %v9087_v5 = vsel %vm15212_vm15, %v9079_v7, %v9081_v22  ;;  %8943 = vmatprep.mubr.f32.mxu0 %v14679_v38 }
 0x647   : > { %11419 = vrot.lane.b32.xlu0 %v11407_v2, %s12155_s8  ;;  %9127 = vmatprep.subr.mxu0 %v9087_v5  ;;  %v9088_v49 = vsel %vm15215_vm14, %v9081_v22, %v9083_v29 }
 0x648   : > { %11634 = vrot.lane.b32.xlu1 %v11621_v15, %s12154_s25  ;;  %9014 = vmatprep.mubr.f32.mxu1 %v14679_v38 }
 0x649   : > { %v9085_v60 = vpop.permute.xlu0 %9084  ;;  %12047 = vmatmul.mubr.msk.f32.vlgmr.msra.gmra.mxu0 %vm411_vm8, %v12046_v30  ;;  %12048 = vmatmul.mubr.msk.f32.vlgmr.msra.gmra.mxu1 %vm411_vm8, %v12046_v30 }
 0x64a   : > { %v9077_v36 = vpop.permute.xlu1 %9076  ;;  %v9089_v31 = vsel %vm15213_vm10, %v9083_v29, %v9085_v60  ;;  %9232 = vmatprep.mubr.f32.mxu1 %v14679_v38  ;;  %9161 = vmatprep.mubr.f32.mxu0 %v14679_v38 }
 0x64b   : > { %v9086_v14 = vsel %vm15214_vm11, %v9077_v36, %v9079_v7  ;;  %11636 = vrot.lane.b32.xlu0 %v11622_v18, %s12154_s25  ;;  %9198 = vmatprep.subr.mxu1 %v9089_v31 }
 0x64c   : > { %11638 = vrot.lane.b32.xlu1 %v11623_v25, %s12154_s25  ;;  %9128 = vmatpush1.msra.mxu0 %v9086_v14  ;;  %v12074_v14 = vld [vmem:[%s15130_s4 + $0xa0] sm:$0xff] }
 0x64d   : > { %9199 = vmatpush1.msra.mxu1 %v9088_v49  ;;  %v9292_v40 = vpop.permute.xlu0 %9291  ;;  %12051 = vmatmul.mubr.msk.f32.vlgmr.msra.gmra.mxu0 %vm411_vm8, %v12050_v42 }
 0x64e   : > { %v9294_v32 = vpop.permute.xlu1 %9293  ;;  %12052 = vmatmul.mubr.msk.f32.vlgmr.msra.gmra.mxu1 %vm411_vm8, %v12050_v42  ;;  %9374 = vmatprep.mubr.f32.mxu0 %v14679_v38 }
 0x64f   : > { %11640 = vrot.lane.b32.xlu0 %v11624_v53, %s12154_s25  ;;  %v9300_v1 = vsel %vm2687_vm13, %v9292_v40, %v9294_v32  ;;  %9445 = vmatprep.mubr.f32.mxu1 %v14679_v38 }
 0x650   : > { %11632 = vrot.lane.b32.xlu1 %v11620_v8, %s12154_s25  ;;  %9340 = vmatprep.subr.mxu0 %v9300_v1  ;;  %s12104_s25 = sshll.u32 %s15237_s22, 5 }
 0x651   : > { %v9296_v20 = vpop.permute.xlu0 %9295  ;;  %s251_s7 = scalar_lea.vmem %s15132_s6, %s12104_s25 }
 0x652   : > { %v9301_v52 = vsel %vm2687_vm13, %v9294_v32, %v9296_v20  ;;  %v9298_v48 = vpop.permute.xlu1 %9297 }
 0x653   : > { %11802 = vperm.xlu0 %12132, %v11799_v57   ;;  %v9302_v35 = vsel %vm2687_vm13, %v9296_v20, %v9298_v48 }
 0x654   : > { %9411 = vmatprep.subr.mxu1 %v9302_v35 }
 0x655   : > { %9412 = vmatpush1.msra.mxu1 %v9301_v52  ;;  %v9290_v10 = vpop.permute.xlu0 %9289  ;;  %v12078_v52 = vld [vmem:[%s15130_s4 + $0xa8] sm:$0xff] }
 0x656   : > { %v9299_v56 = vsel %vm2687_vm13, %v9290_v10, %v9292_v40  ;;  %v9505_v51 = vpop.permute.xlu1 %9504  ;;  %12056 = vmatmul.mubr.msk.f32.vlgmr.msra.gmra.mxu1 %vm411_vm8, %v12054_v46  ;;  %vm15216_vm13 = vcmask 973824  }
 0x657   : > { %9341 = vmatpush1.msra.mxu0 %v9299_v56  ;;  %9658 = vmatprep.mubr.f32.mxu1 %v14679_v38  ;;  %vm15217_vm15 = vmmov %vm15216_vm13 }
 0x658   : > { %12055 = vmatmul.mubr.msk.f32.vlgmr.msra.gmra.mxu0 %vm411_vm8, %v12054_v46 }
 0x659   : > { %v9507_v28 = vpop.permute.xlu0 %9506  ;;  %9587 = vmatprep.mubr.f32.mxu0 %v14679_v38 }
 0x65a   : > { %v9509_v39 = vpop.permute.xlu1 %9508  ;;  %v9513_v4 = vsel %vm2472_vm12, %v9505_v51, %v9507_v28 }
 0x65b   : > { %9553 = vmatprep.subr.mxu0 %v9513_v4  ;;  %v9514_v13 = vsel %vm2472_vm12, %v9507_v28, %v9509_v39 }
 0x65d   : > { %v9511_v34 = vpop.permute.xlu0 %9510 }
 0x65e   : > { %v9503_v24 = vpop.permute.xlu1 %9502  ;;  %v9515_v54 = vsel %vm2472_vm12, %v9509_v39, %v9511_v34  ;;  %v12082_v34 = vld [vmem:[%s15130_s4 + $0xb0] sm:$0xff] }
 0x65f   : > { %v9512_v11 = vsel %vm2472_vm12, %v9503_v24, %v9505_v51  ;;  %9624 = vmatprep.subr.mxu1 %v9515_v54  ;;  %vm15218_vm12 = vmmov %vm15216_vm13 }
 0x660   : > { %9554 = vmatpush1.msra.mxu0 %v9512_v11  ;;  %9625 = vmatpush1.msra.mxu1 %v9514_v13  ;;  %vm15219_vm10 = vmmov %vm15218_vm12 }
 0x661   : > { %v9718_v33 = vpop.permute.xlu0 %9717  ;;  %12060 = vmatmul.mubr.msk.f32.vlgmr.msra.gmra.mxu1 %vm411_vm8, %v12058_v0  ;;  %12059 = vmatmul.mubr.msk.f32.vlgmr.msra.gmra.mxu0 %vm411_vm8, %v12058_v0 }
 0x662   : > { %v9720_v47 = vpop.permute.xlu1 %9719  ;;  %9800 = vmatprep.mubr.f32.mxu0 %v14679_v38  ;;  %9871 = vmatprep.mubr.f32.mxu1 %v14679_v38 }
 0x663   : > { %v9726_v59 = vsel %vm15216_vm13, %v9718_v33, %v9720_v47 }
 0x664   : > { %9766 = vmatprep.subr.mxu0 %v9726_v59 }
 0x665   : > { %v9722_v41 = vpop.permute.xlu0 %9721 }
 0x666   : > { %v9727_v43 = vsel %vm15217_vm15, %v9720_v47, %v9722_v41  ;;  %v9724_v55 = vpop.permute.xlu1 %9723 }
 0x667   : > { %v9728_v26 = vsel %vm15218_vm12, %v9722_v41, %v9724_v55 }
 0x668   : > { %9837 = vmatprep.subr.mxu1 %v9728_v26 }
 0x669   : > { %9838 = vmatpush1.msra.mxu1 %v9727_v43  ;;  %v9716_v17 = vpop.permute.xlu0 %9715  ;;  %v12086_v43 = vld [vmem:[%s15130_s4 + $0xb8] sm:$0xff] }
 0x66a   : > { %v9725_v9 = vsel %vm15219_vm10, %v9716_v17, %v9718_v33  ;;  %v9931_v12 = vpop.permute.xlu1 %9930  ;;  %12064 = vmatmul.mubr.msk.f32.vlgmr.msra.gmra.mxu1 %vm411_vm8, %v12062_v45 }
 0x66b   : > { %9767 = vmatpush1.msra.mxu0 %v9725_v9  ;;  %10084 = vmatprep.mubr.f32.mxu1 %v14679_v38 }
 0x66c   : > { %12063 = vmatmul.mubr.msk.f32.vlgmr.msra.gmra.mxu0 %vm411_vm8, %v12062_v45 }
 0x66d   : > { %v9933_v6 = vpop.permute.xlu0 %9932  ;;  %10013 = vmatprep.mubr.f32.mxu0 %v14679_v38 }
 0x66e   : > { %v9935_v27 = vpop.permute.xlu1 %9934  ;;  %v9939_v63 = vsel %vm572_vm9, %v9931_v12, %v9933_v6 }
 0x66f   : > { %9979 = vmatprep.subr.mxu0 %v9939_v63  ;;  %v9940_v44 = vsel %vm572_vm9, %v9933_v6, %v9935_v27 }
 0x671   : > { %v9937_v16 = vpop.permute.xlu0 %9936 }
 0x672   : > { %v9929_v61 = vpop.permute.xlu1 %9928  ;;  %v9941_v37 = vsel %vm572_vm9, %v9935_v27, %v9937_v16  ;;  %v12090_v16 = vld [vmem:[%s15130_s4 + $0xc0] sm:$0xff] }
 0x673   : > { %v9938_v3 = vsel %vm572_vm9, %v9929_v61, %v9931_v12  ;;  %10050 = vmatprep.subr.mxu1 %v9941_v37 }
 0x674   : > { %9980 = vmatpush1.msra.mxu0 %v9938_v3  ;;  %10051 = vmatpush1.msra.mxu1 %v9940_v44 }
 0x675   : > { %v10144_v7 = vpop.permute.xlu0 %10143  ;;  %12068 = vmatmul.mubr.msk.f32.vlgmr.msra.gmra.mxu1 %vm411_vm8, %v12066_v21  ;;  %12067 = vmatmul.mubr.msk.f32.vlgmr.msra.gmra.mxu0 %vm411_vm8, %v12066_v21 }
 0x676   : > { %v10146_v19 = vpop.permute.xlu1 %10145  ;;  %10226 = vmatprep.mubr.f32.mxu0 %v14679_v38  ;;  %10297 = vmatprep.mubr.f32.mxu1 %v14679_v38 }
 0x677   : > { %v10152_v58 = vsel %vm402_vm7, %v10144_v7, %v10146_v19 }
 0x678   : > { %10192 = vmatprep.subr.mxu0 %v10152_v58 }
 0x679   : > { %v10148_v23 = vpop.permute.xlu0 %10147 }
 0x67a   : > { %v10153_v2 = vsel %vm402_vm7, %v10146_v19, %v10148_v23  ;;  %v10150_v22 = vpop.permute.xlu1 %10149 }
 0x67b   : > { %v10154_v15 = vsel %vm402_vm7, %v10148_v23, %v10150_v22 }
 0x67c   : > { %10263 = vmatprep.subr.mxu1 %v10154_v15 }
 0x67d   : > { %10264 = vmatpush1.msra.mxu1 %v10153_v2  ;;  %v10142_v29 = vpop.permute.xlu0 %10141  ;;  %v12094_v2 = vld [vmem:[%s15130_s4 + $0xc8] sm:$0xff] }
 0x67e   : > { %v10151_v5 = vsel %vm402_vm7, %v10142_v29, %v10144_v7  ;;  %v10357_v30 = vpop.permute.xlu1 %10356  ;;  %12072 = vmatmul.mubr.msk.f32.vlgmr.msra.gmra.mxu1 %vm411_vm8, %v12070_v62 }
 0x67f   : > { %10193 = vmatpush1.msra.mxu0 %v10151_v5  ;;  %10510 = vmatprep.mubr.f32.mxu1 %v14679_v38 }
 0x680   : > { %12071 = vmatmul.mubr.msk.f32.vlgmr.msra.gmra.mxu0 %vm411_vm8, %v12070_v62 }
 0x681   : > { %v10359_v50 = vpop.permute.xlu0 %10358  ;;  %10439 = vmatprep.mubr.f32.mxu0 %v14679_v38 }
 0x682   : > { %v10361_v18 = vpop.permute.xlu1 %10360  ;;  %v10365_v60 = vsel %vm784_vm6, %v10357_v30, %v10359_v50 }
 0x683   : > { %10405 = vmatprep.subr.mxu0 %v10365_v60  ;;  %v10366_v42 = vsel %vm784_vm6, %v10359_v50, %v10361_v18 }
 0x685   : > { %v10363_v25 = vpop.permute.xlu0 %10362 }
 0x686   : > { %v10355_v36 = vpop.permute.xlu1 %10354  ;;  %v10367_v31 = vsel %vm784_vm6, %v10361_v18, %v10363_v25  ;;  %v12098_v25 = vld [vmem:[%s15130_s4 + $0xd0] sm:$0xff] }
 0x687   : > { %v10364_v49 = vsel %vm784_vm6, %v10355_v36, %v10357_v30  ;;  %10476 = vmatprep.subr.mxu1 %v10367_v31 }
 0x688   : > { %10406 = vmatpush1.msra.mxu0 %v10364_v49  ;;  %10477 = vmatpush1.msra.mxu1 %v10366_v42  ;;  %v6332_v42 = vpop.f32.mrf.mxu1 }
 0x689   : > { %12075 = vmatmul.mubr.msk.f32.vlgmr.msra.gmra.mxu0 %vm411_vm8, %v12074_v14  ;;  %v10570_v53 = vpop.permute.xlu0 %10569  ;;  %12076 = vmatmul.mubr.msk.f32.vlgmr.msra.gmra.mxu1 %vm411_vm8, %v12074_v14  ;;  %v6261_v14 = vpop.f32.mrf.mxu0 }
 0x68a   : > { %v10572_v40 = vpop.permute.xlu1 %10571  ;;  %10723 = vmatprep.mubr.f32.mxu1 %v14679_v38  ;;  %10652 = vmatprep.mubr.f32.mxu0 %v14679_v38  ;;  %v6334_v49 = vpop.f32.mrf.mxu1 }
 0x68b   : > { %v10578_v8 = vsel %vm1000_vm5, %v10570_v53, %v10572_v40 }
 0x68c   : > { %10618 = vmatprep.subr.mxu0 %v10578_v8 }
 0x68d   : > { %v10574_v32 = vpop.permute.xlu0 %10573 }
 0x68e   : > { %v10579_v1 = vsel %vm1000_vm5, %v10572_v40, %v10574_v32  ;;  %v10576_v57 = vpop.permute.xlu1 %10575  ;;  %v6500_v40 = vpop.f32.mrf.mxu1 }
 0x68f   : > { %v10580_v20 = vsel %vm1000_vm5, %v10574_v32, %v10576_v57 }
 0x690   : > { %10689 = vmatprep.subr.mxu1 %v10580_v20  ;;  %v6502_v32 = vpop.f32.mrf.mxu1 }
 0x691   : > { %10690 = vmatpush1.msra.mxu1 %v10579_v1  ;;  %v10568_v48 = vpop.permute.xlu0 %10567 }
 0x692   : > { %v10577_v35 = vsel %vm1000_vm5, %v10568_v48, %v10570_v53  ;;  %12080 = vmatmul.mubr.msk.f32.vlgmr.msra.gmra.mxu1 %vm411_vm8, %v12078_v52  ;;  %v10783_v46 = vpop.permute.xlu1 %10782  ;;  %v6709_v57 = vpop.f32.mrf.mxu1 }
 0x693   : > { %10619 = vmatpush1.msra.mxu0 %v10577_v35  ;;  %10936 = vmatprep.mubr.f32.mxu1 %v14679_v38 }
 0x694   : > { %12079 = vmatmul.mubr.msk.f32.vlgmr.msra.gmra.mxu0 %vm411_vm8, %v12078_v52  ;;  %v6711_v52 = vpop.f32.mrf.mxu1 }
 0x695   : > { %v10785_v10 = vpop.permute.xlu0 %10784  ;;  %10865 = vmatprep.mubr.f32.mxu0 %v14679_v38 }
 0x696   : > { %v10787_v56 = vpop.permute.xlu1 %10786  ;;  %v10791_v51 = vsel %vm1185_vm4, %v10783_v46, %v10785_v10  ;;  %v6922_v35 = vpop.f32.mrf.mxu1 }
 0x697   : > { %10831 = vmatprep.subr.mxu0 %v10791_v51  ;;  %v10792_v24 = vsel %vm1185_vm4, %v10785_v10, %v10787_v56 }
 0x698   : > { %v6924_v10 = vpop.f32.mrf.mxu1 }
 0x699   : > { %v10789_v28 = vpop.permute.xlu0 %10788 }
 0x69a   : > { %v10781_v39 = vpop.permute.xlu1 %10780  ;;  %v10793_v4 = vsel %vm1185_vm4, %v10787_v56, %v10789_v28  ;;  %v7135_v51 = vpop.f32.mrf.mxu1 }
 0x69b   : > { %v10790_v54 = vsel %vm1185_vm4, %v10781_v39, %v10783_v46  ;;  %10902 = vmatprep.subr.mxu1 %v10793_v4 }
 0x69c   : > { %10832 = vmatpush1.msra.mxu0 %v10790_v54  ;;  %10903 = vmatpush1.msra.mxu1 %v10792_v24  ;;  %v7137_v39 = vpop.f32.mrf.mxu1 }
 0x69d   : > { %12083 = vmatmul.mubr.msk.f32.vlgmr.msra.gmra.mxu0 %vm411_vm8, %v12082_v34  ;;  %v10996_v0 = vpop.permute.xlu0 %10995  ;;  %12084 = vmatmul.mubr.msk.f32.vlgmr.msra.gmra.mxu1 %vm411_vm8, %v12082_v34 }
 0x69e   : > { %v10998_v13 = vpop.permute.xlu1 %10997  ;;  %11149 = vmatprep.mubr.f32.mxu1 %v14679_v38  ;;  %11078 = vmatprep.mubr.f32.mxu0 %v14679_v38  ;;  %v7348_v34 = vpop.f32.mrf.mxu1 }
 0x69f   : > { %v11004_v11 = vsel %vm969_vm3, %v10996_v0, %v10998_v13 }
 0x6a0   : > { %11044 = vmatprep.subr.mxu0 %v11004_v11  ;;  %v7350_v54 = vpop.f32.mrf.mxu1 }
 0x6a1   : > { %v11000_v33 = vpop.permute.xlu0 %10999 }
 0x6a2   : > { %v11005_v47 = vsel %vm969_vm3, %v10998_v13, %v11000_v33  ;;  %v11002_v59 = vpop.permute.xlu1 %11001  ;;  %v7561_v13 = vpop.f32.mrf.mxu1 }
 0x6a3   : > { %v11006_v41 = vsel %vm969_vm3, %v11000_v33, %v11002_v59 }
 0x6a4   : > { %11115 = vmatprep.subr.mxu1 %v11006_v41  ;;  %v7563_v33 = vpop.f32.mrf.mxu1 }
 0x6a5   : > { %11116 = vmatpush1.msra.mxu1 %v11005_v47  ;;  %v10994_v55 = vpop.permute.xlu0 %10993 }
 0x6a6   : > { %v11003_v26 = vsel %vm969_vm3, %v10994_v55, %v10996_v0  ;;  %12088 = vmatmul.mubr.msk.f32.vlgmr.msra.gmra.mxu1 %vm411_vm8, %v12086_v43  ;;  %v11209_v45 = vpop.permute.xlu1 %11208 }
 0x6a7   : > { %11045 = vmatpush1.msra.mxu0 %v11003_v26  ;;  %11362 = vmatprep.mubr.f32.mxu1 %v14679_v38 }
 0x6a8   : > { %12087 = vmatmul.mubr.msk.f32.vlgmr.msra.gmra.mxu0 %vm411_vm8, %v12086_v43 }
 0x6a9   : > { %v11211_v17 = vpop.permute.xlu0 %11210  ;;  %11291 = vmatprep.mubr.f32.mxu0 %v14679_v38 }
 0x6aa   : > { %v11213_v9 = vpop.permute.xlu1 %11212  ;;  %v11217_v12 = vsel %vm753_vm2, %v11209_v45, %v11211_v17 }
 0x6ab   : > { %11257 = vmatprep.subr.mxu0 %v11217_v12  ;;  %v11218_v61 = vsel %vm753_vm2, %v11211_v17, %v11213_v9 }
 0x6ad   : > { %v11215_v6 = vpop.permute.xlu0 %11214 }
 0x6ae   : > { %v11207_v27 = vpop.permute.xlu1 %11206  ;;  %v11219_v63 = vsel %vm753_vm2, %v11213_v9, %v11215_v6 }
 0x6af   : > { %v11216_v37 = vsel %vm753_vm2, %v11207_v27, %v11209_v45  ;;  %11328 = vmatprep.subr.mxu1 %v11219_v63 }
 0x6b0   : > { %11258 = vmatpush1.msra.mxu0 %v11216_v37  ;;  %11329 = vmatpush1.msra.mxu1 %v11218_v61 }
 0x6b1   : > { %12091 = vmatmul.mubr.msk.f32.vlgmr.msra.gmra.mxu0 %vm411_vm8, %v12090_v16  ;;  %v11422_v21 = vpop.permute.xlu0 %11421  ;;  %12092 = vmatmul.mubr.msk.f32.vlgmr.msra.gmra.mxu1 %vm411_vm8, %v12090_v16 }
 0x6b2   : > { %v11424_v44 = vpop.permute.xlu1 %11423  ;;  %11575 = vmatprep.mubr.f32.mxu1 %v14679_v38  ;;  %11504 = vmatprep.mubr.f32.mxu0 %v14679_v38  ;;  %v15007_v59 = vpop.f32.mrf.mxu1 }
 0x6b3   : > { %v11430_v3 = vsel %vm371_vm0, %v11422_v21, %v11424_v44 }
 0x6b4   : > { %11470 = vmatprep.subr.mxu0 %v11430_v3  ;;  %v15011_v43 = vpop.f32.mrf.mxu1 }
 0x6b5   : > { %v11426_v7 = vpop.permute.xlu0 %11425 }
 0x6b6   : > { %v11431_v19 = vsel %vm371_vm0, %v11424_v44, %v11426_v7  ;;  %v11428_v58 = vpop.permute.xlu1 %11427 }
 0x6b7   : > { %v11432_v23 = vsel %vm371_vm0, %v11426_v7, %v11428_v58 }
 0x6b8   : > { %11541 = vmatprep.subr.mxu1 %v11432_v23 }
 0x6b9   : > { %11542 = vmatpush1.msra.mxu1 %v11431_v19  ;;  %v11420_v22 = vpop.permute.xlu0 %11419 }
 0x6ba   : > { %v11429_v15 = vsel %vm371_vm0, %v11420_v22, %v11422_v21  ;;  %12096 = vmatmul.mubr.msk.f32.vlgmr.msra.gmra.mxu1 %vm411_vm8, %v12094_v2  ;;  %v11635_v62 = vpop.permute.xlu1 %11634 }
 0x6bb   : > { %11471 = vmatpush1.msra.mxu0 %v11429_v15  ;;  %11788 = vmatprep.mubr.f32.mxu1 %v14679_v38 }
 0x6bc   : > { %12095 = vmatmul.mubr.msk.f32.vlgmr.msra.gmra.mxu0 %vm411_vm8, %v12094_v2 }
 0x6bd   : > { %v11637_v29 = vpop.permute.xlu0 %11636  ;;  %11717 = vmatprep.mubr.f32.mxu0 %v14679_v38  ;;  %v6263_v38 = vpop.f32.mrf.mxu0 }
 0x6be   : > { %v11639_v5 = vpop.permute.xlu1 %11638  ;;  %v11643_v30 = vsel %vm329_vm1, %v11635_v62, %v11637_v29 }
 0x6bf   : > { %11683 = vmatprep.subr.mxu0 %v11643_v30  ;;  %v11644_v36 = vsel %vm329_vm1, %v11637_v29, %v11639_v5  ;;  %v6429_v53 = vpop.f32.mrf.mxu0  ;;  %v6501_v30 = vadd.f32 %v6500_v40, %v6332_v42 }
 0x6c1   : > { %v11641_v50 = vpop.permute.xlu0 %11640  ;;  %v6431_v8 = vpop.f32.mrf.mxu0 }
 0x6c2   : > { %v11633_v18 = vpop.permute.xlu1 %11632  ;;  %v11645_v60 = vsel %vm329_vm1, %v11639_v5, %v11641_v50  ;;  %v15015_v26 = vpop.f32.mrf.mxu1  ;;  %v6430_v5 = vadd.f32 %v6429_v53, %v6261_v14  ;;  %v6432_v50 = vadd.f32 %v6431_v8, %v6263_v38 }
 0x6c3   : > { %v11642_v31 = vsel %vm329_vm1, %v11633_v18, %v11635_v62  ;;  %11754 = vmatprep.subr.mxu1 %v11645_v60  ;;  %v6638_v1 = vpop.f32.mrf.mxu0  ;;  %v6503_v18 = vadd.f32 %v6502_v32, %v6334_v49 }
 0x6c4   : > { %11684 = vmatpush1.msra.mxu0 %v11642_v31  ;;  %11755 = vmatpush1.msra.mxu1 %v11644_v36  ;;  %v15019_v17 = vpop.f32.mrf.mxu1  ;;  %v6714_v36 = vadd.f32 %v6638_v1, %v6430_v5  ;;  %v6716_v31 = vadd.f32 %v6709_v57, %v6501_v30 }
 0x6c5   : > { %12099 = vmatmul.mubr.msk.f32.vlgmr.msra.gmra.mxu0 %vm411_vm8, %v12098_v25  ;;  %12100 = vmatmul.mubr.msk.f32.vlgmr.msra.gmra.mxu1 %vm411_vm8, %v12098_v25  ;;  %v6640_v20 = vpop.f32.mrf.mxu0 }
 0x6c7   : > { %v6851_v48 = vpop.f32.mrf.mxu0 }
 0x6c9   : > { %v6853_v46 = vpop.f32.mrf.mxu0 }
 0x6cb   : > { %v7064_v56 = vpop.f32.mrf.mxu0 }
 0x6cd   : > { %v7066_v28 = vpop.f32.mrf.mxu0 }
 0x6cf   : > { %v7277_v4 = vpop.f32.mrf.mxu0 }
 0x6d1   : > { %v7279_v24 = vpop.f32.mrf.mxu0 }
 0x6d3   : > { %v7490_v0 = vpop.f32.mrf.mxu0 }
 0x6d5   : > { %v7492_v11 = vpop.f32.mrf.mxu0 }
 0x6d6   : > { %v15023_v12 = vpop.f32.mrf.mxu1 }
 0x6d7   : > { %v15005_v47 = vpop.f32.mrf.mxu0 }
 0x6d8   : > { %v15027_v27 = vpop.f32.mrf.mxu1 }
 0x6d9   : > { %v15009_v41 = vpop.f32.mrf.mxu0 }
 0x6db   : > { %v15013_v55 = vpop.f32.mrf.mxu0 }
 0x6dd   : > { %v15017_v45 = vpop.f32.mrf.mxu0 }
 0x6df   : > { %v15021_v9 = vpop.f32.mrf.mxu0 }
 0x6e1   : > { %v15025_v6 = vpop.f32.mrf.mxu0 }
 0x6e6   : > { %v15031_v16 = vpop.f32.mrf.mxu1 }
 0x6e8   : > { %v15029_v63 = vpop.f32.mrf.mxu0  ;;  %v15035_v37 = vpop.f32.mrf.mxu1 }
 0x6ea   : > { %v15033_v61 = vpop.f32.mrf.mxu0 }
 0x6f9   : > { %v15037_v21 = vpop.f32.mrf.mxu0 }
 0x6fa   : > { %v15039_v44 = vpop.f32.mrf.mxu1 }
 0x6fb   : > { %v15041_v3 = vpop.f32.mrf.mxu0 }
 0x6fc   : > { %v15043_v7 = vpop.f32.mrf.mxu1 }
 0x702   : > { %v15047_v58 = vpop.f32.mrf.mxu1 }
 0x703   : > { %15221 = vst [vmem:[#allocation14_spill] sm:$0xff] %v15047_v58 }
 0x704   : > { %v15051_v2 = vpop.f32.mrf.mxu1 }
 0x705   : > { %v15045_v19 = vpop.f32.mrf.mxu0  ;;  %15223 = vst [vmem:[#allocation15_spill] sm:$0xff] %v15051_v2  ;;  %v6717_v2 = vadd.f32 %v6711_v52, %v6503_v18 }
 0x706   : > { %15220 = vst [vmem:[#allocation12_spill] sm:$0xff] %v15045_v19 }
 0x707   : > { %v15049_v23 = vpop.f32.mrf.mxu0 }
 0x708   : > { %15222 = vst [vmem:[#allocation13_spill] sm:$0xff] %v15049_v23  ;;  %v6715_v23 = vadd.f32 %v6640_v20, %v6432_v50 }
 0x709   : > { %v15053_v22 = vpop.f32.mrf.mxu0  ;;  %v15055_v15 = vpop.f32.mrf.mxu1 }
 0x70a   : > { %15224 = vst [vmem:[#allocation16_spill] sm:$0xff] %v15053_v22  ;;  %15225 = vst [vmem:[#allocation9_spill] sm:$0xff] %v15055_v15  ;;  %v6927_v15 = vadd.f32 %v6851_v48, %v6714_v36  ;;  %v6928_v19 = vadd.f32 %v6853_v46, %v6715_v23 }
 0x70b   : > { %v15057_v62 = vpop.f32.mrf.mxu0  ;;  %v15059_v29 = vpop.f32.mrf.mxu1 }
 0x70c   : > { %15226 = vst [vmem:[#allocation17_spill] sm:$0xff] %v15057_v62  ;;  %15227 = vst [vmem:[#allocation10_spill] sm:$0xff] %v15059_v29  ;;  %v6929_v62 = vadd.f32 %v6922_v35, %v6716_v31  ;;  %v6930_v29 = vadd.f32 %v6924_v10, %v6717_v2  ;;  %v7140_v38 = vadd.f32 %v7064_v56, %v6927_v15  ;;  %v15229_v31 = vld [vmem:[#allocation14_spill] sm:$0xff] }
 0x70d   : > { %v15061_v60 = vpop.f32.mrf.mxu0  ;;  %v7141_v53 = vadd.f32 %v7066_v28, %v6928_v19  ;;  %v15228_v36 = vld [vmem:[#allocation12_spill] sm:$0xff] }
 0x70e   : > { %v15063_v25 = vpop.f32.mrf.mxu1  ;;  %v7142_v49 = vadd.f32 %v7135_v51, %v6929_v62  ;;  %v7143_v40 = vadd.f32 %v7137_v39, %v6930_v29  ;;  %v7353_v1 = vadd.f32 %v7277_v4, %v7140_v38 }
 0x70f   : > { %v15065_v58 = vpop.f32.mrf.mxu0  ;;  %v7354_v20 = vadd.f32 %v7279_v24, %v7141_v53  ;;  %v15230_v38 = vld [vmem:[#allocation13_spill] sm:$0xff] }
 0x710   : > { %v15067_v22 = vpop.f32.mrf.mxu1  ;;  %v7355_v57 = vadd.f32 %v7348_v34, %v7142_v49  ;;  %v7356_v52 = vadd.f32 %v7350_v54, %v7143_v40  ;;  %v7566_v46 = vadd.f32 %v7490_v0, %v7353_v1  ;;  %v15231_v49 = vld [vmem:[#allocation15_spill] sm:$0xff] }
 0x711   : > { %v7567_v23 = vadd.f32 %v7492_v11, %v7354_v20  ;;  %v15232_v1 = vld [vmem:[#allocation16_spill] sm:$0xff] }
 0x712   : > { %v7568_v10 = vadd.f32 %v7561_v13, %v7355_v57  ;;  %v7569_v2 = vadd.f32 %v7563_v33, %v7356_v52  ;;  %v7779_v28 = vadd.f32 %v15005_v47, %v7566_v46  ;;  %v15233_v57 = vld [vmem:[#allocation9_spill] sm:$0xff] }
 0x713   : > { %v7780_v19 = vadd.f32 %v15009_v41, %v7567_v23  ;;  %v15234_v52 = vld [vmem:[#allocation17_spill] sm:$0xff]  ;;  %v15235_v46 = vld [vmem:[#allocation10_spill] sm:$0xff] }
 0x714   : > { %v7781_v39 = vadd.f32 %v15007_v59, %v7568_v10  ;;  %v7782_v4 = vadd.f32 %v15011_v43, %v7569_v2  ;;  %v7992_v54 = vadd.f32 %v15013_v55, %v7779_v28 }
 0x715   : > { %v7993_v0 = vadd.f32 %v15017_v45, %v7780_v19 }
 0x716   : > { %v15071_v42 = vpop.f32.mrf.mxu1  ;;  %v7994_v15 = vadd.f32 %v15015_v26, %v7781_v39  ;;  %v7995_v13 = vadd.f32 %v15019_v17, %v7782_v4  ;;  %v8205_v47 = vadd.f32 %v15021_v9, %v7992_v54 }
 0x717   : > { %v8206_v41 = vadd.f32 %v15025_v6, %v7993_v0 }
 0x718   : > { %v15069_v14 = vpop.f32.mrf.mxu0  ;;  %v15075_v32 = vpop.f32.mrf.mxu1  ;;  %v8207_v59 = vadd.f32 %v15023_v12, %v7994_v15  ;;  %v8208_v43 = vadd.f32 %v15027_v27, %v7995_v13  ;;  %v8418_v55 = vadd.f32 %v15029_v63, %v8205_v47 }
 0x719   : > { %v8419_v45 = vadd.f32 %v15033_v61, %v8206_v41 }
 0x71a   : > { %v15073_v8 = vpop.f32.mrf.mxu0  ;;  %v8420_v26 = vadd.f32 %v15031_v16, %v8207_v59  ;;  %v8421_v17 = vadd.f32 %v15035_v37, %v8208_v43  ;;  %v8631_v9 = vadd.f32 %v15037_v21, %v8418_v55 }
 0x71b   : > { %v8632_v6 = vadd.f32 %v15041_v3, %v8419_v45 }
 0x71c   : > { %v8633_v12 = vadd.f32 %v15039_v44, %v8420_v26  ;;  %v8634_v27 = vadd.f32 %v15043_v7, %v8421_v17  ;;  %v8844_v63 = vadd.f32 %v15228_v36, %v8631_v9 }
 0x71d   : > { %v8845_v61 = vadd.f32 %v15230_v38, %v8632_v6 }
 0x71e   : > { %v8846_v16 = vadd.f32 %v15229_v31, %v8633_v12  ;;  %v8847_v37 = vadd.f32 %v15231_v49, %v8634_v27  ;;  %v9021_v21 = vadd.f32 %v15232_v1, %v8844_v63 }
 0x71f   : > { %v9022_v7 = vadd.f32 %v15234_v52, %v8845_v61 }
 0x720   : > { %v9023_v44 = vadd.f32 %v15233_v57, %v8846_v16  ;;  %v9024_v10 = vadd.f32 %v15235_v46, %v8847_v37  ;;  %v9239_v23 = vadd.f32 %v15061_v60, %v9021_v21 }
 0x721   : > { %v15077_v48 = vpop.f32.mrf.mxu0  ;;  %v15079_v35 = vpop.f32.mrf.mxu1  ;;  %v9240_v19 = vadd.f32 %v15065_v58, %v9022_v7 }
 0x722   : > { %v9241_v2 = vadd.f32 %v15063_v25, %v9023_v44  ;;  %v9242_v4 = vadd.f32 %v15067_v22, %v9024_v10  ;;  %v9452_v0 = vadd.f32 %v15069_v14, %v9239_v23 }
 0x723   : > { %v9591_v56 = vpop.f32.mrf.mxu0  ;;  %v9662_v51 = vpop.f32.mrf.mxu1  ;;  %v9453_v47 = vadd.f32 %v15073_v8, %v9240_v19 }
 0x724   : > { %v9454_v13 = vadd.f32 %v15071_v42, %v9241_v2  ;;  %v9455_v59 = vadd.f32 %v15075_v32, %v9242_v4  ;;  %v9665_v25 = vadd.f32 %v15077_v48, %v9452_v0 }
 0x725   : > { %v9666_v26 = vadd.f32 %v9591_v56, %v9453_v47 }
 0x726   : > { %v9667_v43 = vadd.f32 %v15079_v35, %v9454_v13  ;;  %v9668_v22 = vadd.f32 %v9662_v51, %v9455_v59 }
 0x72a   : > { %v9873_v24 = vpop.f32.mrf.mxu1 }
 0x72b   : > { %v9880_v17 = vadd.f32 %v9873_v24, %v9667_v43 }
 0x72c   : > { %v9802_v34 = vpop.f32.mrf.mxu0  ;;  %v9875_v33 = vpop.f32.mrf.mxu1 }
 0x72d   : > { %v9878_v45 = vadd.f32 %v9802_v34, %v9665_v25  ;;  %v9881_v42 = vadd.f32 %v9875_v33, %v9668_v22 }
 0x72e   : > { %v9804_v11 = vpop.f32.mrf.mxu0 }
 0x72f   : > { %v9879_v12 = vadd.f32 %v9804_v11, %v9666_v26 }
 0x735   : > { %v10015_v62 = vpop.f32.mrf.mxu0  ;;  %v10086_v29 = vpop.f32.mrf.mxu1 }
 0x736   : > { %v10091_v27 = vadd.f32 %v10015_v62, %v9878_v45  ;;  %v10093_v32 = vadd.f32 %v10086_v29, %v9880_v17 }
 0x737   : > { %v10017_v5 = vpop.f32.mrf.mxu0  ;;  %v10088_v30 = vpop.f32.mrf.mxu1 }
 0x738   : > { %v10092_v36 = vadd.f32 %v10017_v5, %v9879_v12  ;;  %v10094_v63 = vadd.f32 %v10088_v30, %v9881_v42 }
 0x73e   : > { %v10299_v18 = vpop.f32.mrf.mxu1 }
 0x73f   : > { %v10306_v35 = vadd.f32 %v10299_v18, %v10093_v32 }
 0x740   : > { %v10228_v50 = vpop.f32.mrf.mxu0  ;;  %v10301_v40 = vpop.f32.mrf.mxu1 }
 0x741   : > { %v10304_v16 = vadd.f32 %v10228_v50, %v10091_v27  ;;  %v10307_v51 = vadd.f32 %v10301_v40, %v10094_v63 }
 0x742   : > { %v10230_v53 = vpop.f32.mrf.mxu0 }
 0x743   : > { %v10305_v56 = vadd.f32 %v10230_v53, %v10092_v36 }
 0x749   : > { %v10441_v20 = vpop.f32.mrf.mxu0  ;;  %v10512_v3 = vpop.f32.mrf.mxu1 }
 0x74a   : > { %v10517_v34 = vadd.f32 %v10441_v20, %v10304_v16  ;;  %v10519_v24 = vadd.f32 %v10512_v3, %v10306_v35 }
 0x74b   : > { %v10443_v28 = vpop.f32.mrf.mxu0  ;;  %v10514_v39 = vpop.f32.mrf.mxu1 }
 0x74c   : > { %v10518_v49 = vadd.f32 %v10443_v28, %v10305_v56  ;;  %v10520_v37 = vadd.f32 %v10514_v39, %v10307_v51 }
 0x752   : > { %v10725_v54 = vpop.f32.mrf.mxu1 }
 0x753   : > { %v10732_v11 = vadd.f32 %v10725_v54, %v10519_v24  ;;  %v11803_v54 = vpop.permute.xlu0 %11802 }
 0x754   : > { %v10654_v15 = vpop.f32.mrf.mxu0  ;;  %v10727_v41 = vpop.f32.mrf.mxu1 }
 0x755   : > { %v10730_v33 = vadd.f32 %v10654_v15, %v10517_v34  ;;  %v10733_v62 = vadd.f32 %v10727_v41, %v10520_v37 }
 0x756   : > { %v10656_v60 = vpop.f32.mrf.mxu0 }
 0x757   : > { %v10731_v29 = vadd.f32 %v10656_v60, %v10518_v49 }
 0x75d   : > { %v10867_v55 = vpop.f32.mrf.mxu0  ;;  %v10938_v58 = vpop.f32.mrf.mxu1 }
 0x75e   : > { %v10943_v5 = vadd.f32 %v10867_v55, %v10730_v33  ;;  %v10945_v30 = vadd.f32 %v10938_v58, %v10732_v11 }
 0x75f   : > { %v10869_v9 = vpop.f32.mrf.mxu0  ;;  %v10940_v14 = vpop.f32.mrf.mxu1 }
 0x760   : > { %v10944_v50 = vadd.f32 %v10869_v9, %v10731_v29  ;;  %v10946_v18 = vadd.f32 %v10940_v14, %v10733_v62 }
 0x766   : > { %v11151_v6 = vpop.f32.mrf.mxu1 }
 0x767   : > { %v11158_v52 = vadd.f32 %v11151_v6, %v10945_v30 }
 0x768   : > { %v11080_v8 = vpop.f32.mrf.mxu0  ;;  %v11153_v31 = vpop.f32.mrf.mxu1 }
 0x769   : > { %v11156_v7 = vadd.f32 %v11080_v8, %v10943_v5  ;;  %v11159_v53 = vadd.f32 %v11153_v31, %v10946_v18 }
 0x76a   : > { %v11082_v48 = vpop.f32.mrf.mxu0 }
 0x76b   : > { %v11157_v40 = vadd.f32 %v11082_v48, %v10944_v50 }
 0x771   : > { %v11293_v38 = vpop.f32.mrf.mxu0  ;;  %v11364_v61 = vpop.f32.mrf.mxu1 }
 0x772   : > { %v11369_v20 = vadd.f32 %v11293_v38, %v11156_v7  ;;  %v11371_v3 = vadd.f32 %v11364_v61, %v11158_v52 }
 0x773   : > { %v11295_v1 = vpop.f32.mrf.mxu0  ;;  %v11366_v21 = vpop.f32.mrf.mxu1 }
 0x774   : > { %v11370_v23 = vadd.f32 %v11295_v1, %v11157_v40  ;;  %v11372_v2 = vadd.f32 %v11366_v21, %v11159_v53 }
 0x77a   : > { %v11577_v57 = vpop.f32.mrf.mxu1 }
 0x77b   : > { %v11584_v28 = vadd.f32 %v11577_v57, %v11371_v3 }
 0x77c   : > { %v11506_v44 = vpop.f32.mrf.mxu0  ;;  %v11579_v46 = vpop.f32.mrf.mxu1 }
 0x77d   : > { %v11582_v39 = vadd.f32 %v11506_v44, %v11369_v20  ;;  %v11585_v15 = vadd.f32 %v11579_v46, %v11372_v2 }
 0x77e   : > { %v11508_v10 = vpop.f32.mrf.mxu0 }
 0x77f   : > { %v11583_v0 = vadd.f32 %v11508_v10, %v11370_v23 }
 0x785   : > { %v11719_v19 = vpop.f32.mrf.mxu0  ;;  %v11790_v4 = vpop.f32.mrf.mxu1 }
 0x786   : > { %v11795_v13 = vadd.f32 %v11719_v19, %v11582_v39  ;;  %v11797_v47 = vadd.f32 %v11790_v4, %v11584_v28 }
 0x787   : > { %v11721_v59 = vpop.f32.mrf.mxu0  ;;  %v11792_v41 = vpop.f32.mrf.mxu1 }
 0x788   : > { %v11805_v60 = vadd.f32 %v11803_v54, %v11795_v13  ;;  %v11807_v25 = vadd.f32 %v11803_v54, %v11797_v47  ;;  %v11796_v43 = vadd.f32 %v11721_v59, %v11583_v0  ;;  %v11798_v55 = vadd.f32 %v11792_v41, %v11585_v15 }
 0x78a   : > { %vm11809_vm0 = vcmp.ge.f32.partialorder %v11805_v60, 0.0  ;;  %v11813_v58 = vmul.f32 0.01, %v11805_v60  ;;  %vm11811_vm1 = vcmp.ge.f32.partialorder %v11807_v25, 0.0  ;;  %v11815_v26 = vmul.f32 0.01, %v11807_v25 }
 0x78b   : > { %v11806_v22 = vadd.f32 %v11803_v54, %v11796_v43  ;;  %v11808_v45 = vadd.f32 %v11803_v54, %v11798_v55 }
 0x78c   : > { %v11817_v17 = vsel %vm11809_vm0, %v11805_v60, %v11813_v58  ;;  %v11819_v9 = vsel %vm11811_vm1, %v11807_v25, %v11815_v26 }
 0x78d   : > { %11821 = vst [vmem:[%s251_s7] sm:$0xff] %v11817_v17  ;;  %11823 = vst [vmem:[%s251_s7 + $0x10] sm:$0xff] %v11819_v9  ;;  %vm11810_vm2 = vcmp.ge.f32.partialorder %v11806_v22, 0.0  ;;  %v11814_v14 = vmul.f32 0.01, %v11806_v22  ;;  %vm11812_vm3 = vcmp.ge.f32.partialorder %v11808_v45, 0.0 }
 0x78e   : > { %v11816_v12 = vmul.f32 0.01, %v11808_v45 }
 0x78f   : > { %v11818_v42 = vsel %vm11810_vm2, %v11806_v22, %v11814_v14 }
 0x790   : > { %v11820_v6 = vsel %vm11812_vm3, %v11808_v45, %v11816_v12  ;;  %11822 = vst [vmem:[%s251_s7 + $0x8] sm:$0xff] %v11818_v42 }
 0x791   : > { %11824 = vst [vmem:[%s251_s7 + $0x18] sm:$0xff] %v11820_v6 }
 0x792 PF: > { %s16_s21 = sadd.s32 1, %s12151_s21  }
 0x793   : > { %p13_p4 = scmp.ge.s32.totalorder %s16_s21, 4  }
 0x795   :  { %15 = sbr.rel (!%p13_p4) target bundleno = 1 (0x1), region = 152 }

</bundles_post_ra>
